<compile_context>
chip_gen: v5e
topology: v5e:2x2
jax: 0.10.0
libtpu: 0.0.40
codegen_flags: <defaults>
</compile_context>

<pallas_src>
import functools

import jax
import jax.numpy as jnp
import numpy as np
from jax.experimental import pallas as pl
from jax.experimental.pallas import tpu as pltpu


def _shift(a, k, n):
    """result[..., i] = a[..., (i + k) % n]  -- lane-axis rotate on the XLU."""
    s = (-k) % n            # pltpu.roll follows np.roll semantics
    if s == 0:
        return a
    return pltpu.roll(a, s, 1)


# ----------------------------- fused kernel ---------------------------------
def _dilran_kernel(x_ref, w_ref, b_ref, o_ref, *, H, W, C):
    # x_ref : (1, C, H*W)   NCHW image, spatial flattened into lanes (r = h*W + w)
    # w_ref : (3, C, 3*C)   per-dy weight slab; columns ordered (dx, c_in)
    # b_ref : (C, 1)
    # o_ref : (1, C, H*W)
    HW = H * W
    x = x_ref[0]                                     # (C, HW)
    bias = b_ref[...]                                # (C, 1) -> lane broadcast
    w_dy = [w_ref[0], w_ref[1], w_ref[2]]            # hoisted; reused by 3 convs

    # Border masks per tap (lane index r -> (h, w)); combined and pre-broadcast
    # once, reused by all three convs.
    r = jax.lax.broadcasted_iota(jnp.int32, (1, HW), 1)
    w_idx = r % W
    tap_masks = []                                   # None == all-valid tap
    for dy in range(3):
        for dx in range(3):
            oy, ox = dy - 1, dx - 1
            conds = []
            if oy == -1:
                conds.append(r >= W)
            elif oy == 1:
                conds.append(r < (H - 1) * W)
            if ox == -1:
                conds.append(w_idx >= 1)
            elif ox == 1:
                conds.append(w_idx <= W - 2)
            mask = None
            for c in conds:
                mask = c if mask is None else jnp.logical_and(mask, c)
            if mask is not None:
                mask = jnp.broadcast_to(mask, (C, HW))
            tap_masks.append(mask)

    def conv(src):                                   # (C, HW) -> (C, HW)
        # K-chunked accumulation: one (3C, HW) chunk per kernel row dy, then
        # acc += W_dy(64,192) @ chunk -- no full 9-tap patch is materialized.
        acc = None
        for dy in range(3):
            taps = []
            for dx in range(3):
                t = _shift(src, (dy - 1) * W + (dx - 1), HW)
                m = tap_masks[dy * 3 + dx]
                if m is not None:
                    t = jnp.where(m, t, 0.0)
                taps.append(t)
            chunk = jnp.concatenate(taps, axis=0)    # (3C, HW), sublane-aligned
            part = jnp.dot(w_dy[dy], chunk, preferred_element_type=jnp.float32)
            acc = part if acc is None else acc + part
        return acc + bias

    c1 = conv(x)
    c2 = conv(c1)
    c3 = conv(c2)
    prev = c1 + c2 + c3

    # relu(nearest_up2(avgpool2(x))): pair-sum along w (adjacent lanes) and
    # replicate back, then the same along h (lanes W apart).  Wrapped lanes
    # are always overwritten by the parity selects, so no padding is needed.
    w_even = (r % 2) == 0
    h_even = (r % (2 * W)) < W
    t = x + _shift(x, 1, HW)
    t = jnp.where(w_even, t, _shift(t, -1, HW))
    s = t + _shift(t, W, HW)
    s = jnp.where(h_even, s, _shift(s, -W, HW))
    up = 0.25 * s

    o_ref[0] = jnp.maximum(up, 0.0) * prev + x


# ----------------------------- module wrapper -------------------------------
@jax.jit
def dilran_forward(x_nchw, w_oihw, b):
    """Matches DILRAN.forward. x_nchw: (N, 64, H, W) f32. Returns NCHW."""
    N, C, H, W = x_nchw.shape
    assert H % 2 == 0 and W % 2 == 0, "avgpool(2)+upsample(2) needs even H, W"
    HW = H * W
    assert C % 8 == 0 and HW % 128 == 0, "lane-dense (C, HW) layout"

    x = x_nchw.reshape(N, C, HW).astype(jnp.float32)        # no transpose needed
    # (O,I,3,3) -> (dy, O, dx, I) -> (3, O, 3*I): per-dy slabs whose column
    # order (dx, c_in) matches the kernel's K-chunk row order.
    w3 = jnp.transpose(w_oihw, (2, 0, 3, 1)).reshape(3, C, 3 * C).astype(jnp.float32)
    b_col = b.reshape(C, 1).astype(jnp.float32)

    kern = functools.partial(_dilran_kernel, H=H, W=W, C=C)
    out = pl.pallas_call(
        kern,
        out_shape=jax.ShapeDtypeStruct((N, C, HW), jnp.float32),
        grid=(N,),
        in_specs=[
            pl.BlockSpec((1, C, HW), lambda n: (n, 0, 0)),
            pl.BlockSpec((3, C, 3 * C), lambda n: (0, 0, 0)),
            pl.BlockSpec((C, 1), lambda n: (0, 0)),
        ],
        out_specs=pl.BlockSpec((1, C, HW), lambda n: (n, 0, 0)),
        compiler_params=pltpu.CompilerParams(
            dimension_semantics=("parallel",),        # batch across TCs on v7x
            vmem_limit_bytes=32 * 1024 * 1024,        # far above actual footprint
        ),
    )(x, w3, b_col)

    return out.reshape(N, C, H, W)


# ----------------------------- reference (pure JAX) --------------------------
def dilran_reference(x, w, b):
    def conv(v):
        y = jax.lax.conv_general_dilated(
            v, w, window_strides=(1, 1), padding="SAME",
            dimension_numbers=("NCHW", "OIHW", "NCHW"))
        return y + b[None, :, None, None]
    c1 = conv(x); c2 = conv(c1); c3 = conv(c2)
    prev = c1 + c2 + c3
    pooled = jax.lax.reduce_window(x, 0.0, jax.lax.add,
                                   (1, 1, 2, 2), (1, 1, 2, 2), "VALID") / 4.0
    up = jnp.repeat(jnp.repeat(pooled, 2, axis=2), 2, axis=3)
    return jnp.maximum(up, 0.0) * prev + x


if __name__ == "__main__":
    key = jax.random.PRNGKey(0)
    kx, kw, kb = jax.random.split(key, 3)

    N, C, H, W = 2, 64, 16, 16            # C=64 is fixed by the module
    x = jax.random.normal(kx, (N, C, H, W), dtype=jnp.float32)
    w = 0.05 * jax.random.normal(kw, (C, C, 3, 3), dtype=jnp.float32)
    b = 0.05 * jax.random.normal(kb, (C,), dtype=jnp.float32)

    out = jax.block_until_ready(dilran_forward(x, w, b))
    ref = jax.block_until_ready(dilran_reference(x, w, b))
    np.testing.assert_allclose(np.asarray(out), np.asarray(ref),
                               rtol=1e-4, atol=1e-4)
    print("KERNEL_OK")
</pallas_src>

<mosaic_0001>
module attributes {stable_mosaic.version = 11 : i64} {
  func.func @_dilran_kernel(%arg0: i32, %arg1: memref<1x64x256xf32, #tpu.memory_space<vmem>>, %arg2: memref<3x64x192xf32, #tpu.memory_space<vmem>>, %arg3: memref<64x1xf32, #tpu.memory_space<vmem>>, %arg4: memref<1x64x256xf32, #tpu.memory_space<vmem>>) attributes {dimension_semantics = [#tpu.dimension_semantics<parallel>], iteration_bounds = array<i64: 2>, scalar_prefetch = 0 : i64, scratch_operands = 0 : i64, tpu.core_type = #tpu.core_type<tc>, window_params = [{transform_indices = @transform_0, window_bounds = array<i64: 1, 64, 256>}, {pipeline_mode = #tpu.pipeline_mode<synchronous>, transform_indices = @transform_1, window_bounds = array<i64: 3, 64, 192>}, {pipeline_mode = #tpu.pipeline_mode<synchronous>, transform_indices = @transform_2, window_bounds = array<i64: 64, 1>}, {transform_indices = @transform_3, window_bounds = array<i64: 1, 64, 256>}]} {
    %c0 = arith.constant 0 : index
    %c0_0 = arith.constant 0 : index
    %c0_1 = arith.constant 0 : index
    %0 = vector.load %arg1[%c0, %c0_0, %c0_1] : memref<1x64x256xf32, #tpu.memory_space<vmem>>, vector<1x64x256xf32>
    %1 = vector.shape_cast %0 : vector<1x64x256xf32> to vector<64x256xf32>
    %c0_2 = arith.constant 0 : index
    %c0_3 = arith.constant 0 : index
    %2 = vector.load %arg3[%c0_2, %c0_3] : memref<64x1xf32, #tpu.memory_space<vmem>>, vector<64x1xf32>
    %c0_4 = arith.constant 0 : index
    %c0_5 = arith.constant 0 : index
    %c0_6 = arith.constant 0 : index
    %3 = vector.load %arg2[%c0_4, %c0_5, %c0_6] : memref<3x64x192xf32, #tpu.memory_space<vmem>>, vector<1x64x192xf32>
    %4 = vector.shape_cast %3 : vector<1x64x192xf32> to vector<64x192xf32>
    %c1 = arith.constant 1 : index
    %c0_7 = arith.constant 0 : index
    %c0_8 = arith.constant 0 : index
    %5 = vector.load %arg2[%c1, %c0_7, %c0_8] : memref<3x64x192xf32, #tpu.memory_space<vmem>>, vector<1x64x192xf32>
    %6 = vector.shape_cast %5 : vector<1x64x192xf32> to vector<64x192xf32>
    %c2 = arith.constant 2 : index
    %c0_9 = arith.constant 0 : index
    %c0_10 = arith.constant 0 : index
    %7 = vector.load %arg2[%c2, %c0_9, %c0_10] : memref<3x64x192xf32, #tpu.memory_space<vmem>>, vector<1x64x192xf32>
    %8 = vector.shape_cast %7 : vector<1x64x192xf32> to vector<64x192xf32>
    %9 = tpu.iota {dimensions = array<i32: 1>} : vector<1x256xi32>
    %c16_i32 = arith.constant 16 : i32
    %c0_i32 = arith.constant 0 : i32
    %10 = arith.cmpi eq, %c16_i32, %c0_i32 : i32
    %c1_i32 = arith.constant 1 : i32
    %11 = arith.select %10, %c1_i32, %c16_i32 : i32
    %12 = vector.broadcast %11 : i32 to vector<1x256xi32>
    %13 = arith.remsi %9, %12 : vector<1x256xi32>
    %c0_i32_11 = arith.constant 0 : i32
    %14 = vector.broadcast %c0_i32_11 : i32 to vector<1x256xi32>
    %15 = arith.cmpi ne, %13, %14 : vector<1x256xi32>
    %c0_i32_12 = arith.constant 0 : i32
    %16 = vector.broadcast %c0_i32_12 : i32 to vector<1x256xi32>
    %17 = arith.cmpi slt, %13, %16 : vector<1x256xi32>
    %c0_i32_13 = arith.constant 0 : i32
    %18 = arith.cmpi slt, %11, %c0_i32_13 : i32
    %19 = vector.broadcast %18 : i1 to vector<1x256xi1>
    %20 = vector.broadcast %19 : vector<1x256xi1> to vector<1x256xi1>
    %21 = arith.xori %17, %20 : vector<1x256xi1>
    %22 = arith.andi %21, %15 : vector<1x256xi1>
    %23 = vector.broadcast %11 : i32 to vector<1x256xi32>
    %24 = arith.addi %13, %23 : vector<1x256xi32>
    %25 = arith.select %22, %24, %13 : vector<1x256xi1>, vector<1x256xi32>
    %c16_i32_14 = arith.constant 16 : i32
    %26 = vector.broadcast %c16_i32_14 : i32 to vector<1x256xi32>
    %27 = arith.cmpi sge, %9, %26 : vector<1x256xi32>
    %c1_i32_15 = arith.constant 1 : i32
    %28 = vector.broadcast %c1_i32_15 : i32 to vector<1x256xi32>
    %29 = arith.cmpi sge, %25, %28 : vector<1x256xi32>
    %30 = arith.andi %27, %29 : vector<1x256xi1>
    %31 = vector.shape_cast %30 : vector<1x256xi1> to vector<1x256xi1>
    %32 = vector.broadcast %31 : vector<1x256xi1> to vector<64x256xi1>
    %c16_i32_16 = arith.constant 16 : i32
    %33 = vector.broadcast %c16_i32_16 : i32 to vector<1x256xi32>
    %34 = arith.cmpi sge, %9, %33 : vector<1x256xi32>
    %35 = vector.shape_cast %34 : vector<1x256xi1> to vector<1x256xi1>
    %36 = vector.broadcast %35 : vector<1x256xi1> to vector<64x256xi1>
    %c16_i32_17 = arith.constant 16 : i32
    %37 = vector.broadcast %c16_i32_17 : i32 to vector<1x256xi32>
    %38 = arith.cmpi sge, %9, %37 : vector<1x256xi32>
    %c14_i32 = arith.constant 14 : i32
    %39 = vector.broadcast %c14_i32 : i32 to vector<1x256xi32>
    %40 = arith.cmpi sle, %25, %39 : vector<1x256xi32>
    %41 = arith.andi %38, %40 : vector<1x256xi1>
    %42 = vector.shape_cast %41 : vector<1x256xi1> to vector<1x256xi1>
    %43 = vector.broadcast %42 : vector<1x256xi1> to vector<64x256xi1>
    %c1_i32_18 = arith.constant 1 : i32
    %44 = vector.broadcast %c1_i32_18 : i32 to vector<1x256xi32>
    %45 = arith.cmpi sge, %25, %44 : vector<1x256xi32>
    %46 = vector.shape_cast %45 : vector<1x256xi1> to vector<1x256xi1>
    %47 = vector.broadcast %46 : vector<1x256xi1> to vector<64x256xi1>
    %c14_i32_19 = arith.constant 14 : i32
    %48 = vector.broadcast %c14_i32_19 : i32 to vector<1x256xi32>
    %49 = arith.cmpi sle, %25, %48 : vector<1x256xi32>
    %50 = vector.shape_cast %49 : vector<1x256xi1> to vector<1x256xi1>
    %51 = vector.broadcast %50 : vector<1x256xi1> to vector<64x256xi1>
    %c240_i32 = arith.constant 240 : i32
    %52 = vector.broadcast %c240_i32 : i32 to vector<1x256xi32>
    %53 = arith.cmpi slt, %9, %52 : vector<1x256xi32>
    %c1_i32_20 = arith.constant 1 : i32
    %54 = vector.broadcast %c1_i32_20 : i32 to vector<1x256xi32>
    %55 = arith.cmpi sge, %25, %54 : vector<1x256xi32>
    %56 = arith.andi %53, %55 : vector<1x256xi1>
    %57 = vector.shape_cast %56 : vector<1x256xi1> to vector<1x256xi1>
    %58 = vector.broadcast %57 : vector<1x256xi1> to vector<64x256xi1>
    %c240_i32_21 = arith.constant 240 : i32
    %59 = vector.broadcast %c240_i32_21 : i32 to vector<1x256xi32>
    %60 = arith.cmpi slt, %9, %59 : vector<1x256xi32>
    %61 = vector.shape_cast %60 : vector<1x256xi1> to vector<1x256xi1>
    %62 = vector.broadcast %61 : vector<1x256xi1> to vector<64x256xi1>
    %c240_i32_22 = arith.constant 240 : i32
    %63 = vector.broadcast %c240_i32_22 : i32 to vector<1x256xi32>
    %64 = arith.cmpi slt, %9, %63 : vector<1x256xi32>
    %c14_i32_23 = arith.constant 14 : i32
    %65 = vector.broadcast %c14_i32_23 : i32 to vector<1x256xi32>
    %66 = arith.cmpi sle, %25, %65 : vector<1x256xi32>
    %67 = arith.andi %64, %66 : vector<1x256xi1>
    %68 = vector.shape_cast %67 : vector<1x256xi1> to vector<1x256xi1>
    %69 = vector.broadcast %68 : vector<1x256xi1> to vector<64x256xi1>
    %c17_i32 = arith.constant 17 : i32
    %70 = tpu.dynamic_rotate %1 by %c17_i32 dim 1 : vector<64x256xf32>, i32 -> vector<64x256xf32>
    %cst = arith.constant 0.000000e+00 : f32
    %71 = vector.broadcast %cst : f32 to vector<64x256xf32>
    %72 = arith.select %32, %70, %71 : vector<64x256xi1>, vector<64x256xf32>
    %c16_i32_24 = arith.constant 16 : i32
    %73 = tpu.dynamic_rotate %1 by %c16_i32_24 dim 1 : vector<64x256xf32>, i32 -> vector<64x256xf32>
    %cst_25 = arith.constant 0.000000e+00 : f32
    %74 = vector.broadcast %cst_25 : f32 to vector<64x256xf32>
    %75 = arith.select %36, %73, %74 : vector<64x256xi1>, vector<64x256xf32>
    %c15_i32 = arith.constant 15 : i32
    %76 = tpu.dynamic_rotate %1 by %c15_i32 dim 1 : vector<64x256xf32>, i32 -> vector<64x256xf32>
    %cst_26 = arith.constant 0.000000e+00 : f32
    %77 = vector.broadcast %cst_26 : f32 to vector<64x256xf32>
    %78 = arith.select %43, %76, %77 : vector<64x256xi1>, vector<64x256xf32>
    %79 = tpu.concatenate %72, %75, %78 in 0 : vector<64x256xf32>, vector<64x256xf32>, vector<64x256xf32> -> vector<192x256xf32>
    %cst_27 = arith.constant dense<0.000000e+00> : vector<64x256xf32>
    %80 = tpu.matmul %4, %79, %cst_27 {dimension_numbers = #tpu.dot_dimension_numbers<[1], [0], [0], [1], [0, 0, 1, 1], [], []>} : vector<64x192xf32>, vector<192x256xf32>, vector<64x256xf32> -> vector<64x256xf32>
    %c1_i32_28 = arith.constant 1 : i32
    %81 = tpu.dynamic_rotate %1 by %c1_i32_28 dim 1 : vector<64x256xf32>, i32 -> vector<64x256xf32>
    %cst_29 = arith.constant 0.000000e+00 : f32
    %82 = vector.broadcast %cst_29 : f32 to vector<64x256xf32>
    %83 = arith.select %47, %81, %82 : vector<64x256xi1>, vector<64x256xf32>
    %c255_i32 = arith.constant 255 : i32
    %84 = tpu.dynamic_rotate %1 by %c255_i32 dim 1 : vector<64x256xf32>, i32 -> vector<64x256xf32>
    %cst_30 = arith.constant 0.000000e+00 : f32
    %85 = vector.broadcast %cst_30 : f32 to vector<64x256xf32>
    %86 = arith.select %51, %84, %85 : vector<64x256xi1>, vector<64x256xf32>
    %87 = tpu.concatenate %83, %1, %86 in 0 : vector<64x256xf32>, vector<64x256xf32>, vector<64x256xf32> -> vector<192x256xf32>
    %cst_31 = arith.constant dense<0.000000e+00> : vector<64x256xf32>
    %88 = tpu.matmul %6, %87, %cst_31 {dimension_numbers = #tpu.dot_dimension_numbers<[1], [0], [0], [1], [0, 0, 1, 1], [], []>} : vector<64x192xf32>, vector<192x256xf32>, vector<64x256xf32> -> vector<64x256xf32>
    %89 = arith.addf %80, %88 : vector<64x256xf32>
    %c241_i32 = arith.constant 241 : i32
    %90 = tpu.dynamic_rotate %1 by %c241_i32 dim 1 : vector<64x256xf32>, i32 -> vector<64x256xf32>
    %cst_32 = arith.constant 0.000000e+00 : f32
    %91 = vector.broadcast %cst_32 : f32 to vector<64x256xf32>
    %92 = arith.select %58, %90, %91 : vector<64x256xi1>, vector<64x256xf32>
    %c240_i32_33 = arith.constant 240 : i32
    %93 = tpu.dynamic_rotate %1 by %c240_i32_33 dim 1 : vector<64x256xf32>, i32 -> vector<64x256xf32>
    %cst_34 = arith.constant 0.000000e+00 : f32
    %94 = vector.broadcast %cst_34 : f32 to vector<64x256xf32>
    %95 = arith.select %62, %93, %94 : vector<64x256xi1>, vector<64x256xf32>
    %c239_i32 = arith.constant 239 : i32
    %96 = tpu.dynamic_rotate %1 by %c239_i32 dim 1 : vector<64x256xf32>, i32 -> vector<64x256xf32>
    %cst_35 = arith.constant 0.000000e+00 : f32
    %97 = vector.broadcast %cst_35 : f32 to vector<64x256xf32>
    %98 = arith.select %69, %96, %97 : vector<64x256xi1>, vector<64x256xf32>
    %99 = tpu.concatenate %92, %95, %98 in 0 : vector<64x256xf32>, vector<64x256xf32>, vector<64x256xf32> -> vector<192x256xf32>
    %cst_36 = arith.constant dense<0.000000e+00> : vector<64x256xf32>
    %100 = tpu.matmul %8, %99, %cst_36 {dimension_numbers = #tpu.dot_dimension_numbers<[1], [0], [0], [1], [0, 0, 1, 1], [], []>} : vector<64x192xf32>, vector<192x256xf32>, vector<64x256xf32> -> vector<64x256xf32>
    %101 = arith.addf %89, %100 : vector<64x256xf32>
    %102 = vector.broadcast %2 : vector<64x1xf32> to vector<64x256xf32>
    %103 = arith.addf %101, %102 : vector<64x256xf32>
    %c17_i32_37 = arith.constant 17 : i32
    %104 = tpu.dynamic_rotate %103 by %c17_i32_37 dim 1 : vector<64x256xf32>, i32 -> vector<64x256xf32>
    %cst_38 = arith.constant 0.000000e+00 : f32
    %105 = vector.broadcast %cst_38 : f32 to vector<64x256xf32>
    %106 = arith.select %32, %104, %105 : vector<64x256xi1>, vector<64x256xf32>
    %c16_i32_39 = arith.constant 16 : i32
    %107 = tpu.dynamic_rotate %103 by %c16_i32_39 dim 1 : vector<64x256xf32>, i32 -> vector<64x256xf32>
    %cst_40 = arith.constant 0.000000e+00 : f32
    %108 = vector.broadcast %cst_40 : f32 to vector<64x256xf32>
    %109 = arith.select %36, %107, %108 : vector<64x256xi1>, vector<64x256xf32>
    %c15_i32_41 = arith.constant 15 : i32
    %110 = tpu.dynamic_rotate %103 by %c15_i32_41 dim 1 : vector<64x256xf32>, i32 -> vector<64x256xf32>
    %cst_42 = arith.constant 0.000000e+00 : f32
    %111 = vector.broadcast %cst_42 : f32 to vector<64x256xf32>
    %112 = arith.select %43, %110, %111 : vector<64x256xi1>, vector<64x256xf32>
    %113 = tpu.concatenate %106, %109, %112 in 0 : vector<64x256xf32>, vector<64x256xf32>, vector<64x256xf32> -> vector<192x256xf32>
    %cst_43 = arith.constant dense<0.000000e+00> : vector<64x256xf32>
    %114 = tpu.matmul %4, %113, %cst_43 {dimension_numbers = #tpu.dot_dimension_numbers<[1], [0], [0], [1], [0, 0, 1, 1], [], []>} : vector<64x192xf32>, vector<192x256xf32>, vector<64x256xf32> -> vector<64x256xf32>
    %c1_i32_44 = arith.constant 1 : i32
    %115 = tpu.dynamic_rotate %103 by %c1_i32_44 dim 1 : vector<64x256xf32>, i32 -> vector<64x256xf32>
    %cst_45 = arith.constant 0.000000e+00 : f32
    %116 = vector.broadcast %cst_45 : f32 to vector<64x256xf32>
    %117 = arith.select %47, %115, %116 : vector<64x256xi1>, vector<64x256xf32>
    %c255_i32_46 = arith.constant 255 : i32
    %118 = tpu.dynamic_rotate %103 by %c255_i32_46 dim 1 : vector<64x256xf32>, i32 -> vector<64x256xf32>
    %cst_47 = arith.constant 0.000000e+00 : f32
    %119 = vector.broadcast %cst_47 : f32 to vector<64x256xf32>
    %120 = arith.select %51, %118, %119 : vector<64x256xi1>, vector<64x256xf32>
    %121 = tpu.concatenate %117, %103, %120 in 0 : vector<64x256xf32>, vector<64x256xf32>, vector<64x256xf32> -> vector<192x256xf32>
    %cst_48 = arith.constant dense<0.000000e+00> : vector<64x256xf32>
    %122 = tpu.matmul %6, %121, %cst_48 {dimension_numbers = #tpu.dot_dimension_numbers<[1], [0], [0], [1], [0, 0, 1, 1], [], []>} : vector<64x192xf32>, vector<192x256xf32>, vector<64x256xf32> -> vector<64x256xf32>
    %123 = arith.addf %114, %122 : vector<64x256xf32>
    %c241_i32_49 = arith.constant 241 : i32
    %124 = tpu.dynamic_rotate %103 by %c241_i32_49 dim 1 : vector<64x256xf32>, i32 -> vector<64x256xf32>
    %cst_50 = arith.constant 0.000000e+00 : f32
    %125 = vector.broadcast %cst_50 : f32 to vector<64x256xf32>
    %126 = arith.select %58, %124, %125 : vector<64x256xi1>, vector<64x256xf32>
    %c240_i32_51 = arith.constant 240 : i32
    %127 = tpu.dynamic_rotate %103 by %c240_i32_51 dim 1 : vector<64x256xf32>, i32 -> vector<64x256xf32>
    %cst_52 = arith.constant 0.000000e+00 : f32
    %128 = vector.broadcast %cst_52 : f32 to vector<64x256xf32>
    %129 = arith.select %62, %127, %128 : vector<64x256xi1>, vector<64x256xf32>
    %c239_i32_53 = arith.constant 239 : i32
    %130 = tpu.dynamic_rotate %103 by %c239_i32_53 dim 1 : vector<64x256xf32>, i32 -> vector<64x256xf32>
    %cst_54 = arith.constant 0.000000e+00 : f32
    %131 = vector.broadcast %cst_54 : f32 to vector<64x256xf32>
    %132 = arith.select %69, %130, %131 : vector<64x256xi1>, vector<64x256xf32>
    %133 = tpu.concatenate %126, %129, %132 in 0 : vector<64x256xf32>, vector<64x256xf32>, vector<64x256xf32> -> vector<192x256xf32>
    %cst_55 = arith.constant dense<0.000000e+00> : vector<64x256xf32>
    %134 = tpu.matmul %8, %133, %cst_55 {dimension_numbers = #tpu.dot_dimension_numbers<[1], [0], [0], [1], [0, 0, 1, 1], [], []>} : vector<64x192xf32>, vector<192x256xf32>, vector<64x256xf32> -> vector<64x256xf32>
    %135 = arith.addf %123, %134 : vector<64x256xf32>
    %136 = vector.broadcast %2 : vector<64x1xf32> to vector<64x256xf32>
    %137 = arith.addf %135, %136 : vector<64x256xf32>
    %c17_i32_56 = arith.constant 17 : i32
    %138 = tpu.dynamic_rotate %137 by %c17_i32_56 dim 1 : vector<64x256xf32>, i32 -> vector<64x256xf32>
    %cst_57 = arith.constant 0.000000e+00 : f32
    %139 = vector.broadcast %cst_57 : f32 to vector<64x256xf32>
    %140 = arith.select %32, %138, %139 : vector<64x256xi1>, vector<64x256xf32>
    %c16_i32_58 = arith.constant 16 : i32
    %141 = tpu.dynamic_rotate %137 by %c16_i32_58 dim 1 : vector<64x256xf32>, i32 -> vector<64x256xf32>
    %cst_59 = arith.constant 0.000000e+00 : f32
    %142 = vector.broadcast %cst_59 : f32 to vector<64x256xf32>
    %143 = arith.select %36, %141, %142 : vector<64x256xi1>, vector<64x256xf32>
    %c15_i32_60 = arith.constant 15 : i32
    %144 = tpu.dynamic_rotate %137 by %c15_i32_60 dim 1 : vector<64x256xf32>, i32 -> vector<64x256xf32>
    %cst_61 = arith.constant 0.000000e+00 : f32
    %145 = vector.broadcast %cst_61 : f32 to vector<64x256xf32>
    %146 = arith.select %43, %144, %145 : vector<64x256xi1>, vector<64x256xf32>
    %147 = tpu.concatenate %140, %143, %146 in 0 : vector<64x256xf32>, vector<64x256xf32>, vector<64x256xf32> -> vector<192x256xf32>
    %cst_62 = arith.constant dense<0.000000e+00> : vector<64x256xf32>
    %148 = tpu.matmul %4, %147, %cst_62 {dimension_numbers = #tpu.dot_dimension_numbers<[1], [0], [0], [1], [0, 0, 1, 1], [], []>} : vector<64x192xf32>, vector<192x256xf32>, vector<64x256xf32> -> vector<64x256xf32>
    %c1_i32_63 = arith.constant 1 : i32
    %149 = tpu.dynamic_rotate %137 by %c1_i32_63 dim 1 : vector<64x256xf32>, i32 -> vector<64x256xf32>
    %cst_64 = arith.constant 0.000000e+00 : f32
    %150 = vector.broadcast %cst_64 : f32 to vector<64x256xf32>
    %151 = arith.select %47, %149, %150 : vector<64x256xi1>, vector<64x256xf32>
    %c255_i32_65 = arith.constant 255 : i32
    %152 = tpu.dynamic_rotate %137 by %c255_i32_65 dim 1 : vector<64x256xf32>, i32 -> vector<64x256xf32>
    %cst_66 = arith.constant 0.000000e+00 : f32
    %153 = vector.broadcast %cst_66 : f32 to vector<64x256xf32>
    %154 = arith.select %51, %152, %153 : vector<64x256xi1>, vector<64x256xf32>
    %155 = tpu.concatenate %151, %137, %154 in 0 : vector<64x256xf32>, vector<64x256xf32>, vector<64x256xf32> -> vector<192x256xf32>
    %cst_67 = arith.constant dense<0.000000e+00> : vector<64x256xf32>
    %156 = tpu.matmul %6, %155, %cst_67 {dimension_numbers = #tpu.dot_dimension_numbers<[1], [0], [0], [1], [0, 0, 1, 1], [], []>} : vector<64x192xf32>, vector<192x256xf32>, vector<64x256xf32> -> vector<64x256xf32>
    %157 = arith.addf %148, %156 : vector<64x256xf32>
    %c241_i32_68 = arith.constant 241 : i32
    %158 = tpu.dynamic_rotate %137 by %c241_i32_68 dim 1 : vector<64x256xf32>, i32 -> vector<64x256xf32>
    %cst_69 = arith.constant 0.000000e+00 : f32
    %159 = vector.broadcast %cst_69 : f32 to vector<64x256xf32>
    %160 = arith.select %58, %158, %159 : vector<64x256xi1>, vector<64x256xf32>
    %c240_i32_70 = arith.constant 240 : i32
    %161 = tpu.dynamic_rotate %137 by %c240_i32_70 dim 1 : vector<64x256xf32>, i32 -> vector<64x256xf32>
    %cst_71 = arith.constant 0.000000e+00 : f32
    %162 = vector.broadcast %cst_71 : f32 to vector<64x256xf32>
    %163 = arith.select %62, %161, %162 : vector<64x256xi1>, vector<64x256xf32>
    %c239_i32_72 = arith.constant 239 : i32
    %164 = tpu.dynamic_rotate %137 by %c239_i32_72 dim 1 : vector<64x256xf32>, i32 -> vector<64x256xf32>
    %cst_73 = arith.constant 0.000000e+00 : f32
    %165 = vector.broadcast %cst_73 : f32 to vector<64x256xf32>
    %166 = arith.select %69, %164, %165 : vector<64x256xi1>, vector<64x256xf32>
    %167 = tpu.concatenate %160, %163, %166 in 0 : vector<64x256xf32>, vector<64x256xf32>, vector<64x256xf32> -> vector<192x256xf32>
    %cst_74 = arith.constant dense<0.000000e+00> : vector<64x256xf32>
    %168 = tpu.matmul %8, %167, %cst_74 {dimension_numbers = #tpu.dot_dimension_numbers<[1], [0], [0], [1], [0, 0, 1, 1], [], []>} : vector<64x192xf32>, vector<192x256xf32>, vector<64x256xf32> -> vector<64x256xf32>
    %169 = arith.addf %157, %168 : vector<64x256xf32>
    %170 = vector.broadcast %2 : vector<64x1xf32> to vector<64x256xf32>
    %171 = arith.addf %169, %170 : vector<64x256xf32>
    %172 = arith.addf %103, %137 : vector<64x256xf32>
    %173 = arith.addf %172, %171 : vector<64x256xf32>
    %c2_i32 = arith.constant 2 : i32
    %c0_i32_75 = arith.constant 0 : i32
    %174 = arith.cmpi eq, %c2_i32, %c0_i32_75 : i32
    %c1_i32_76 = arith.constant 1 : i32
    %175 = arith.select %174, %c1_i32_76, %c2_i32 : i32
    %176 = vector.broadcast %175 : i32 to vector<1x256xi32>
    %177 = arith.remsi %9, %176 : vector<1x256xi32>
    %c0_i32_77 = arith.constant 0 : i32
    %178 = vector.broadcast %c0_i32_77 : i32 to vector<1x256xi32>
    %179 = arith.cmpi ne, %177, %178 : vector<1x256xi32>
    %c0_i32_78 = arith.constant 0 : i32
    %180 = vector.broadcast %c0_i32_78 : i32 to vector<1x256xi32>
    %181 = arith.cmpi slt, %177, %180 : vector<1x256xi32>
    %c0_i32_79 = arith.constant 0 : i32
    %182 = arith.cmpi slt, %175, %c0_i32_79 : i32
    %183 = vector.broadcast %182 : i1 to vector<1x256xi1>
    %184 = vector.broadcast %183 : vector<1x256xi1> to vector<1x256xi1>
    %185 = arith.xori %181, %184 : vector<1x256xi1>
    %186 = arith.andi %185, %179 : vector<1x256xi1>
    %187 = vector.broadcast %175 : i32 to vector<1x256xi32>
    %188 = arith.addi %177, %187 : vector<1x256xi32>
    %189 = arith.select %186, %188, %177 : vector<1x256xi1>, vector<1x256xi32>
    %c0_i32_80 = arith.constant 0 : i32
    %190 = vector.broadcast %c0_i32_80 : i32 to vector<1x256xi32>
    %191 = arith.cmpi eq, %189, %190 : vector<1x256xi32>
    %c32_i32 = arith.constant 32 : i32
    %c0_i32_81 = arith.constant 0 : i32
    %192 = arith.cmpi eq, %c32_i32, %c0_i32_81 : i32
    %c1_i32_82 = arith.constant 1 : i32
    %193 = arith.select %192, %c1_i32_82, %c32_i32 : i32
    %194 = vector.broadcast %193 : i32 to vector<1x256xi32>
    %195 = arith.remsi %9, %194 : vector<1x256xi32>
    %c0_i32_83 = arith.constant 0 : i32
    %196 = vector.broadcast %c0_i32_83 : i32 to vector<1x256xi32>
    %197 = arith.cmpi ne, %195, %196 : vector<1x256xi32>
    %c0_i32_84 = arith.constant 0 : i32
    %198 = vector.broadcast %c0_i32_84 : i32 to vector<1x256xi32>
    %199 = arith.cmpi slt, %195, %198 : vector<1x256xi32>
    %c0_i32_85 = arith.constant 0 : i32
    %200 = arith.cmpi slt, %193, %c0_i32_85 : i32
    %201 = vector.broadcast %200 : i1 to vector<1x256xi1>
    %202 = vector.broadcast %201 : vector<1x256xi1> to vector<1x256xi1>
    %203 = arith.xori %199, %202 : vector<1x256xi1>
    %204 = arith.andi %203, %197 : vector<1x256xi1>
    %205 = vector.broadcast %193 : i32 to vector<1x256xi32>
    %206 = arith.addi %195, %205 : vector<1x256xi32>
    %207 = arith.select %204, %206, %195 : vector<1x256xi1>, vector<1x256xi32>
    %c16_i32_86 = arith.constant 16 : i32
    %208 = vector.broadcast %c16_i32_86 : i32 to vector<1x256xi32>
    %209 = arith.cmpi slt, %207, %208 : vector<1x256xi32>
    %c255_i32_87 = arith.constant 255 : i32
    %210 = tpu.dynamic_rotate %1 by %c255_i32_87 dim 1 : vector<64x256xf32>, i32 -> vector<64x256xf32>
    %211 = arith.addf %1, %210 : vector<64x256xf32>
    %c1_i32_88 = arith.constant 1 : i32
    %212 = tpu.dynamic_rotate %211 by %c1_i32_88 dim 1 : vector<64x256xf32>, i32 -> vector<64x256xf32>
    %213 = vector.shape_cast %191 : vector<1x256xi1> to vector<1x256xi1>
    %214 = vector.broadcast %213 : vector<1x256xi1> to vector<64x256xi1>
    %215 = arith.select %214, %211, %212 : vector<64x256xi1>, vector<64x256xf32>
    %c240_i32_89 = arith.constant 240 : i32
    %216 = tpu.dynamic_rotate %215 by %c240_i32_89 dim 1 : vector<64x256xf32>, i32 -> vector<64x256xf32>
    %217 = arith.addf %215, %216 : vector<64x256xf32>
    %c16_i32_90 = arith.constant 16 : i32
    %218 = tpu.dynamic_rotate %217 by %c16_i32_90 dim 1 : vector<64x256xf32>, i32 -> vector<64x256xf32>
    %219 = vector.shape_cast %209 : vector<1x256xi1> to vector<1x256xi1>
    %220 = vector.broadcast %219 : vector<1x256xi1> to vector<64x256xi1>
    %221 = arith.select %220, %217, %218 : vector<64x256xi1>, vector<64x256xf32>
    %cst_91 = arith.constant 2.500000e-01 : f32
    %222 = vector.broadcast %cst_91 : f32 to vector<64x256xf32>
    %223 = arith.mulf %222, %221 : vector<64x256xf32>
    %cst_92 = arith.constant 0.000000e+00 : f32
    %224 = vector.broadcast %cst_92 : f32 to vector<64x256xf32>
    %225 = arith.maximumf %223, %224 : vector<64x256xf32>
    %226 = arith.mulf %225, %173 : vector<64x256xf32>
    %227 = arith.addf %226, %1 : vector<64x256xf32>
    %c0_93 = arith.constant 0 : index
    %c0_94 = arith.constant 0 : index
    %c0_95 = arith.constant 0 : index
    %228 = vector.load %arg4[%c0_93, %c0_94, %c0_95] : memref<1x64x256xf32, #tpu.memory_space<vmem>>, vector<1x64x256xf32>
    %229 = vector.shape_cast %228 : vector<1x64x256xf32> to vector<64x256xf32>
    %230 = vector.shape_cast %227 : vector<64x256xf32> to vector<1x64x256xf32>
    tpu.vector_store %arg4[%c0_93, %c0_94, %c0_95], %230 {strides = array<i32>} : memref<1x64x256xf32, #tpu.memory_space<vmem>>, vector<1x64x256xf32>,
    return
  }
  func.func @transform_0(%arg0: i32) -> (i32, i32, i32) {
    %c0_i32 = arith.constant 0 : i32
    %c0_i32_0 = arith.constant 0 : i32
    %c0_i32_1 = arith.constant 0 : i32
    return %arg0, %c0_i32, %c0_i32_0 : i32, i32, i32
  }
  func.func @transform_1(%arg0: i32) -> (i32, i32, i32) {
    %c0_i32 = arith.constant 0 : i32
    %c0_i32_0 = arith.constant 0 : i32
    %c0_i32_1 = arith.constant 0 : i32
    %c0_i32_2 = arith.constant 0 : i32
    return %c0_i32, %c0_i32_0, %c0_i32_1 : i32, i32, i32
  }
  func.func @transform_2(%arg0: i32) -> (i32, i32) {
    %c0_i32 = arith.constant 0 : i32
    %c0_i32_0 = arith.constant 0 : i32
    %c0_i32_1 = arith.constant 0 : i32
    return %c0_i32, %c0_i32_0 : i32, i32
  }
  func.func @transform_3(%arg0: i32) -> (i32, i32, i32) {
    %c0_i32 = arith.constant 0 : i32
    %c0_i32_0 = arith.constant 0 : i32
    %c0_i32_1 = arith.constant 0 : i32
    return %arg0, %c0_i32, %c0_i32_0 : i32, i32, i32
  }
}

</mosaic_0001>

<bundles_post_ra>
// kernel: dilran_forward.1
= control target key start
LH: loop header
LB: loop body
LE: loop exit
PB: predicated region body
PF: predicated region fallthrough
CT: control target
= control target key end

     0   :  { %s4718_s12 = smov 0   ;;  %s10059_s0 = inlined_call_operand.vmem [shape: f32[2,64,256], index: 0, kind: input, shape index: {}]   ;;  %s10060_s1 = inlined_call_operand.vmem [shape: f32[3,64,192], index: 1, kind: input, shape index: {}]   ;;  %s10061_s2 = inlined_call_operand.vmem [shape: f32[64,1], index: 2, kind: input, shape index: {}]   ;;  %s10062_s3 = inlined_call_operand.vmem [shape: f32[2,64,256], index: 3, kind: output, shape index: {}]  }
   0x1 LB: > { %s3984_s13 = sadd.s32 4294967295, %s4687_s12   ;;  %p3988_p0 = scmp.ge.s32.totalorder %s4687_s12, 1  ;;  %s4687_s12 = sphi %s4718_s12, %s13_s12  }
   0x2   : > { %p137_p1 = scmp.lt.s32.totalorder %s4687_s12, 3 }
   0x4   : > { %p138_p2 = pnand %p3988_p0, %p137_p1 }
   0x6   : > { %141 = sbr.rel (%p138_p2) target bundleno = 1975 (0x7b7), region = 32 }
   0xb   : > { %p161_p3 = scmp.lt.s32.totalorder %s3984_s13, 1  ;;  %s4689_s18 = smov 17   ;;  %vm645_vm10 = vcmask 523264  }
   0xc   : > { %s4690_s19 = smov 16   ;;  %s4691_s20 = smov 15  }
   0xd   : > { %s10885_s13 = smov (!%p161_p3, %s3984_s13), 1  ;;  %s4692_s21 = smov 1  }
   0xe   : > { %s4507_s14 = sshll.u32 %s10885_s13, 7  ;;  %s4693_s22 = smov 127  }
   0xf   : > { %s4734_s17 = scalar_lea.vmem %s10059_s0, %s4507_s14  ;;  %s4694_s23 = smov 113  }
  0x10   : > { %v4737_v0 = vld [vmem:[%s4734_s17 + $0x40] sm:$0xff]  ;;  %v4752_v3 = vld [vmem:[%s4734_s17 + $0x70] sm:$0xff]  ;;  %v4774_v8 = vld [vmem:[%s4734_s17 + $0x78] sm:$0xff]  ;;  %s4695_s24 = smov 112   ;;  %s4696_s25 = smov 111  }
  0x11   : > { %10249 = vst [vmem:[#allocation2_spill] sm:$0xff] %v4737_v0  ;;  %v4740_v1 = vld [vmem:[%s4734_s17 + $0x20] sm:$0xff]  ;;  %328 = vrot.lane.b32.xlu2 %v4737_v0, %s4689_s18  ;;  %670 = vmatpush.msra.mxu0 %v4752_v3  ;;  %v4760_v5 = vld [vmem:[%s4734_s17 + $0x50] sm:$0xff]  ;;  %v4780_v9 = vld [vmem:[%s4734_s17 + $0x68] sm:$0xff]  ;;  %s9950_s4 = scalar_lea.vmem %s10062_s3, %s4507_s14 }
  0x12   : > { %10250 = vst [vmem:[#allocation3_spill] sm:$0xff] %v4740_v1  ;;  %v4743_v2 = vld [vmem:[%s4734_s17] sm:$0xff]  ;;  %324 = vrot.lane.b32.xlu1 %v4740_v1, %s4689_s18  ;;  %v4763_v6 = vld [vmem:[%s4734_s17 + $0x30] sm:$0xff]  ;;  %752 = vmatpush.msra.mxu2 %v4774_v8  ;;  %v4785_v10 = vld [vmem:[%s4734_s17 + $0x58] sm:$0xff] }
  0x13   : > { %10251 = vst [vmem:[#allocation4_spill] sm:$0xff] %v4743_v2  ;;  %320 = vrot.lane.b32.xlu0 %v4743_v2, %s4689_s18  ;;  %v4756_v4 = vld [vmem:[%s4734_s17 + $0x60] sm:$0xff]  ;;  %v4766_v7 = vld [vmem:[%s4734_s17 + $0x10] sm:$0xff]  ;;  %v4789_v11 = vld [vmem:[%s4734_s17 + $0x8] sm:$0xff] }
  0x14   : > { %671 = vmatpush.msra.mxu0 %v4756_v4  ;;  %10252 = vst [vmem:[#allocation5_spill] sm:$0xff] %v4763_v6  ;;  %753 = vmatpush.msra.mxu2 %v4780_v9  ;;  %v4793_v12 = vld [vmem:[%s4734_s17 + $0x48] sm:$0xff]  ;;  %v4802_v13 = vld [vmem:[%s4734_s17 + $0x38] sm:$0xff] }
  0x15   : > { %10253 = vst [vmem:[#allocation6_spill] sm:$0xff] %v4766_v7  ;;  %v4808_v14 = vld [vmem:[%s4734_s17 + $0x28] sm:$0xff]  ;;  %v4813_v15 = vld [vmem:[%s4734_s17 + $0x18] sm:$0xff] }
  0x16   : > { %672 = vmatpush.msra.mxu0 %v4760_v5  ;;  %10254 = vst [vmem:[#allocation7_spill] sm:$0xff] %v4789_v11  ;;  %754 = vmatpush.msra.mxu2 %v4785_v10 }
  0x17   : > { %10255 = vst [vmem:[#allocation8_spill] sm:$0xff] %v4813_v15 }
  0x18   : > { %673 = vmatpush.msra.mxu0 %v4737_v0  ;;  %755 = vmatpush.msra.mxu2 %v4793_v12 }
  0x19   : > { %330 = vrot.lane.b32.xlu2 %v4760_v5, %s4689_s18 }
  0x1a   : > { %326 = vrot.lane.b32.xlu1 %v4763_v6, %s4689_s18  ;;  %674 = vmatpush.msra.mxu0 %v4763_v6 }
  0x1b   : > { %322 = vrot.lane.b32.xlu0 %v4766_v7, %s4689_s18  ;;  %756 = vmatpush.msra.mxu2 %v4802_v13 }
  0x1c   : > { %675 = vmatpush.msra.mxu0 %v4740_v1 }
  0x1d   : > { %757 = vmatpush.msra.mxu2 %v4808_v14 }
  0x1e   : > { %676 = vmatpush.msra.mxu0 %v4766_v7 }
  0x1f   : > { %758 = vmatpush.msra.mxu2 %v4813_v15 }
  0x20   : > { %677 = vmatpush.msra.mxu0 %v4743_v2 }
  0x21   : > { %336 = vrot.lane.b32.xlu2 %v4789_v11, %s4689_s18  ;;  %759 = vmatpush.msra.mxu2 %v4789_v11 }
  0x22   : > { %334 = vrot.lane.b32.xlu1 %v4752_v3, %s4689_s18 }
  0x23   : > { %332 = vrot.lane.b32.xlu0 %v4756_v4, %s4689_s18 }
  0x29   : > { %342 = vrot.lane.b32.xlu2 %v4802_v13, %s4689_s18 }
  0x2a   : > { %340 = vrot.lane.b32.xlu1 %v4808_v14, %s4689_s18 }
  0x2b   : > { %338 = vrot.lane.b32.xlu0 %v4813_v15, %s4689_s18 }
  0x31   : > { %348 = vrot.lane.b32.xlu2 %v4780_v9, %s4689_s18 }
  0x32   : > { %346 = vrot.lane.b32.xlu1 %v4785_v10, %s4689_s18 }
  0x33   : > { %344 = vrot.lane.b32.xlu0 %v4793_v12, %s4689_s18 }
  0x39   : > { %387 = vrot.lane.b32.xlu2 %v4766_v7, %s4690_s19 }
  0x3a   : > { %385 = vrot.lane.b32.xlu1 %v4743_v2, %s4690_s19 }
  0x3b   : > { %350 = vrot.lane.b32.xlu0 %v4774_v8, %s4689_s18 }
  0x41   : > { %393 = vrot.lane.b32.xlu2 %v4737_v0, %s4690_s19 }
  0x42   : > { %391 = vrot.lane.b32.xlu1 %v4763_v6, %s4690_s19 }
  0x43   : > { %389 = vrot.lane.b32.xlu0 %v4740_v1, %s4690_s19 }
  0x49   : > { %399 = vrot.lane.b32.xlu2 %v4752_v3, %s4690_s19 }
  0x4a   : > { %397 = vrot.lane.b32.xlu1 %v4756_v4, %s4690_s19 }
  0x4b   : > { %395 = vrot.lane.b32.xlu0 %v4760_v5, %s4690_s19 }
  0x51   : > { %405 = vrot.lane.b32.xlu2 %v4808_v14, %s4690_s19 }
  0x52   : > { %403 = vrot.lane.b32.xlu1 %v4813_v15, %s4690_s19 }
  0x53   : > { %401 = vrot.lane.b32.xlu0 %v4789_v11, %s4690_s19 }
  0x59   : > { %411 = vrot.lane.b32.xlu2 %v4785_v10, %s4690_s19 }
  0x5a   : > { %409 = vrot.lane.b32.xlu1 %v4793_v12, %s4690_s19 }
  0x5b   : > { %407 = vrot.lane.b32.xlu0 %v4802_v13, %s4690_s19 }
  0x61   : > { %450 = vrot.lane.b32.xlu2 %v4743_v2, %s4691_s20 }
  0x62   : > { %415 = vrot.lane.b32.xlu1 %v4774_v8, %s4690_s19 }
  0x63   : > { %413 = vrot.lane.b32.xlu0 %v4780_v9, %s4690_s19 }
  0x69   : > { %456 = vrot.lane.b32.xlu2 %v4763_v6, %s4691_s20 }
  0x6a   : > { %454 = vrot.lane.b32.xlu1 %v4740_v1, %s4691_s20 }
  0x6b   : > { %452 = vrot.lane.b32.xlu0 %v4766_v7, %s4691_s20  ;;  %v4872_v16 = vpop.permute.xlu2 %328 }
  0x6c   : > { %10256 = vst [vmem:[#allocation9_spill] sm:$0xff] %v4872_v16 }
  0x71   : > { %462 = vrot.lane.b32.xlu2 %v4756_v4, %s4691_s20 }
  0x72   : > { %460 = vrot.lane.b32.xlu1 %v4760_v5, %s4691_s20 }
  0x73   : > { %458 = vrot.lane.b32.xlu0 %v4737_v0, %s4691_s20  ;;  %v4880_v17 = vpop.permute.xlu2 %330 }
  0x74   : > { %10257 = vst [vmem:[#allocation10_spill] sm:$0xff] %v4880_v17 }
  0x79   : > { %468 = vrot.lane.b32.xlu2 %v4813_v15, %s4691_s20 }
  0x7a   : > { %466 = vrot.lane.b32.xlu1 %v4789_v11, %s4691_s20 }
  0x7b   : > { %464 = vrot.lane.b32.xlu0 %v4752_v3, %s4691_s20  ;;  %v4888_v18 = vpop.permute.xlu2 %336 }
  0x7c   : > { %10258 = vst [vmem:[#allocation11_spill] sm:$0xff] %v4888_v18 }
  0x81   : > { %474 = vrot.lane.b32.xlu2 %v4793_v12, %s4691_s20 }
  0x82   : > { %472 = vrot.lane.b32.xlu1 %v4802_v13, %s4691_s20 }
  0x83   : > { %470 = vrot.lane.b32.xlu0 %v4808_v14, %s4691_s20  ;;  %v4898_v20 = vpop.permute.xlu2 %342 }
  0x84   : > { %v4896_v19 = vpop.permute.xlu1 %324  ;;  %10260 = vst [vmem:[#allocation13_spill] sm:$0xff] %v4898_v20 }
  0x85   : > { %10259 = vst [vmem:[#allocation12_spill] sm:$0xff] %v4896_v19  ;;  %v4900_v21 = vpop.permute.xlu0 %320 }
  0x86   : > { %10261 = vst [vmem:[#allocation14_spill] sm:$0xff] %v4900_v21 }
  0x89   : > { %480 = vrot.lane.b32.xlu2 %v4774_v8, %s4691_s20 }
  0x8a   : > { %478 = vrot.lane.b32.xlu1 %v4780_v9, %s4691_s20 }
  0x8b   : > { %476 = vrot.lane.b32.xlu0 %v4785_v10, %s4691_s20  ;;  %v4910_v23 = vpop.permute.xlu2 %348 }
  0x8c   : > { %v4908_v22 = vpop.permute.xlu1 %326  ;;  %10263 = vst [vmem:[#allocation16_spill] sm:$0xff] %v4910_v23 }
  0x8d   : > { %10262 = vst [vmem:[#allocation15_spill] sm:$0xff] %v4908_v22  ;;  %v4912_v24 = vpop.permute.xlu0 %322 }
  0x8e   : > { %10264 = vst [vmem:[#allocation17_spill] sm:$0xff] %v4912_v24 }
  0x91   : > { %519 = vrot.lane.b32.xlu2 %v4740_v1, %s4692_s21 }
  0x92   : > { %517 = vrot.lane.b32.xlu1 %v4766_v7, %s4692_s21 }
  0x93   : > { %515 = vrot.lane.b32.xlu0 %v4743_v2, %s4692_s21  ;;  %v4922_v26 = vpop.permute.xlu2 %387 }
  0x94   : > { %v4920_v25 = vpop.permute.xlu1 %334 }
  0x95   : > { %10265 = vst [vmem:[#allocation18_spill] sm:$0xff] %v4920_v25  ;;  %v4924_v27 = vpop.permute.xlu0 %332 }
  0x96   : > { %10266 = vst [vmem:[#allocation19_spill] sm:$0xff] %v4924_v27 }
  0x99   : > { %525 = vrot.lane.b32.xlu2 %v4760_v5, %s4692_s21 }
  0x9a   : > { %523 = vrot.lane.b32.xlu1 %v4737_v0, %s4692_s21 }
  0x9b   : > { %521 = vrot.lane.b32.xlu0 %v4763_v6, %s4692_s21  ;;  %v4934_v29 = vpop.permute.xlu2 %393 }
  0x9c   : > { %v4932_v28 = vpop.permute.xlu1 %340 }
  0x9d   : > { %10267 = vst [vmem:[#allocation20_spill] sm:$0xff] %v4932_v28  ;;  %v4936_v30 = vpop.permute.xlu0 %338 }
  0x9e   : > { %10268 = vst [vmem:[#allocation21_spill] sm:$0xff] %v4936_v30 }
  0xa1   : > { %531 = vrot.lane.b32.xlu2 %v4789_v11, %s4692_s21 }
  0xa2   : > { %529 = vrot.lane.b32.xlu1 %v4752_v3, %s4692_s21 }
  0xa3   : > { %527 = vrot.lane.b32.xlu0 %v4756_v4, %s4692_s21  ;;  %v4946_v32 = vpop.permute.xlu2 %399 }
  0xa4   : > { %v4944_v31 = vpop.permute.xlu1 %346 }
  0xa5   : > { %10269 = vst [vmem:[#allocation22_spill] sm:$0xff] %v4944_v31  ;;  %v4948_v33 = vpop.permute.xlu0 %344 }
  0xa6   : > { %10270 = vst [vmem:[#allocation23_spill] sm:$0xff] %v4948_v33 }
  0xa9   : > { %537 = vrot.lane.b32.xlu2 %v4802_v13, %s4692_s21 }
  0xaa   : > { %535 = vrot.lane.b32.xlu1 %v4808_v14, %s4692_s21 }
  0xab   : > { %533 = vrot.lane.b32.xlu0 %v4813_v15, %s4692_s21  ;;  %v4956_v34 = vpop.permute.xlu2 %405 }
  0xac   : > { %v4958_v35 = vpop.permute.xlu1 %385 }
  0xad   : > { %10271 = vst [vmem:[#allocation24_spill] sm:$0xff] %v4958_v35  ;;  %v4960_v36 = vpop.permute.xlu0 %350  ;;  %v10281_v35 = vmov 0 }
  0xae   : > { %10272 = vst [vmem:[#allocation25_spill] sm:$0xff] %v4960_v36 }
  0xb1   : > { %543 = vrot.lane.b32.xlu2 %v4780_v9, %s4692_s21 }
  0xb2   : > { %541 = vrot.lane.b32.xlu1 %v4785_v10, %s4692_s21 }
  0xb3   : > { %539 = vrot.lane.b32.xlu0 %v4793_v12, %s4692_s21  ;;  %v4968_v37 = vpop.permute.xlu2 %411 }
  0xb4   : > { %v4970_v38 = vpop.permute.xlu1 %391 }
  0xb5   : > { %v4972_v39 = vpop.permute.xlu0 %389 }
  0xb9   : > { %582 = vrot.lane.b32.xlu2 %v4766_v7, %s4693_s22 }
  0xba   : > { %580 = vrot.lane.b32.xlu1 %v4743_v2, %s4693_s22 }
  0xbb   : > { %545 = vrot.lane.b32.xlu0 %v4774_v8, %s4692_s21  ;;  %v4980_v40 = vpop.permute.xlu2 %450 }
  0xbc   : > { %10273 = vst [vmem:[#allocation26_spill] sm:$0xff] %v4980_v40  ;;  %v4982_v41 = vpop.permute.xlu1 %397 }
  0xbd   : > { %v4984_v42 = vpop.permute.xlu0 %395 }
  0xc1   : > { %610 = vrot.lane.b32.xlu2 %v4774_v8, %s4693_s22 }
  0xc2   : > { %594 = vrot.lane.b32.xlu1 %v4752_v3, %s4693_s22 }
  0xc3   : > { %584 = vrot.lane.b32.xlu0 %v4740_v1, %s4693_s22  ;;  %v4992_v43 = vpop.permute.xlu2 %456 }
  0xc4   : > { %v4994_v44 = vpop.permute.xlu1 %403 }
  0xc5   : > { %v4996_v45 = vpop.permute.xlu0 %401 }
  0xc6   : > { %10274 = vst [vmem:[#allocation27_spill] sm:$0xff] %v4996_v45  ;;  %v10284_v45 = vmov 0 }
  0xc9   : > { %590 = vrot.lane.b32.xlu2 %v4760_v5, %s4693_s22 }
  0xca   : > { %608 = vrot.lane.b32.xlu1 %v4780_v9, %s4693_s22 }
  0xcb   : > { %592 = vrot.lane.b32.xlu0 %v4756_v4, %s4693_s22  ;;  %v5004_v46 = vpop.permute.xlu2 %462 }
  0xcc   : > { %v5006_v47 = vpop.permute.xlu1 %409 }
  0xcd   : > { %v5008_v48 = vpop.permute.xlu0 %407 }
  0xd1   : > { %604 = vrot.lane.b32.xlu2 %v4793_v12, %s4693_s22 }
  0xd2   : > { %588 = vrot.lane.b32.xlu1 %v4737_v0, %s4693_s22 }
  0xd3   : > { %606 = vrot.lane.b32.xlu0 %v4785_v10, %s4693_s22  ;;  %v5016_v49 = vpop.permute.xlu2 %468 }
  0xd4   : > { %v5018_v50 = vpop.permute.xlu1 %415 }
  0xd5   : > { %v5020_v51 = vpop.permute.xlu0 %413 }
  0xd9   : > { %600 = vrot.lane.b32.xlu2 %v4808_v14, %s4693_s22 }
  0xda   : > { %602 = vrot.lane.b32.xlu1 %v4802_v13, %s4693_s22 }
  0xdb   : > { %586 = vrot.lane.b32.xlu0 %v4763_v6, %s4693_s22  ;;  %v5028_v52 = vpop.permute.xlu2 %474 }
  0xdc   : > { %v5030_v53 = vpop.permute.xlu1 %454 }
  0xdd   : > { %v5032_v54 = vpop.permute.xlu0 %452 }
  0xde   : > { %10275 = vst [vmem:[#allocation28_spill] sm:$0xff] %v5032_v54 }
  0xe1   : > { %1022 = vrot.lane.b32.xlu2 %v4743_v2, %s4694_s23 }
  0xe2   : > { %596 = vrot.lane.b32.xlu1 %v4789_v11, %s4693_s22 }
  0xe3   : > { %598 = vrot.lane.b32.xlu0 %v4813_v15, %s4693_s22  ;;  %v5040_v55 = vpop.permute.xlu2 %480 }
  0xe4   : > { %v5042_v56 = vpop.permute.xlu1 %460 }
  0xe5   : > { %v5044_v57 = vpop.permute.xlu0 %458 }
  0xe9   : > { %1028 = vrot.lane.b32.xlu2 %v4763_v6, %s4694_s23 }
  0xea   : > { %1026 = vrot.lane.b32.xlu1 %v4740_v1, %s4694_s23 }
  0xeb   : > { %1024 = vrot.lane.b32.xlu0 %v4766_v7, %s4694_s23  ;;  %v5052_v58 = vpop.permute.xlu2 %519 }
  0xec   : > { %v5054_v59 = vpop.permute.xlu1 %466 }
  0xed   : > { %10276 = vst [vmem:[#allocation29_spill] sm:$0xff] %v5054_v59  ;;  %v5056_v60 = vpop.permute.xlu0 %464 }
  0xf1   : > { %1034 = vrot.lane.b32.xlu2 %v4756_v4, %s4694_s23 }
  0xf2   : > { %1032 = vrot.lane.b32.xlu1 %v4760_v5, %s4694_s23 }
  0xf3   : > { %1030 = vrot.lane.b32.xlu0 %v4737_v0, %s4694_s23  ;;  %v5064_v61 = vpop.permute.xlu2 %525 }
  0xf4   : > { %v5066_v62 = vpop.permute.xlu1 %472 }
  0xf5   : > { %v5068_v63 = vpop.permute.xlu0 %470 }
  0xf9   : > { %1040 = vrot.lane.b32.xlu2 %v4813_v15, %s4694_s23 }
  0xfa   : > { %1038 = vrot.lane.b32.xlu1 %v4789_v11, %s4694_s23 }
  0xfb   : > { %1036 = vrot.lane.b32.xlu0 %v4752_v3, %s4694_s23  ;;  %v5076_v21 = vpop.permute.xlu2 %531 }
  0xfc   : > { %v5078_v18 = vpop.permute.xlu1 %478 }
  0xfd   : > { %v5080_v24 = vpop.permute.xlu0 %476 }
 0x101   : > { %1046 = vrot.lane.b32.xlu2 %v4793_v12, %s4694_s23 }
 0x102   : > { %1044 = vrot.lane.b32.xlu1 %v4802_v13, %s4694_s23 }
 0x103   : > { %1042 = vrot.lane.b32.xlu0 %v4808_v14, %s4694_s23  ;;  %v5088_v30 = vpop.permute.xlu2 %537 }
 0x104   : > { %v5090_v19 = vpop.permute.xlu1 %517 }
 0x105   : > { %v5092_v28 = vpop.permute.xlu0 %515 }
 0x109   : > { %1052 = vrot.lane.b32.xlu2 %v4774_v8, %s4694_s23 }
 0x10a   : > { %1050 = vrot.lane.b32.xlu1 %v4780_v9, %s4694_s23 }
 0x10b   : > { %1048 = vrot.lane.b32.xlu0 %v4785_v10, %s4694_s23  ;;  %v544_v22 = vpop.permute.xlu2 %543 }
 0x10c   : > { %v524_v20 = vpop.permute.xlu1 %523 }
 0x10d   : > { %v5100_v16 = vpop.permute.xlu0 %521 }
 0x111   : > { %1091 = vrot.lane.b32.xlu2 %v4740_v1, %s4695_s24 }
 0x112   : > { %1089 = vrot.lane.b32.xlu1 %v4766_v7, %s4695_s24  ;;  %v245_v7 = vlaneseq }
 0x113   : > { %1087 = vrot.lane.b32.xlu0 %v4743_v2, %s4695_s24  ;;  %v5108_v33 = vpop.permute.xlu2 %582 }
 0x114   : > { %10277 = vst [vmem:[#allocation30_spill] sm:$0xff] %v5108_v33  ;;  %v530_v17 = vpop.permute.xlu1 %529  ;;  %v5122_v2 = vand.u32 127, %v245_v7 }
 0x115   : > { %v528_v31 = vpop.permute.xlu0 %527 }
 0x116   : > { %10278 = vst [vmem:[#allocation31_spill] sm:$0xff] %v5122_v2  ;;  %v252_v40 = vand.u32 15, %v5122_v2  ;;  %vm10165_vm2 = vcmp.lt.s32.totalorder %v5122_v2, 1  ;;  %vm10164_vm4 = vcmp.lt.s32.totalorder %v5122_v2, 127  ;;  %vm10110_vm6 = vcmp.lt.s32.totalorder %v5122_v2, 16 }
 0x117   : > { %v554_v54 = vsel %vm10165_vm2, %v528_v31, %v544_v22  ;;  %vm10166_vm7 = vcmp.lt.s32.totalorder %v5122_v2, 15  ;;  %vm10108_vm8 = vcmp.lt.s32.totalorder %v5122_v2, 17  ;;  %vm10109_vm9 = vcmp.ge.s32.totalorder %v5122_v2, 16 }
 0x118   : > { %vm5143_vm0 = vcmp.ge.s32.totalorder %v252_v40, 1  ;;  %vm5182_vm3 = vcmp.le.s32.totalorder %v252_v40, 14  ;;  %vm1119_vm14 = vcmp.lt.s32.totalorder %v5122_v2, 112  ;;  %vm10168_vm15 = vcmp.lt.s32.totalorder %v5122_v2, 111 }
 0x119   : > { %1097 = vrot.lane.b32.xlu2 %v4760_v5, %s4695_s24  ;;  %v10282_v35 = vsel %vm5143_vm0, 4294967295, %v10281_v35  ;;  %vm5538_vm11 = vmand %vm10109_vm9, %vm5182_vm3 }
 0x11a   : > { %1095 = vrot.lane.b32.xlu1 %v4737_v0, %s4695_s24  ;;  %10283 = vst [vmem:[#allocation34_spill] sm:$0xff] %v10282_v35  ;;  %vm5694_vm12 = vmand %vm10109_vm9, %vm5143_vm0 }
 0x11b   : > { %1093 = vrot.lane.b32.xlu0 %v4763_v6, %s4695_s24  ;;  %v611_v1 = vpop.permute.xlu2 %610  ;;  %v5129_v6 = vadd.s32 128, %v5122_v2 }
 0x11c   : > { %v536_v27 = vpop.permute.xlu1 %535 }
 0x11d   : > { %v5116_v23 = vpop.permute.xlu0 %533  ;;  %10279 = vst [vmem:[#allocation32_spill] sm:$0xff] %v5129_v6  ;;  %v259_v59 = vand.u32 15, %v5129_v6 }
 0x11f   : > { %vm5147_vm1 = vcmp.ge.s32.totalorder %v259_v59, 1  ;;  %vm5193_vm5 = vcmp.le.s32.totalorder %v259_v59, 14  ;;  %v550_v59 = vsel %vm10165_vm2, %v5052_v58, %v536_v27 }
 0x120   : > { %v10285_v45 = vsel %vm5147_vm1, 4294967295, %v10284_v45 }
 0x121   : > { %1103 = vrot.lane.b32.xlu2 %v4789_v11, %s4695_s24  ;;  %10286 = vst [vmem:[#allocation35_spill] sm:$0xff] %v10285_v45 }
 0x122   : > { %1101 = vrot.lane.b32.xlu1 %v4752_v3, %s4695_s24 }
 0x123   : > { %1099 = vrot.lane.b32.xlu0 %v4756_v4, %s4695_s24  ;;  %v5126_v33 = vpop.permute.xlu2 %590 }
 0x124   : > { %v542_v25 = vpop.permute.xlu1 %541 }
 0x125   : > { %v540_v36 = vpop.permute.xlu0 %539 }
 0x129   : > { %1115 = vrot.lane.b32.xlu2 %v4780_v9, %s4695_s24 }
 0x12a   : > { %1117 = vrot.lane.b32.xlu1 %v4774_v8, %s4695_s24 }
 0x12b   : > { %1105 = vrot.lane.b32.xlu0 %v4813_v15, %s4695_s24  ;;  %v5139_v7 = vpop.permute.xlu2 %604 }
 0x12c   : > { %v5141_v11 = vpop.permute.xlu1 %580 }
 0x12d   : > { %10280 = vst [vmem:[#allocation33_spill] sm:$0xff] %v5141_v11  ;;  %v546_v6 = vpop.permute.xlu0 %545  ;;  %v562_v11 = vsel %vm10165_vm2, %v544_v22, %v528_v31  ;;  %v560_v22 = vsel %vm10165_vm2, %v540_v36, %v524_v20  ;;  %v10290_v31 = vmov 0 }
 0x12e   : > { %v563_v0 = vsel %vm10165_vm2, %v546_v6, %v530_v17  ;;  %v555_v15 = vsel %vm10165_vm2, %v530_v17, %v546_v6  ;;  %v553_v6 = vsel %vm10165_vm2, %v5064_v61, %v542_v25  ;;  %v10291_v31 = vsel %vm5193_vm5, 4294967295, %v10290_v31 }
 0x12f   : > { %4025 = vmatpush.msk.msra.mxu0 %vm5143_vm0, %v563_v0  ;;  %4049 = vmatpush.msk.msra.mxu2 %vm5147_vm1, %v555_v15  ;;  %v561_v0 = vsel %vm10165_vm2, %v542_v25, %v5064_v61  ;;  %10292 = vst [vmem:[#allocation37_spill] sm:$0xff] %v10291_v31  ;;  %v552_v25 = vsel %vm10165_vm2, %v524_v20, %v540_v36 }
 0x130   : > { %v559_v20 = vsel %vm10165_vm2, %v5088_v30, %v5100_v16  ;;  %v558_v36 = vsel %vm10165_vm2, %v536_v27, %v5052_v58  ;;  %v549_v27 = vsel %vm10165_vm2, %v5090_v19, %v5116_v23 }
 0x131   : > { %4026 = vmatpush.msk.msra.mxu0 %vm5143_vm0, %v562_v11  ;;  %4050 = vmatpush.msk.msra.mxu2 %vm5147_vm1, %v554_v54  ;;  %v10287_v11 = vmov 0 }
 0x132   : > { %1109 = vrot.lane.b32.xlu2 %v4802_v13, %s4695_s24  ;;  %1111 = vrot.lane.b32.xlu1 %v4793_v12, %s4695_s24  ;;  %v10288_v11 = vsel %vm5182_vm3, 4294967295, %v10287_v11 }
 0x133   : > { %1113 = vrot.lane.b32.xlu0 %v4785_v10, %s4695_s24  ;;  %4027 = vmatpush.msk.msra.mxu0 %vm5143_vm0, %v561_v0  ;;  %10289 = vst [vmem:[#allocation36_spill] sm:$0xff] %v10288_v11  ;;  %v5188_v15 = vpop.permute.xlu2 %600  ;;  %v556_v0 = vsel %vm10165_vm2, %v5076_v21, %v5092_v28 }
 0x134   : > { %4051 = vmatpush.msk.msra.mxu2 %vm5147_vm1, %v553_v6  ;;  %v595_v17 = vpop.permute.xlu1 %594 }
 0x135   : > { %v5199_v40 = vpop.permute.xlu0 %584  ;;  %4028 = vmatpush.msk.msra.mxu0 %vm5143_vm0, %v560_v22  ;;  %v5205_v54 = vsel %vm10164_vm4, %v595_v17, %v611_v1  ;;  %v5209_v61 = vsel %vm10164_vm4, %v611_v1, %v595_v17  ;;  %v551_v1 = vsel %vm10165_vm2, %v5100_v16, %v5088_v30  ;;  %v557_v16 = vsel %vm10165_vm2, %v5116_v23, %v5090_v19 }
 0x136   : > { %10293 = vst [vmem:[#allocation38_spill] sm:$0xff] %v5205_v54  ;;  %4052 = vmatpush.msk.msra.mxu2 %vm5147_vm1, %v552_v25  ;;  %4033 = vmatpush.msk.msra.mxu1 %vm5182_vm3, %v5205_v54  ;;  %v548_v19 = vsel %vm10165_vm2, %v5092_v28, %v5076_v21  ;;  %v490_v28 = vsel %vm10166_vm7, %v5056_v60, %v5040_v55 }
 0x137   : > { %10294 = vst [vmem:[#allocation39_spill] sm:$0xff] %v5209_v61  ;;  %4029 = vmatpush.msk.msra.mxu0 %vm5143_vm0, %v559_v20  ;;  %4057 = vmatpush.msk.msra.mxu3 %vm5193_vm5, %v5209_v61  ;;  %v424_v17 = vsel %vm10110_vm6, %v4982_v41, %v5020_v51  ;;  %v489_v22 = vsel %vm10166_vm7, %v5004_v46, %v5078_v18 }
 0x138   : > { %4053 = vmatpush.msk.msra.mxu2 %vm5147_vm1, %v551_v1  ;;  %v423_v25 = vsel %vm10110_vm6, %v4984_v42, %v4968_v37  ;;  %v488_v20 = vsel %vm10166_vm7, %v5042_v56, %v5080_v24  ;;  %v3995_v1 = vld [vmem:[%s10060_s1 + $0x90] sm:$0xff] }
 0x139   : > { %4030 = vmatpush.msk.msra.mxu0 %vm5143_vm0, %v558_v36 }
 0x13a   : > { %4054 = vmatpush.msk.msra.mxu2 %vm5147_vm1, %v550_v59  ;;  %1166 = vrot.lane.b32.xlu1 %v4752_v3, %s4696_s25  ;;  %v3993_v3 = vld [vmem:[%s10060_s1 + $0x80] sm:$0xff] }
 0x13b   : > { %1107 = vrot.lane.b32.xlu0 %v4808_v14, %s4695_s24  ;;  %4031 = vmatpush.msk.msra.mxu0 %vm5143_vm0, %v557_v16  ;;  %v5260_v30 = vpop.permute.xlu2 %1022 }
 0x13c   : > { %4055 = vmatpush.msk.msra.mxu2 %vm5147_vm1, %v549_v27  ;;  %v609_v58 = vpop.permute.xlu1 %608  ;;  %1182 = vrot.lane.b32.xlu2 %v4774_v8, %s4696_s25  ;;  %v425_v8 = vsel %vm10110_vm6, %v4946_v32, %v5018_v50  ;;  %v421_v27 = vsel %vm10110_vm6, %v4970_v38, %v5008_v48 }
 0x13d   : > { %v593_v23 = vpop.permute.xlu0 %592  ;;  %4032 = vmatpush.msk.msra.mxu0 %vm5143_vm0, %v556_v0 }
 0x13e   : > { %4056 = vmatpush.msk.msra.mxu2 %vm5147_vm1, %v548_v19  ;;  %686 = vmatmul.f32.vlgmr.msra.gmra.mxu0 %v3993_v3  ;;  %v5284_v6 = vsel %vm10164_vm4, %v593_v23, %v609_v58  ;;  %v5288_v21 = vsel %vm10164_vm4, %v609_v58, %v593_v23  ;;  %v486_v58 = vsel %vm10166_vm7, %v4992_v43, %v5066_v62 }
 0x13f   : > { %10295 = vst [vmem:[#allocation40_spill] sm:$0xff] %v5284_v6  ;;  %768 = vmatmul.f32.vlgmr.msra.gmra.mxu2 %v3993_v3  ;;  %940 = vmatpush.msrb.mxu0 %v425_v8  ;;  %v485_v23 = vsel %vm10166_vm7, %v5030_v53, %v5068_v63  ;;  %v10301_v8 = vld [vmem:[#allocation28_spill] sm:$0xff] }
 0x140   : > { %10296 = vst [vmem:[#allocation41_spill] sm:$0xff] %v5288_v21  ;;  %4113 = vmatpush.msk.msrb.mxu2 %vm5193_vm5, %v490_v28  ;;  %4034 = vmatpush.msk.msra.mxu1 %vm5182_vm3, %v5284_v6  ;;  %v484_v28 = vsel %vm10166_vm7, %v10301_v8, %v5016_v49  ;;  %v10326_v6 = vld [vmem:[#allocation12_spill] sm:$0xff] }
 0x141   : > { %4058 = vmatpush.msk.msra.mxu3 %vm5193_vm5, %v5288_v21  ;;  %941 = vmatpush.msrb.mxu0 %v424_v17  ;;  %v3997_v17 = vld [vmem:[%s10060_s1 + $0xa0] sm:$0xff] }
 0x142   : > { %4114 = vmatpush.msk.msrb.mxu2 %vm5193_vm5, %v489_v22  ;;  %1180 = vrot.lane.b32.xlu1 %v4780_v9, %s4696_s25  ;;  %v422_v9 = vsel %vm10110_vm6, %v4934_v29, %v5006_v47  ;;  %v10302_v22 = vld [vmem:[#allocation2_spill] sm:$0xff] }
 0x143   : > { %942 = vmatpush.msrb.mxu0 %v423_v25  ;;  %1164 = vrot.lane.b32.xlu0 %v4756_v4, %s4696_s25  ;;  %v5333_v36 = vpop.permute.xlu2 %1028  ;;  %v487_v4 = vsel %vm10166_vm7, %v5044_v57, %v5028_v52  ;;  %v10303_v25 = vld [vmem:[#allocation27_spill] sm:$0xff] }
 0x144   : > { %4115 = vmatpush.msk.msrb.mxu2 %vm5193_vm5, %v488_v20  ;;  %v589_v59 = vpop.permute.xlu1 %588  ;;  %1162 = vrot.lane.b32.xlu2 %v4760_v5, %s4696_s25  ;;  %v10304_v20 = vld [vmem:[#allocation24_spill] sm:$0xff] }
 0x145   : > { %943 = vmatpush.msrb.mxu0 %v422_v9  ;;  %v607_v16 = vpop.permute.xlu0 %606  ;;  %v5364_v0 = vsel %vm10164_vm4, %v589_v59, %v5139_v7  ;;  %v5378_v19 = vsel %vm10164_vm4, %v5139_v7, %v589_v59  ;;  %v419_v7 = vsel %vm10110_vm6, %v4922_v26, %v4994_v44  ;;  %v10305_v59 = vld [vmem:[#allocation29_spill] sm:$0xff] }
 0x146   : > { %4116 = vmatpush.msk.msrb.mxu2 %vm5193_vm5, %v487_v4  ;;  %689 = vmatmul.f32.gmra.mxu0 %v3995_v1  ;;  %v5350_v5 = vsel %vm10164_vm4, %v5126_v33, %v607_v16  ;;  %v5355_v3 = vsel %vm10164_vm4, %v607_v16, %v5126_v33  ;;  %10299 = vst [vmem:[#allocation44_spill] sm:$0xff] %v5364_v0  ;;  %v10306_v4 = vld [vmem:[#allocation26_spill] sm:$0xff] }
 0x147   : > { %10297 = vst [vmem:[#allocation42_spill] sm:$0xff] %v5350_v5  ;;  %771 = vmatmul.f32.gmra.mxu2 %v3995_v1  ;;  %944 = vmatpush.msrb.mxu0 %v421_v27  ;;  %v420_v33 = vsel %vm10110_vm6, %v4972_v39, %v4956_v34  ;;  %v418_v1 = vsel %vm10110_vm6, %v10304_v20, %v10303_v25 }
 0x148   : > { %10298 = vst [vmem:[#allocation43_spill] sm:$0xff] %v5355_v3  ;;  %4117 = vmatpush.msk.msrb.mxu2 %vm5193_vm5, %v486_v58  ;;  %4035 = vmatpush.msk.msra.mxu1 %vm5182_vm3, %v5350_v5  ;;  %v483_v16 = vsel %vm10166_vm7, %v10306_v4, %v10305_v59 }
 0x149   : > { %10300 = vst [vmem:[#allocation45_spill] sm:$0xff] %v5378_v19  ;;  %4059 = vmatpush.msk.msra.mxu3 %vm5193_vm5, %v5355_v3  ;;  %945 = vmatpush.msrb.mxu0 %v420_v33  ;;  %v10307_v33 = vld [vmem:[#allocation25_spill] sm:$0xff] }
 0x14a   : > { %4118 = vmatpush.msk.msrb.mxu2 %vm5193_vm5, %v485_v23  ;;  %4036 = vmatpush.msk.msra.mxu1 %vm5182_vm3, %v5364_v0  ;;  %v10308_v23 = vld [vmem:[#allocation18_spill] sm:$0xff]  ;;  %v10319_v3 = vld [vmem:[#allocation5_spill] sm:$0xff]  ;;  %v10330_v0 = vmov 0 }
 0x14b   : > { %4060 = vmatpush.msk.msra.mxu3 %vm5193_vm5, %v5378_v19  ;;  %946 = vmatpush.msrb.mxu0 %v419_v7  ;;  %v5423_v58 = vpop.permute.xlu2 %1034  ;;  %v10321_v19 = vld [vmem:[#allocation15_spill] sm:$0xff]  ;;  %v10331_v0 = vsel %vm5538_vm11, 4294967295, %v10330_v0 }
 0x14c   : > { %4119 = vmatpush.msk.msrb.mxu2 %vm5193_vm5, %v484_v28  ;;  %1160 = vrot.lane.b32.xlu1 %v10302_v22, %s4696_s25  ;;  %v603_v9 = vpop.permute.xlu1 %602  ;;  %v10311_v22 = vld [vmem:[#allocation16_spill] sm:$0xff] }
 0x14d   : > { %1178 = vrot.lane.b32.xlu0 %v4785_v10, %s4696_s25  ;;  %947 = vmatpush.msrb.mxu0 %v418_v1  ;;  %v587_v27 = vpop.permute.xlu0 %586  ;;  %v360_v10 = vsel %vm10108_vm8, %v10308_v23, %v10307_v33  ;;  %v10312_v1 = vld [vmem:[#allocation19_spill] sm:$0xff]  ;;  %10332 = vst [vmem:[#allocation16_spill] sm:$0xff] %v10331_v0 }
 0x14e   : > { %4120 = vmatpush.msk.msrb.mxu2 %vm5193_vm5, %v483_v16  ;;  %692 = vmatmul.f32.gmra.mxu0 %v3997_v17  ;;  %v5431_v7 = vsel %vm10164_vm4, %v587_v27, %v603_v9  ;;  %v5435_v28 = vsel %vm10164_vm4, %v603_v9, %v587_v27  ;;  %v359_v16 = vsel %vm10108_vm8, %v10312_v1, %v10311_v22  ;;  %v10315_v27 = vld [vmem:[#allocation22_spill] sm:$0xff] }
 0x14f   : > { %10309 = vst [vmem:[#allocation28_spill] sm:$0xff] %v5431_v7  ;;  %774 = vmatmul.f32.gmra.mxu2 %v3997_v17  ;;  %4105 = vmatpush.msk.msrb.mxu0 %vm5147_vm1, %v360_v10  ;;  %v5455_v17 = vsel %vm10164_vm4, %v5199_v40, %v5188_v15  ;;  %v5461_v9 = vsel %vm10164_vm4, %v5188_v15, %v5199_v40  ;;  %v10316_v10 = vld [vmem:[#allocation10_spill] sm:$0xff]  ;;  %v10317_v15 = vld [vmem:[#allocation23_spill] sm:$0xff]  ;;  %v10318_v40 = vld [vmem:[#allocation9_spill] sm:$0xff] }
 0x150   : > { %10310 = vst [vmem:[#allocation2_spill] sm:$0xff] %v5435_v28  ;;  %4037 = vmatpush.msk.msra.mxu1 %vm5182_vm3, %v5431_v7  ;;  %4061 = vmatpush.msk.msra.mxu3 %vm5193_vm5, %v5435_v28  ;;  %v357_v21 = vsel %vm10108_vm8, %v10318_v40, %v10317_v15  ;;  %v10320_v28 = vld [vmem:[#allocation13_spill] sm:$0xff] }
 0x151   : > { %4106 = vmatpush.msk.msrb.mxu0 %vm5147_vm1, %v359_v16  ;;  %10313 = vst [vmem:[#allocation27_spill] sm:$0xff] %v5455_v17  ;;  %1176 = vrot.lane.b32.xlu2 %v4793_v12, %s4696_s25  ;;  %v358_v16 = vsel %vm10108_vm8, %v10316_v10, %v10315_v27  ;;  %v3999_v12 = vld [vmem:[%s10060_s1 + $0xb0] sm:$0xff] }
 0x152   : > { %10314 = vst [vmem:[#allocation24_spill] sm:$0xff] %v5461_v9  ;;  %4038 = vmatpush.msk.msra.mxu1 %vm5182_vm3, %v5455_v17  ;;  %4062 = vmatpush.msk.msra.mxu3 %vm5193_vm5, %v5461_v9  ;;  %v356_v9 = vsel %vm10108_vm8, %v10321_v19, %v10320_v28 }
 0x153   : > { %4107 = vmatpush.msk.msrb.mxu0 %vm5147_vm1, %v358_v16 }
 0x154   : > { %1174 = vrot.lane.b32.xlu1 %v4802_v13, %s4696_s25  ;;  %v597_v61 = vpop.permute.xlu1 %596  ;;  %v10322_v13 = vld [vmem:[#allocation30_spill] sm:$0xff] }
 0x155   : > { %1158 = vrot.lane.b32.xlu0 %v10319_v3, %s4696_s25  ;;  %4108 = vmatpush.msk.msrb.mxu0 %vm5147_vm1, %v357_v21  ;;  %v599_v16 = vpop.permute.xlu0 %598  ;;  %v5507_v21 = vpop.permute.xlu2 %1040  ;;  %v10325_v3 = vld [vmem:[#allocation20_spill] sm:$0xff] }
 0x156   : > { %695 = vmatmul.f32.gmra.mxu0 %v3999_v12  ;;  %v5497_v54 = vsel %vm10164_vm4, %v10322_v13, %v599_v16  ;;  %v5502_v5 = vsel %vm10164_vm4, %v599_v16, %v10322_v13  ;;  %v355_v16 = vsel %vm10108_vm8, %v10326_v6, %v10325_v3 }
 0x157   : > { %10323 = vst [vmem:[#allocation29_spill] sm:$0xff] %v5497_v54  ;;  %777 = vmatmul.f32.gmra.mxu2 %v3999_v12  ;;  %4109 = vmatpush.msk.msrb.mxu0 %vm5147_vm1, %v356_v9  ;;  %v3994_v12 = vld [vmem:[%s10060_s1 + $0x88] sm:$0xff]  ;;  %v10327_v9 = vld [vmem:[#allocation33_spill] sm:$0xff] }
 0x158   : > { %10324 = vst [vmem:[#allocation26_spill] sm:$0xff] %v5502_v5  ;;  %4039 = vmatpush.msk.msra.mxu1 %vm5182_vm3, %v5497_v54  ;;  %4063 = vmatpush.msk.msra.mxu3 %vm5193_vm5, %v5502_v5  ;;  %v5527_v13 = vsel %vm10164_vm4, %v10327_v9, %v597_v61  ;;  %v5532_v5 = vsel %vm10164_vm4, %v597_v61, %v10327_v9 }
 0x159   : > { %4110 = vmatpush.msk.msrb.mxu0 %vm5147_vm1, %v355_v16  ;;  %10328 = vst [vmem:[#allocation25_spill] sm:$0xff] %v5527_v13  ;;  %v10333_v16 = vld [vmem:[#allocation3_spill] sm:$0xff]  ;;  %v433_v61 = vsel %vm10110_vm6, %v5018_v50, %v4946_v32  ;;  %v498_v9 = vsel %vm10166_vm7, %v5040_v55, %v5056_v60  ;;  %v10336_v32 = vld [vmem:[#allocation6_spill] sm:$0xff]  ;;  %v432_v50 = vsel %vm10110_vm6, %v5020_v51, %v4982_v41 }
 0x15a   : > { %10329 = vst [vmem:[#allocation18_spill] sm:$0xff] %v5532_v5  ;;  %1156 = vrot.lane.b32.xlu2 %v10333_v16, %s4696_s25  ;;  %4040 = vmatpush.msk.msra.mxu1 %vm5182_vm3, %v5527_v13  ;;  %v10334_v16 = vld [vmem:[#allocation21_spill] sm:$0xff]  ;;  %v4001_v60 = vld [vmem:[%s10060_s1 + $0xc0] sm:$0xff] }
 0x15b   : > { %4064 = vmatpush.msk.msra.mxu3 %vm5193_vm5, %v5532_v5  ;;  %4041 = vmatmul.msk.f32.vlgmr.msra.gmra.mxu1 %vm645_vm10, %v3994_v12  ;;  %v10335_v5 = vld [vmem:[#allocation17_spill] sm:$0xff] }
 0x15c   : > { %4065 = vmatmul.msk.f32.vlgmr.msra.gmra.mxu3 %vm645_vm10, %v3994_v12  ;;  %4073 = vmatpush.msk.msrb.mxu1 %vm10109_vm9, %v433_v61  ;;  %v354_v12 = vsel %vm10108_vm8, %v10335_v5, %v10334_v16  ;;  %v5568_v17 = vpop.permute.xlu1 %1026  ;;  %v497_v61 = vsel %vm10166_vm7, %v5078_v18, %v5004_v46  ;;  %v496_v18 = vsel %vm10166_vm7, %v5080_v24, %v5042_v56  ;;  %v3996_v46 = vld [vmem:[%s10060_s1 + $0x98] sm:$0xff] }
 0x15d   : > { %4089 = vmatpush.msk.msrb.mxu3 %vm5538_vm11, %v498_v9  ;;  %4111 = vmatpush.msk.msrb.mxu0 %vm5147_vm1, %v354_v12  ;;  %v5578_v55 = vpop.permute.xlu0 %1024  ;;  %v10337_v9 = vld [vmem:[#allocation11_spill] sm:$0xff]  ;;  %v10338_v12 = vld [vmem:[#allocation14_spill] sm:$0xff]  ;;  %v5614_v51 = vpop.permute.xlu2 %1046  ;;  %v495_v24 = vsel %vm10166_vm7, %v5028_v52, %v5044_v57  ;;  %v4003_v57 = vld [vmem:[%s10060_s1 + $0xd0] sm:$0xff] }
 0x15e   : > { %1154 = vrot.lane.b32.xlu1 %v10336_v32, %s4696_s25  ;;  %1172 = vrot.lane.b32.xlu0 %v4808_v14, %s4696_s25  ;;  %v353_v41 = vsel %vm10108_vm8, %v10338_v12, %v10337_v9  ;;  %v431_v14 = vsel %vm10110_vm6, %v4968_v37, %v4984_v42  ;;  %v430_v37 = vsel %vm10110_vm6, %v5006_v47, %v4934_v29  ;;  %v10339_v42 = vld [vmem:[#allocation8_spill] sm:$0xff] }
 0x15f   : > { %4074 = vmatpush.msk.msrb.mxu1 %vm10109_vm9, %v432_v50  ;;  %4090 = vmatpush.msk.msrb.mxu3 %vm5538_vm11, %v497_v61  ;;  %v429_v29 = vsel %vm10110_vm6, %v5008_v48, %v4970_v38  ;;  %v494_v47 = vsel %vm10166_vm7, %v5066_v62, %v4992_v43  ;;  %v10340_v38 = vld [vmem:[#allocation7_spill] sm:$0xff]  ;;  %v10341_v48 = vld [vmem:[#allocation4_spill] sm:$0xff]  ;;  %v428_v43 = vsel %vm10110_vm6, %v4956_v34, %v4972_v39  ;;  %v4004_v61 = vld [vmem:[%s10060_s1 + $0xd8] sm:$0xff] }
 0x160   : > { %4112 = vmatpush.msk.msrb.mxu0 %vm5147_vm1, %v353_v41  ;;  %780 = vmatmul.f32.gmra.mxu2 %v4001_v60  ;;  %v493_v62 = vsel %vm10166_vm7, %v5068_v63, %v5030_v53  ;;  %v427_v32 = vsel %vm10110_vm6, %v4994_v44, %v4922_v26  ;;  %v492_v34 = vsel %vm10166_vm7, %v5016_v49, %v10301_v8  ;;  %v3998_v39 = vld [vmem:[%s10060_s1 + $0xa8] sm:$0xff]  ;;  %v10342_v49 = vmov 0  ;;  %v197_v41 = vld [vmem:[%s10060_s1 + $0x10] sm:$0xff] }
 0x161   : > { %698 = vmatmul.f32.gmra.mxu0 %v4001_v60  ;;  %4075 = vmatpush.msk.msrb.mxu1 %vm10109_vm9, %v431_v14  ;;  %v426_v26 = vsel %vm10110_vm6, %v10303_v25, %v10304_v20  ;;  %v491_v44 = vsel %vm10166_vm7, %v10305_v59, %v10306_v4  ;;  %v10343_v49 = vsel %vm5694_vm12, 4294967295, %v10342_v49  ;;  %v368_v63 = vsel %vm10108_vm8, %v10307_v33, %v10308_v23  ;;  %v4005_v20 = vld [vmem:[%s10060_s1 + $0xe0] sm:$0xff]  ;;  %v4000_v33 = vld [vmem:[%s10060_s1 + $0xb8] sm:$0xff]  ;;  %v196_v50 = vld [vmem:[%s10060_s1 + $0x8] sm:$0xff] }
 0x162   : > { %4091 = vmatpush.msk.msrb.mxu3 %vm5538_vm11, %v496_v18  ;;  %1170 = vrot.lane.b32.xlu2 %v10339_v42, %s4696_s25  ;;  %10344 = vst [vmem:[#allocation19_spill] sm:$0xff] %v10343_v49  ;;  %v367_v59 = vsel %vm10108_vm8, %v10311_v22, %v10312_v1  ;;  %v366_v4 = vsel %vm10108_vm8, %v10315_v27, %v10316_v10  ;;  %v4007_v10 = vld [vmem:[%s10060_s1 + $0xf0] sm:$0xff]  ;;  %v198_v14 = vld [vmem:[%s10060_s1 + $0x18] sm:$0xff]  ;;  %v4006_v18 = vld [vmem:[%s10060_s1 + $0xe8] sm:$0xff]  ;;  %vm10167_vm6 = vcmp.lt.s32.totalorder %v5122_v2, 113 }
 0x163   : > { %4076 = vmatpush.msk.msrb.mxu1 %vm10109_vm9, %v430_v37  ;;  %v365_v23 = vsel %vm10108_vm8, %v10317_v15, %v10318_v40  ;;  %v364_v22 = vsel %vm10108_vm8, %v10320_v28, %v10321_v19  ;;  %v363_v40 = vsel %vm10108_vm8, %v10325_v3, %v10326_v6  ;;  %v362_v19 = vsel %vm10108_vm8, %v10334_v16, %v10335_v5  ;;  %v4002_v28 = vld [vmem:[%s10060_s1 + $0xc8] sm:$0xff]  ;;  %v195_v16 = vld [vmem:[%s10060_s1] sm:$0xff] }
 0x164   : > { %4092 = vmatpush.msk.msrb.mxu3 %vm5538_vm11, %v495_v24  ;;  %4042 = vmatmul.msk.f32.gmra.mxu1 %vm645_vm10, %v3996_v46  ;;  %v5640_v52 = vpop.permute.xlu1 %1032  ;;  %v361_v6 = vsel %vm10108_vm8, %v10337_v9, %v10338_v12  ;;  %v199_v42 = vld [vmem:[%s10060_s1 + $0x20] sm:$0xff] }
 0x165   : > { %4066 = vmatmul.msk.f32.gmra.mxu3 %vm645_vm10, %v3996_v46  ;;  %4077 = vmatpush.msk.msrb.mxu1 %vm10109_vm9, %v429_v29  ;;  %v5646_v56 = vpop.permute.xlu0 %1030  ;;  %v5702_v53 = vpop.permute.xlu2 %1052  ;;  %v200_v29 = vld [vmem:[%s10060_s1 + $0x28] sm:$0xff] }
 0x166   : > { %4093 = vmatpush.msk.msrb.mxu3 %vm5538_vm11, %v494_v47  ;;  %1168 = vrot.lane.b32.xlu1 %v10340_v38, %s4696_s25  ;;  %v4008_v47 = vld [vmem:[%s10060_s1 + $0xf8] sm:$0xff] }
 0x167   : > { %1152 = vrot.lane.b32.xlu0 %v10341_v48, %s4696_s25  ;;  %4078 = vmatpush.msk.msrb.mxu1 %vm10109_vm9, %v428_v43  ;;  %v5829_v43 = vld [vmem:[%s10060_s1 + $0x30] sm:$0xff] }
 0x168   : > { %4094 = vmatpush.msk.msrb.mxu3 %vm5538_vm11, %v493_v62  ;;  %783 = vmatmul.f32.gmra.mxu2 %v4003_v57  ;;  %v5834_v62 = vld [vmem:[%s10060_s1 + $0x38] sm:$0xff] }
 0x169   : > { %701 = vmatmul.f32.gmra.mxu0 %v4003_v57  ;;  %4079 = vmatpush.msk.msrb.mxu1 %vm10109_vm9, %v427_v32  ;;  %v10345_v32 = vld [vmem:[#allocation32_spill] sm:$0xff] }
 0x16a   : > { %4095 = vmatpush.msk.msrb.mxu3 %vm5538_vm11, %v492_v34  ;;  %vm303_vm13 = vcmp.lt.s32.totalorder %v10345_v32, 240 }
 0x16b   : > { %4080 = vmatpush.msk.msrb.mxu1 %vm10109_vm9, %v426_v26  ;;  %vm5904_vm8 = vmand %vm303_vm13, %vm5193_vm5 }
 0x16c   : > { %4096 = vmatpush.msk.msrb.mxu3 %vm5538_vm11, %v491_v44  ;;  %4043 = vmatmul.msk.f32.gmra.mxu1 %vm645_vm10, %v3998_v39  ;;  %v5710_v8 = vpop.permute.xlu1 %1038  ;;  %v5847_v44 = vld [vmem:[%s10060_s1 + $0x40] sm:$0xff]  ;;  %vm5958_vm9 = vmand %vm303_vm13, %vm5147_vm1 }
 0x16d   : > { %4067 = vmatmul.msk.f32.gmra.mxu3 %vm645_vm10, %v3998_v39  ;;  %4081 = vmatpush.msk.msrb.mxu1 %vm5694_vm12, %v368_v63  ;;  %v5714_v25 = vpop.permute.xlu0 %1036  ;;  %v5755_v15 = vpop.permute.xlu2 %1091  ;;  %v5852_v63 = vld [vmem:[%s10060_s1 + $0x48] sm:$0xff] }
 0x16f   : > { %4082 = vmatpush.msk.msrb.mxu1 %vm5694_vm12, %v367_v59 }
 0x170   : > { %786 = vmatmul.f32.gmra.mxu2 %v4005_v20 }
 0x171   : > { %704 = vmatmul.f32.gmra.mxu0 %v4005_v20  ;;  %4083 = vmatpush.msk.msrb.mxu1 %vm5694_vm12, %v366_v4 }
 0x173   : > { %4084 = vmatpush.msk.msrb.mxu1 %vm5694_vm12, %v365_v23 }
 0x174   : > { %4044 = vmatmul.msk.f32.gmra.mxu1 %vm645_vm10, %v4000_v33  ;;  %v5746_v1 = vpop.permute.xlu1 %1044 }
 0x175   : > { %4068 = vmatmul.msk.f32.gmra.mxu3 %vm645_vm10, %v4000_v33  ;;  %4085 = vmatpush.msk.msrb.mxu1 %vm5694_vm12, %v364_v22  ;;  %v5750_v27 = vpop.permute.xlu0 %1042  ;;  %v1098_v60 = vpop.permute.xlu2 %1097 }
 0x177   : > { %4086 = vmatpush.msk.msrb.mxu1 %vm5694_vm12, %v363_v40  ;;  %v5876_v40 = vld [vmem:[%s10060_s1 + $0x58] sm:$0xff] }
 0x178   : > { %789 = vmatmul.f32.gmra.mxu2 %v4007_v10 }
 0x179   : > { %707 = vmatmul.f32.gmra.mxu0 %v4007_v10  ;;  %4087 = vmatpush.msk.msrb.mxu1 %vm5694_vm12, %v362_v19  ;;  %v5871_v10 = vld [vmem:[%s10060_s1 + $0x50] sm:$0xff] }
 0x17b   : > { %4088 = vmatpush.msk.msrb.mxu1 %vm5694_vm12, %v361_v6 }
 0x17c   : > { %4045 = vmatmul.msk.f32.gmra.mxu1 %vm645_vm10, %v4002_v28  ;;  %v5780_v5 = vpop.permute.xlu1 %1050 }
 0x17d   : > { %4069 = vmatmul.msk.f32.gmra.mxu3 %vm645_vm10, %v4002_v28  ;;  %v5782_v3 = vpop.permute.xlu0 %1048  ;;  %v5810_v46 = vpop.permute.xlu2 %1103 }
 0x180   : > { %4121 = vmatmul.msk.f32.vlgmr.msrb.gmra.mxu2 %vm645_vm10, %v196_v50 }
 0x181   : > { %956 = vmatmul.f32.vlgmr.msrb.gmra.mxu0 %v195_v16 }
 0x184   : > { %4046 = vmatmul.msk.f32.gmra.mxu1 %vm645_vm10, %v4004_v61  ;;  %v5796_v9 = vpop.permute.xlu1 %1089 }
 0x185   : > { %4070 = vmatmul.msk.f32.gmra.mxu3 %vm645_vm10, %v4004_v61  ;;  %v5798_v12 = vpop.permute.xlu0 %1087  ;;  %v1116_v57 = vpop.permute.xlu2 %1115 }
 0x188   : > { %4122 = vmatmul.msk.f32.gmra.mxu2 %vm645_vm10, %v198_v14 }
 0x189   : > { %959 = vmatmul.f32.gmra.mxu0 %v197_v41 }
 0x18c   : > { %4047 = vmatmul.msk.f32.gmra.mxu1 %vm645_vm10, %v4006_v18  ;;  %v1096_v37 = vpop.permute.xlu1 %1095 }
 0x18d   : > { %4071 = vmatmul.msk.f32.gmra.mxu3 %vm645_vm10, %v4006_v18  ;;  %v1094_v24 = vpop.permute.xlu0 %1093  ;;  %v1110_v59 = vpop.permute.xlu2 %1109 }
 0x18e   : > { %v1131_v61 = vsel %vm1119_vm14, %v1110_v59, %v1094_v24 }
 0x190   : > { %4123 = vmatmul.msk.f32.gmra.mxu2 %vm645_vm10, %v200_v29 }
 0x191   : > { %962 = vmatmul.f32.gmra.mxu0 %v199_v42 }
 0x194   : > { %4048 = vmatmul.msk.f32.gmra.mxu1 %vm645_vm10, %v4008_v47  ;;  %v1102_v38 = vpop.permute.xlu1 %1101 }
 0x195   : > { %4072 = vmatmul.msk.f32.gmra.mxu3 %vm645_vm10, %v4008_v47  ;;  %v1100_v48 = vpop.permute.xlu0 %1099  ;;  %v5916_v47 = vld [vmem:[%s10060_s1 + $0x60] sm:$0xff] }
 0x196   : > { %v1126_v4 = vsel %vm1119_vm14, %v1100_v48, %v1116_v57  ;;  %v1134_v33 = vsel %vm1119_vm14, %v1116_v57, %v1100_v48  ;;  %v1183_v6 = vpop.permute.xlu2 %1182  ;;  %v5921_v57 = vld [vmem:[%s10060_s1 + $0x68] sm:$0xff] }
 0x198   : > { %4124 = vmatmul.msk.f32.gmra.mxu2 %vm645_vm10, %v5834_v62 }
 0x199   : > { %965 = vmatmul.f32.gmra.mxu0 %v5829_v43 }
 0x19c   : > { %874 = vmatmul.f32.vlgmr.msrb.gmra.mxu1 %v195_v16  ;;  %v1118_v34 = vpop.permute.xlu1 %1117 }
 0x19d   : > { %4097 = vmatmul.msk.f32.vlgmr.msrb.gmra.mxu3 %vm645_vm10, %v196_v50  ;;  %v1135_v39 = vsel %vm1119_vm14, %v1118_v34, %v1102_v38  ;;  %v1106_v26 = vpop.permute.xlu0 %1105  ;;  %v1127_v20 = vsel %vm1119_vm14, %v1102_v38, %v1118_v34  ;;  %v1120_v34 = vsel %vm1119_vm14, %v5798_v12, %v5810_v46 }
 0x19e   : > { %1241 = vmatpush.msra.mxu1 %v1127_v20  ;;  %4153 = vmatpush.msk.msra.mxu0 %vm303_vm13, %v1135_v39  ;;  %v1121_v38 = vsel %vm1119_vm14, %v5796_v9, %v1106_v26  ;;  %v1163_v48 = vpop.permute.xlu2 %1162  ;;  %v1128_v39 = vsel %vm1119_vm14, %v5810_v46, %v5798_v12  ;;  %v1062_v46 = vsel %vm10167_vm6, %v5714_v25, %v5702_v53 }
 0x1a0   : > { %4125 = vmatmul.msk.f32.gmra.mxu2 %vm645_vm10, %v5852_v63  ;;  %1242 = vmatpush.msra.mxu1 %v1126_v4  ;;  %v1069_v4 = vsel %vm10167_vm6, %v5780_v5, %v5423_v58 }
 0x1a1   : > { %968 = vmatmul.f32.gmra.mxu0 %v5847_v44 }
 0x1a2   : > { %4154 = vmatpush.msk.msra.mxu0 %vm303_vm13, %v1134_v33  ;;  %v1060_v33 = vsel %vm10167_vm6, %v5640_v52, %v5782_v3 }
 0x1a4   : > { %877 = vmatmul.f32.gmra.mxu1 %v197_v41  ;;  %v1112_v23 = vpop.permute.xlu1 %1111  ;;  %v10346_v41 = vmov 0 }
 0x1a5   : > { %4098 = vmatmul.msk.f32.gmra.mxu3 %vm645_vm10, %v198_v14  ;;  %v1114_v22 = vpop.permute.xlu0 %1113  ;;  %v1124_v16 = vsel %vm1119_vm14, %v1096_v37, %v1112_v23  ;;  %v1132_v50 = vsel %vm1119_vm14, %v1112_v23, %v1096_v37  ;;  %v10347_v41 = vsel %vm5904_vm8, 4294967295, %v10346_v41  ;;  %v1068_v23 = vsel %vm10167_vm6, %v5782_v3, %v5640_v52 }
 0x1a6   : > { %v1125_v19 = vsel %vm1119_vm14, %v1098_v60, %v1114_v22  ;;  %v1133_v28 = vsel %vm1119_vm14, %v1114_v22, %v1098_v60  ;;  %v1123_v60 = vsel %vm1119_vm14, %v1094_v24, %v1110_v59  ;;  %10348 = vst [vmem:[#allocation22_spill] sm:$0xff] %v10347_v41  ;;  %v1059_v22 = vsel %vm10167_vm6, %v5646_v56, %v5614_v51 }
 0x1a7   : > { %1243 = vmatpush.msra.mxu1 %v1125_v19  ;;  %4155 = vmatpush.msk.msra.mxu0 %vm303_vm13, %v1133_v28  ;;  %v1067_v52 = vsel %vm10167_vm6, %v5614_v51, %v5646_v56  ;;  %v1057_v56 = vsel %vm10167_vm6, %v5568_v17, %v5750_v27 }
 0x1a8   : > { %4126 = vmatmul.msk.f32.gmra.mxu2 %vm645_vm10, %v5876_v40 }
 0x1a9   : > { %971 = vmatmul.f32.gmra.mxu0 %v5871_v10  ;;  %1244 = vmatpush.msra.mxu1 %v1124_v16  ;;  %v1056_v16 = vsel %vm10167_vm6, %v5578_v55, %v5507_v21 }
 0x1aa   : > { %4156 = vmatpush.msk.msra.mxu0 %vm303_vm13, %v1132_v50 }
 0x1ab   : > { %1245 = vmatpush.msra.mxu1 %v1123_v60  ;;  %v1055_v60 = vsel %vm10167_vm6, %v5260_v30, %v5710_v8 }
 0x1ac   : > { %4157 = vmatpush.msk.msra.mxu0 %vm303_vm13, %v1131_v61  ;;  %880 = vmatmul.f32.gmra.mxu1 %v199_v42  ;;  %v1167_v14 = vpop.permute.xlu1 %1166 }
 0x1ad   : > { %4099 = vmatmul.msk.f32.gmra.mxu3 %vm645_vm10, %v200_v29  ;;  %v1192_v18 = vsel %vm10168_vm15, %v1167_v14, %v1183_v6  ;;  %v1200_v37 = vsel %vm10168_vm15, %v1183_v6, %v1167_v14  ;;  %v1108_v24 = vpop.permute.xlu0 %1107 }
 0x1ae   : > { %v1122_v42 = vsel %vm1119_vm14, %v5755_v15, %v1108_v24  ;;  %4137 = vmatpush.msk.msra.mxu3 %vm5182_vm3, %v1192_v18  ;;  %v1130_v29 = vsel %vm1119_vm14, %v1108_v24, %v5755_v15  ;;  %4169 = vmatpush.msk.msra.mxu2 %vm5904_vm8, %v1200_v37  ;;  %v1129_v15 = vsel %vm1119_vm14, %v1106_v26, %v5796_v9  ;;  %v10349_v9 = vmov 0  ;;  %v4011_v37 = vld [vmem:[%s10060_s1 + $0x110] sm:$0xff] }
 0x1af   : > { %1246 = vmatpush.msra.mxu1 %v1122_v42  ;;  %4158 = vmatpush.msk.msra.mxu0 %vm303_vm13, %v1130_v29  ;;  %v10350_v9 = vsel %vm5958_vm9, 4294967295, %v10349_v9  ;;  %v1070_v26 = vsel %vm10167_vm6, %v5702_v53, %v5714_v25  ;;  %v1061_v53 = vsel %vm10167_vm6, %v5423_v58, %v5780_v5  ;;  %v1177_v58 = vpop.permute.xlu2 %1176 }
 0x1b0   : > { %4127 = vmatmul.msk.f32.gmra.mxu2 %vm645_vm10, %v5921_v57  ;;  %10351 = vst [vmem:[#allocation10_spill] sm:$0xff] %v10350_v9 }
 0x1b1   : > { %974 = vmatmul.f32.gmra.mxu0 %v5916_v47  ;;  %1247 = vmatpush.msra.mxu1 %v1121_v38 }
 0x1b2   : > { %4159 = vmatpush.msk.msra.mxu0 %vm303_vm13, %v1129_v15 }
 0x1b3   : > { %1248 = vmatpush.msra.mxu1 %v1120_v34  ;;  %v4697_v34 = vmov 0  }
 0x1b4   : > { %4160 = vmatpush.msk.msra.mxu0 %vm303_vm13, %v1128_v39  ;;  %883 = vmatmul.f32.gmra.mxu1 %v5829_v43  ;;  %v1181_v12 = vpop.permute.xlu1 %1180  ;;  %v5983_v43 = vld [vmem:[%s10060_s1 + $0x70] sm:$0xff]  ;;  %v188_v39 = vld [vmem:[%s10061_s2 + $0x8] sm:$0xff] }
 0x1b5   : > { %4100 = vmatmul.msk.f32.gmra.mxu3 %vm645_vm10, %v5834_v62  ;;  %4129 = vmatpush.msk.msra.mxu1 %vm5143_vm0, %v1062_v46  ;;  %v1165_v20 = vpop.permute.xlu0 %1164  ;;  %v5988_v62 = vld [vmem:[%s10060_s1 + $0x78] sm:$0xff]  ;;  %v4013_v46 = vld [vmem:[%s10060_s1 + $0x120] sm:$0xff] }
 0x1b6   : > { %4161 = vmatpush.msk.msra.mxu0 %vm5958_vm9, %v1070_v26  ;;  %v1191_v25 = vsel %vm10168_vm15, %v1165_v20, %v1181_v12  ;;  %v1199_v59 = vsel %vm10168_vm15, %v1181_v12, %v1165_v20  ;;  %4551 = vset.pattern.permute.xlu0 %v4697_v34 }
 0x1b7   : > { %4130 = vmatpush.msk.msra.mxu1 %vm5143_vm0, %v1061_v53  ;;  %4138 = vmatpush.msk.msra.mxu3 %vm5182_vm3, %v1191_v25  ;;  %v1157_v61 = vpop.permute.xlu2 %1156 }
 0x1b8   : > { %4128 = vmatmul.msk.f32.gmra.mxu2 %vm645_vm10, %v5988_v62  ;;  %4162 = vmatpush.msk.msra.mxu0 %vm5958_vm9, %v1069_v4  ;;  %v187_v4 = vld [vmem:[%s10061_s2] sm:$0xff] }
 0x1b9   : > { %977 = vmatmul.f32.gmra.mxu0 %v5983_v43  ;;  %4170 = vmatpush.msk.msra.mxu2 %vm5904_vm8, %v1199_v59  ;;  %v189_v59 = vld [vmem:[%s10061_s2 + $0x10] sm:$0xff] }
 0x1ba   : > { %4131 = vmatpush.msk.msra.mxu1 %vm5143_vm0, %v1060_v33  ;;  %4163 = vmatpush.msk.msra.mxu0 %vm5958_vm9, %v1068_v23  ;;  %v193_v33 = vld [vmem:[%s10061_s2 + $0x30] sm:$0xff] }
 0x1bb   : > { %v6025_v5 = vpop.f32.mrf.mxu0  ;;  %4552 = vset.pattern.permute.xlu1 %v4697_v34  ;;  %1428 = vperm.xlu0 %4551, %v188_v39   ;;  %v4015_v23 = vld [vmem:[%s10060_s1 + $0x130] sm:$0xff] }
 0x1bc   : > { %886 = vmatmul.f32.gmra.mxu1 %v5847_v44  ;;  %4164 = vmatpush.msk.msra.mxu0 %vm5958_vm9, %v1067_v52  ;;  %v1058_v44 = vsel %vm10167_vm6, %v5333_v36, %v5746_v1 }
 0x1bd   : > { %4101 = vmatmul.msk.f32.gmra.mxu3 %vm645_vm10, %v5852_v63  ;;  %4132 = vmatpush.msk.msra.mxu1 %vm5143_vm0, %v1059_v22  ;;  %v1066_v63 = vsel %vm10167_vm6, %v5746_v1, %v5333_v36  ;;  %v1065_v1 = vsel %vm10167_vm6, %v5750_v27, %v5568_v17  ;;  %v1064_v17 = vsel %vm10167_vm6, %v5507_v21, %v5578_v55  ;;  %v4009_v21 = vld [vmem:[%s10060_s1 + $0x100] sm:$0xff] }
 0x1be   : > { %v1161_v3 = vpop.permute.xlu1 %1160  ;;  %4165 = vmatpush.msk.msra.mxu0 %vm5958_vm9, %v1066_v63  ;;  %v1063_v55 = vsel %vm10167_vm6, %v5710_v8, %v5260_v30  ;;  %4550 = vset.pattern.permute.xlu2 %v4697_v34  ;;  %v191_v63 = vld [vmem:[%s10061_s2 + $0x20] sm:$0xff] }
 0x1bf   : > { %4133 = vmatpush.msk.msra.mxu1 %vm5143_vm0, %v1058_v44  ;;  %v1179_v51 = vpop.permute.xlu0 %1178  ;;  %v1189_v36 = vsel %vm10168_vm15, %v1161_v3, %v1177_v58  ;;  %v1197_v50 = vsel %vm10168_vm15, %v1177_v58, %v1161_v3  ;;  %v1171_v24 = vpop.permute.xlu2 %1170  ;;  %1433 = vperm.xlu1 %4552, %v189_v59   ;;  %v4012_v3 = vld [vmem:[%s10060_s1 + $0x118] sm:$0xff] }
 0x1c0   : > { %v1190_v19 = vsel %vm10168_vm15, %v1163_v48, %v1179_v51  ;;  %v1198_v28 = vsel %vm10168_vm15, %v1179_v51, %v1163_v48  ;;  %4166 = vmatpush.msk.msra.mxu0 %vm5958_vm9, %v1065_v1  ;;  %1423 = vperm.xlu2 %4550, %v187_v4   ;;  %v190_v51 = vld [vmem:[%s10061_s2 + $0x18] sm:$0xff]  ;;  %v4014_v1 = vld [vmem:[%s10060_s1 + $0x128] sm:$0xff] }
 0x1c1   : > { %4134 = vmatpush.msk.msra.mxu1 %vm5143_vm0, %v1057_v56  ;;  %4139 = vmatpush.msk.msra.mxu3 %vm5182_vm3, %v1190_v19  ;;  %v4017_v56 = vld [vmem:[%s10060_s1 + $0x140] sm:$0xff]  ;;  %v4024_v59 = vld [vmem:[%s10060_s1 + $0x178] sm:$0xff] }
 0x1c2   : > { %4171 = vmatpush.msk.msra.mxu2 %vm5904_vm8, %v1198_v28  ;;  %v6076_v6 = vpop.f32.mrf.mxu2  ;;  %4167 = vmatpush.msk.msra.mxu0 %vm5958_vm9, %v1064_v17  ;;  %v192_v17 = vld [vmem:[%s10061_s2 + $0x28] sm:$0xff] }
 0x1c3   : > { %4135 = vmatpush.msk.msra.mxu1 %vm5143_vm0, %v1056_v16  ;;  %v6088_v27 = vpop.f32.mrf.mxu0  ;;  %4140 = vmatpush.msk.msra.mxu3 %vm5182_vm3, %v1189_v36 }
 0x1c4   : > { %889 = vmatmul.f32.gmra.mxu1 %v5871_v10  ;;  %4168 = vmatpush.msk.msra.mxu0 %vm5958_vm9, %v1063_v55  ;;  %v4016_v55 = vld [vmem:[%s10060_s1 + $0x138] sm:$0xff] }
 0x1c5   : > { %4102 = vmatmul.msk.f32.gmra.mxu3 %vm645_vm10, %v5876_v40  ;;  %4136 = vmatpush.msk.msra.mxu1 %vm5143_vm0, %v1055_v60  ;;  %v4019_v60 = vld [vmem:[%s10060_s1 + $0x150] sm:$0xff] }
 0x1c6   : > { %v1175_v10 = vpop.permute.xlu1 %1174  ;;  %4172 = vmatpush.msk.msra.mxu2 %vm5904_vm8, %v1197_v50  ;;  %1339 = vmatmul.f32.vlgmr.msra.gmra.mxu0 %v4009_v21  ;;  %v194_v50 = vld [vmem:[%s10061_s2 + $0x38] sm:$0xff] }
 0x1c7   : > { %v1159_v14 = vpop.permute.xlu0 %1158  ;;  %1453 = vperm.xlu0 %4551, %v193_v33   ;;  %1443 = vperm.xlu1 %4552, %v191_v63  }
 0x1c8   : > { %v1188_v40 = vsel %vm10168_vm15, %v1159_v14, %v1175_v10  ;;  %v1196_v18 = vsel %vm10168_vm15, %v1175_v10, %v1159_v14  ;;  %1438 = vperm.xlu2 %4550, %v190_v51  }
 0x1c9   : > { %4141 = vmatpush.msk.msra.mxu3 %vm5182_vm3, %v1188_v40  ;;  %4173 = vmatpush.msk.msra.mxu2 %vm5904_vm8, %v1196_v18  ;;  %v4021_v40 = vld [vmem:[%s10060_s1 + $0x160] sm:$0xff] }
 0x1ca   : > { %v6124_v30 = vpop.f32.mrf.mxu2 }
 0x1cb   : > { %v6126_v8 = vpop.f32.mrf.mxu0 }
 0x1cc   : > { %892 = vmatmul.f32.gmra.mxu1 %v5916_v47 }
 0x1cd   : > { %4103 = vmatmul.msk.f32.gmra.mxu3 %vm645_vm10, %v5921_v57 }
 0x1ce   : > { %1342 = vmatmul.f32.gmra.mxu0 %v4011_v37 }
 0x1cf   : > { %1458 = vperm.xlu1 %4552, %v194_v50  }
 0x1d0   : > { %v1155_v42 = vpop.permute.xlu1 %1154  ;;  %v1173_v29 = vpop.permute.xlu0 %1172  ;;  %1448 = vperm.xlu2 %4550, %v192_v17  }
 0x1d1   : > { %v1195_v38 = vsel %vm10168_vm15, %v1173_v29, %v1157_v61  ;;  %v1187_v15 = vsel %vm10168_vm15, %v1157_v61, %v1173_v29  ;;  %v1194_v47 = vsel %vm10168_vm15, %v1171_v24, %v1155_v42  ;;  %v1186_v48 = vsel %vm10168_vm15, %v1155_v42, %v1171_v24  ;;  %v4018_v24 = vld [vmem:[%s10060_s1 + $0x148] sm:$0xff] }
 0x1d2   : > { %4174 = vmatpush.msk.msra.mxu2 %vm5904_vm8, %v1195_v38  ;;  %4142 = vmatpush.msk.msra.mxu3 %vm5182_vm3, %v1187_v15  ;;  %v6151_v12 = vpop.f32.mrf.mxu2  ;;  %v4023_v38 = vld [vmem:[%s10060_s1 + $0x170] sm:$0xff] }
 0x1d3   : > { %v6144_v57 = vpop.f32.mrf.mxu0 }
 0x1d4   : > { %895 = vmatmul.f32.gmra.mxu1 %v5983_v43  ;;  %4175 = vmatpush.msk.msra.mxu2 %vm5904_vm8, %v1194_v47  ;;  %v4010_v43 = vld [vmem:[%s10060_s1 + $0x108] sm:$0xff] }
 0x1d5   : > { %4104 = vmatmul.msk.f32.gmra.mxu3 %vm645_vm10, %v5988_v62 }
 0x1d6   : > { %4143 = vmatpush.msk.msra.mxu3 %vm5182_vm3, %v1186_v48  ;;  %1345 = vmatmul.f32.gmra.mxu0 %v4013_v46  ;;  %v4020_v48 = vld [vmem:[%s10060_s1 + $0x158] sm:$0xff] }
 0x1d8   : > { %v1169_v26 = vpop.permute.xlu1 %1168  ;;  %v6166_v53 = vpop.f32.mrf.mxu1 }
 0x1d9   : > { %v1153_v20 = vpop.permute.xlu0 %1152 }
 0x1da   : > { %v1193_v25 = vsel %vm10168_vm15, %v1169_v26, %v1153_v20  ;;  %v1185_v62 = vsel %vm10168_vm15, %v1153_v20, %v1169_v26  ;;  %v6192_v22 = vpop.f32.mrf.mxu2  ;;  %v4022_v26 = vld [vmem:[%s10060_s1 + $0x168] sm:$0xff] }
 0x1db   : > { %4176 = vmatpush.msk.msra.mxu2 %vm5904_vm8, %v1193_v25  ;;  %4144 = vmatpush.msk.msra.mxu3 %vm5182_vm3, %v1185_v62 }
 0x1dc   : > { %4177 = vmatmul.msk.f32.vlgmr.msra.gmra.mxu2 %vm645_vm10, %v4010_v43  ;;  %1257 = vmatmul.f32.vlgmr.msra.gmra.mxu1 %v4009_v21 }
 0x1dd   : > { %4145 = vmatmul.msk.f32.vlgmr.msra.gmra.mxu3 %vm645_vm10, %v4010_v43 }
 0x1de   : > { %v6190_v58 = vpop.f32.mrf.mxu0  ;;  %1348 = vmatmul.f32.gmra.mxu0 %v4015_v23 }
 0x1df   : > { %v6194_v52 = vpop.f32.mrf.mxu3 }
 0x1e1   : > { %v6199_v44 = vpop.f32.mrf.mxu1 }
 0x1e3   : > { %v6216_v36 = vpop.f32.mrf.mxu2 }
 0x1e4   : > { %4178 = vmatmul.msk.f32.gmra.mxu2 %vm645_vm10, %v4012_v3  ;;  %1260 = vmatmul.f32.gmra.mxu1 %v4011_v37 }
 0x1e5   : > { %4146 = vmatmul.msk.f32.gmra.mxu3 %vm645_vm10, %v4012_v3 }
 0x1e6   : > { %v6212_v19 = vpop.f32.mrf.mxu0  ;;  %1351 = vmatmul.f32.gmra.mxu0 %v4017_v56 }
 0x1e8   : > { %v6214_v28 = vpop.f32.mrf.mxu3 }
 0x1e9   : > { %v6221_v16 = vpop.f32.mrf.mxu1 }
 0x1eb   : > { %v6243_v14 = vpop.f32.mrf.mxu2 }
 0x1ec   : > { %4179 = vmatmul.msk.f32.gmra.mxu2 %vm645_vm10, %v4014_v1  ;;  %1263 = vmatmul.f32.gmra.mxu1 %v4013_v46 }
 0x1ed   : > { %4147 = vmatmul.msk.f32.gmra.mxu3 %vm645_vm10, %v4014_v1 }
 0x1ee   : > { %v6234_v61 = vpop.f32.mrf.mxu0  ;;  %1354 = vmatmul.f32.gmra.mxu0 %v4019_v60 }
 0x1ef   : > { %10352 = vst [vmem:[#allocation23_spill] sm:$0xff] %v6234_v61 }
 0x1f0   : > { %v6236_v21 = vpop.f32.mrf.mxu3 }
 0x1f1   : > { %v6241_v10 = vpop.f32.mrf.mxu1 }
 0x1f3   : > { %v6260_v29 = vpop.f32.mrf.mxu2 }
 0x1f4   : > { %4180 = vmatmul.msk.f32.gmra.mxu2 %vm645_vm10, %v4016_v55  ;;  %1266 = vmatmul.f32.gmra.mxu1 %v4015_v23 }
 0x1f5   : > { %4148 = vmatmul.msk.f32.gmra.mxu3 %vm645_vm10, %v4016_v55 }
 0x1f6   : > { %v6250_v18 = vpop.f32.mrf.mxu0  ;;  %1357 = vmatmul.f32.gmra.mxu0 %v4021_v40 }
 0x1f7   : > { %10353 = vst [vmem:[#allocation9_spill] sm:$0xff] %v6250_v18 }
 0x1f8   : > { %v6252_v37 = vpop.f32.mrf.mxu3 }
 0x1f9   : > { %v6257_v42 = vpop.f32.mrf.mxu1 }
 0x1fb   : > { %v6275_v39 = vpop.f32.mrf.mxu2 }
 0x1fc   : > { %4181 = vmatmul.msk.f32.gmra.mxu2 %vm645_vm10, %v4018_v24  ;;  %1269 = vmatmul.f32.gmra.mxu1 %v4017_v56 }
 0x1fd   : > { %4149 = vmatmul.msk.f32.gmra.mxu3 %vm645_vm10, %v4018_v24 }
 0x1fe   : > { %1360 = vmatmul.f32.gmra.mxu0 %v4023_v38  ;;  %v957_v47 = vpop.f32.mrf.mxu0 }
 0x200   : > { %v6266_v15 = vpop.f32.mrf.mxu3 }
 0x201   : > { %v6271_v34 = vpop.f32.mrf.mxu1 }
 0x203   : > { %v998_v62 = vpop.f32.mrf.mxu2 }
 0x204   : > { %4182 = vmatmul.msk.f32.gmra.mxu2 %vm645_vm10, %v4020_v48  ;;  %1272 = vmatmul.f32.gmra.mxu1 %v4019_v60 }
 0x205   : > { %4150 = vmatmul.msk.f32.gmra.mxu3 %vm645_vm10, %v4020_v48 }
 0x206   : > { %v6284_v43 = vpop.f32.mrf.mxu0 }
 0x208   : > { %v6277_v46 = vpop.f32.mrf.mxu3 }
 0x209   : > { %v6282_v20 = vpop.f32.mrf.mxu1 }
 0x20a   : > { %10354 = vst [vmem:[#allocation5_spill] sm:$0xff] %v6282_v20 }
 0x20b   : > { %v6301_v63 = vpop.f32.mrf.mxu2 }
 0x20c   : > { %4183 = vmatmul.msk.f32.gmra.mxu2 %vm645_vm10, %v4022_v26  ;;  %1275 = vmatmul.f32.gmra.mxu1 %v4021_v40 }
 0x20d   : > { %4151 = vmatmul.msk.f32.gmra.mxu3 %vm645_vm10, %v4022_v26 }
 0x20e   : > { %v6296_v33 = vpop.f32.mrf.mxu0 }
 0x210   : > { %v6288_v25 = vpop.f32.mrf.mxu3 }
 0x211   : > { %v6293_v4 = vpop.f32.mrf.mxu1 }
 0x212   : > { %10355 = vst [vmem:[#allocation13_spill] sm:$0xff] %v6293_v4 }
 0x213   : > { %v6305_v17 = vpop.f32.mrf.mxu2 }
 0x214   : > { %4184 = vmatmul.msk.f32.gmra.mxu2 %vm645_vm10, %v4024_v59  ;;  %1278 = vmatmul.f32.gmra.mxu1 %v4023_v38 }
 0x215   : > { %4152 = vmatmul.msk.f32.gmra.mxu3 %vm645_vm10, %v4024_v59 }
 0x216   : > { %v6303_v51 = vpop.f32.mrf.mxu0 }
 0x218   : > { %v6299_v23 = vpop.f32.mrf.mxu3 }
 0x219   : > { %10356 = vst [vmem:[#allocation15_spill] sm:$0xff] %v6299_v23  ;;  %v875_v3 = vpop.f32.mrf.mxu1 }
 0x21a   : > { %v6353_v20 = vpop.permute.xlu2 %1423 }
 0x21b   : > { %v6311_v40 = vpop.f32.mrf.mxu2  ;;  %10371 = vst [vmem:[#allocation47_spill] sm:$0xff] %v6353_v20 }
 0x21e   : > { %v6307_v60 = vpop.f32.mrf.mxu0 }
 0x21f   : > { %10357 = vst [vmem:[#allocation30_spill] sm:$0xff] %v6307_v60 }
 0x220   : > { %v916_v56 = vpop.f32.mrf.mxu3 }
 0x221   : > { %v878_v1 = vpop.f32.mrf.mxu1 }
 0x223   : > { %v6321_v59 = vpop.f32.mrf.mxu2 }
 0x224   : > { %10359 = vst [vmem:[#allocation12_spill] sm:$0xff] %v6321_v59 }
 0x226   : > { %v6317_v48 = vpop.f32.mrf.mxu0 }
 0x227   : > { %10358 = vst [vmem:[#allocation20_spill] sm:$0xff] %v6317_v48 }
 0x228   : > { %v919_v50 = vpop.f32.mrf.mxu3 }
 0x229   : > { %v6309_v55 = vpop.f32.mrf.mxu1 }
 0x22b   : > { %v6331_v41 = vpop.f32.mrf.mxu2 }
 0x22c   : > { %10362 = vst [vmem:[#allocation21_spill] sm:$0xff] %v6331_v41  ;;  %v811_v41 = vadd.f32 %v6194_v52, %v6076_v6 }
 0x22d   : > { %v6371_v6 = vpop.permute.xlu0 %1428 }
 0x22e   : > { %v6325_v7 = vpop.f32.mrf.mxu0  ;;  %10374 = vst [vmem:[#allocation50_spill] sm:$0xff] %v6371_v6 }
 0x22f   : > { %10360 = vst [vmem:[#allocation33_spill] sm:$0xff] %v6325_v7 }
 0x230   : > { %v6313_v24 = vpop.f32.mrf.mxu3 }
 0x231   : > { %v6315_v38 = vpop.f32.mrf.mxu1 }
 0x233   : > { %v6339_v45 = vpop.f32.mrf.mxu2 }
 0x234   : > { %10366 = vst [vmem:[#allocation14_spill] sm:$0xff] %v6339_v45 }
 0x236   : > { %v6333_v32 = vpop.f32.mrf.mxu0 }
 0x237   : > { %10363 = vst [vmem:[#allocation17_spill] sm:$0xff] %v6333_v32 }
 0x238   : > { %v6319_v26 = vpop.f32.mrf.mxu3 }
 0x239   : > { %v6323_v54 = vpop.f32.mrf.mxu1 }
 0x23b   : > { %v6345_v2 = vpop.f32.mrf.mxu2 }
 0x23c   : > { %10369 = vst [vmem:[#allocation4_spill] sm:$0xff] %v6345_v2 }
 0x240   : > { %v6327_v13 = vpop.f32.mrf.mxu3 }
 0x241   : > { %v6329_v9 = vpop.f32.mrf.mxu1 }
 0x242   : > { %10361 = vst [vmem:[#allocation3_spill] sm:$0xff] %v6329_v9 }
 0x243   : > { %v1340_v35 = vpop.f32.mrf.mxu0 }
 0x248   : > { %v6335_v49 = vpop.f32.mrf.mxu3 }
 0x249   : > { %10364 = vst [vmem:[#allocation6_spill] sm:$0xff] %v6335_v49  ;;  %v6337_v0 = vpop.f32.mrf.mxu1  ;;  %v729_v49 = vadd.f32 %v6166_v53, %v6025_v5  ;;  %v732_v5 = vadd.f32 %v6199_v44, %v6088_v27 }
 0x24a   : > { %10365 = vst [vmem:[#allocation11_spill] sm:$0xff] %v6337_v0  ;;  %v958_v0 = vadd.f32 %v957_v47, %v811_v41  ;;  %v817_v47 = vadd.f32 %v6236_v21, %v6151_v12 }
 0x24b   : > { %v1343_v9 = vpop.f32.mrf.mxu0  ;;  %v876_v7 = vadd.f32 %v875_v3, %v729_v49  ;;  %v814_v49 = vadd.f32 %v6214_v28, %v6124_v30  ;;  %v735_v28 = vadd.f32 %v6221_v16, %v6126_v8 }
 0x24c   : > { %v999_v45 = vadd.f32 %v998_v62, %v958_v0 }
 0x24d   : > { %v917_v4 = vadd.f32 %v916_v56, %v876_v7  ;;  %v961_v53 = vadd.f32 %v6284_v43, %v814_v49  ;;  %v882_v43 = vadd.f32 %v6309_v55, %v735_v28  ;;  %v823_v28 = vadd.f32 %v6266_v15, %v6216_v36  ;;  %v10390_v15 = vld [vmem:[#allocation33_spill] sm:$0xff] }
 0x24f   : > { %v923_v3 = vadd.f32 %v6313_v24, %v882_v43 }
 0x250   : > { %v6341_v31 = vpop.f32.mrf.mxu3 }
 0x251   : > { %10367 = vst [vmem:[#allocation8_spill] sm:$0xff] %v6341_v31  ;;  %v6343_v11 = vpop.f32.mrf.mxu1 }
 0x252   : > { %10368 = vst [vmem:[#allocation7_spill] sm:$0xff] %v6343_v11 }
 0x258   : > { %v6347_v48 = vpop.f32.mrf.mxu3 }
 0x259   : > { %10370 = vst [vmem:[#allocation46_spill] sm:$0xff] %v6347_v48  ;;  %v1258_v59 = vpop.f32.mrf.mxu1  ;;  %v1346_v48 = vpop.f32.mrf.mxu0 }
 0x25f   : > { %v1381_v32 = vpop.f32.mrf.mxu2 }
 0x260   : > { %v1382_v60 = vadd.f32 %v1381_v32, %v1340_v35  ;;  %v1299_v31 = vpop.f32.mrf.mxu3 }
 0x261   : > { %v1300_v18 = vadd.f32 %v1299_v31, %v1258_v59  ;;  %v1261_v2 = vpop.f32.mrf.mxu1  ;;  %v1349_v27 = vpop.f32.mrf.mxu0 }
 0x262   : > { %v1406_v11 = vadd.f32 %v1382_v60, %v999_v45  ;;  %v879_v45 = vadd.f32 %v878_v1, %v732_v5  ;;  %v6401_v60 = vpop.permute.xlu1 %1433  ;;  %v820_v5 = vadd.f32 %v6252_v37, %v6192_v22  ;;  %v6431_v37 = vpop.permute.xlu2 %1438 }
 0x263   : > { %v1405_v61 = vadd.f32 %v1300_v18, %v917_v4  ;;  %v964_v4 = vadd.f32 %v6296_v33, %v817_v47  ;;  %10377 = vst [vmem:[#allocation53_spill] sm:$0xff] %v6401_v60  ;;  %v10384_v47 = vld [vmem:[#allocation15_spill] sm:$0xff] }
 0x264   : > { %v6356_v23 = vadd.f32 %v6353_v20, %v1406_v11  ;;  %v920_v11 = vadd.f32 %v919_v50, %v879_v45  ;;  %v738_v45 = vadd.f32 %v6241_v10, %v6144_v57  ;;  %10380 = vst [vmem:[#allocation56_spill] sm:$0xff] %v6431_v37  ;;  %v832_v43 = vadd.f32 %v10384_v47, %v6275_v39  ;;  %v10393_v39 = vld [vmem:[#allocation12_spill] sm:$0xff] }
 0x265   : > { %v6361_v41 = vadd.f32 %v6353_v20, %v1405_v61  ;;  %v1005_v1 = vadd.f32 %v6305_v17, %v964_v4  ;;  %v10386_v4 = vld [vmem:[#allocation5_spill] sm:$0xff]  ;;  %v10402_v47 = vld [vmem:[#allocation8_spill] sm:$0xff] }
 0x266   : > { %10372 = vst [vmem:[#allocation48_spill] sm:$0xff] %v6356_v23  ;;  %1493 = vrot.lane.b32.xlu1 %v6356_v23, %s4689_s18 }
 0x267   : > { %10373 = vst [vmem:[#allocation49_spill] sm:$0xff] %v6361_v41  ;;  %v1384_v35 = vpop.f32.mrf.mxu2  ;;  %1541 = vrot.lane.b32.xlu0 %v6361_v41, %s4690_s19  ;;  %1477 = vrot.lane.b32.xlu2 %v6361_v41, %s4689_s18 }
 0x268   : > { %v1302_v31 = vpop.f32.mrf.mxu3  ;;  %v1385_v52 = vadd.f32 %v1384_v35, %v1343_v9 }
 0x269   : > { %v1303_v0 = vadd.f32 %v1302_v31, %v1261_v2  ;;  %v1264_v7 = vpop.f32.mrf.mxu1  ;;  %v1002_v2 = vadd.f32 %v6301_v63, %v961_v53  ;;  %v1352_v16 = vpop.f32.mrf.mxu0  ;;  %v967_v31 = vadd.f32 %v6303_v51, %v820_v5  ;;  %v10395_v5 = vld [vmem:[#allocation14_spill] sm:$0xff] }
 0x26b   : > { %v1407_v32 = vadd.f32 %v1303_v0, %v920_v11  ;;  %v1408_v9 = vadd.f32 %v1385_v52, %v1002_v2  ;;  %v1008_v0 = vadd.f32 %v6311_v40, %v967_v31  ;;  %v741_v40 = vadd.f32 %v6257_v42, %v6190_v58  ;;  %v6449_v58 = vpop.permute.xlu1 %1443  ;;  %v10396_v31 = vld [vmem:[#allocation7_spill] sm:$0xff] }
 0x26c   : > { %10383 = vst [vmem:[#allocation59_spill] sm:$0xff] %v6449_v58 }
 0x26d   : > { %v6375_v44 = vadd.f32 %v6371_v6, %v1407_v32  ;;  %v6392_v63 = vadd.f32 %v6371_v6, %v1408_v9  ;;  %v829_v9 = vadd.f32 %v6288_v25, %v6260_v29  ;;  %v10391_v25 = vld [vmem:[#allocation17_spill] sm:$0xff] }
 0x26e   : > { %1605 = vrot.lane.b32.xlu1 %v6361_v41, %s4691_s20 }
 0x26f   : > { %10375 = vst [vmem:[#allocation51_spill] sm:$0xff] %v6375_v44  ;;  %v1387_v61 = vpop.f32.mrf.mxu2  ;;  %1479 = vrot.lane.b32.xlu0 %v6375_v44, %s4689_s18  ;;  %1557 = vrot.lane.b32.xlu2 %v6356_v23, %s4690_s19 }
 0x270   : > { %v1305_v30 = vpop.f32.mrf.mxu3  ;;  %10376 = vst [vmem:[#allocation52_spill] sm:$0xff] %v6392_v63  ;;  %v1388_v56 = vadd.f32 %v1387_v61, %v1346_v48 }
 0x271   : > { %v1267_v18 = vpop.f32.mrf.mxu1  ;;  %v1306_v62 = vadd.f32 %v1305_v30, %v1264_v7  ;;  %v1355_v59 = vpop.f32.mrf.mxu0  ;;  %v885_v7 = vadd.f32 %v6315_v38, %v738_v45 }
 0x272   : > { %v1410_v21 = vadd.f32 %v1388_v56, %v1005_v1  ;;  %v10387_v56 = vld [vmem:[#allocation9_spill] sm:$0xff] }
 0x273   : > { %v1409_v50 = vadd.f32 %v1306_v62, %v923_v3  ;;  %v926_v53 = vadd.f32 %v6319_v26, %v885_v7  ;;  %v888_v26 = vadd.f32 %v6323_v54, %v741_v40  ;;  %v10385_v62 = vld [vmem:[#allocation23_spill] sm:$0xff] }
 0x274   : > { %v6407_v24 = vadd.f32 %v6401_v60, %v1410_v21  ;;  %v747_v3 = vadd.f32 %v10386_v4, %v10385_v62  ;;  %v979_v21 = vadd.f32 %v10391_v25, %v832_v43  ;;  %v6488_v4 = vpop.permute.xlu1 %1458 }
 0x275   : > { %v6404_v55 = vadd.f32 %v6401_v60, %v1409_v50  ;;  %v929_v30 = vadd.f32 %v6327_v13, %v888_v26  ;;  %v826_v13 = vadd.f32 %v6277_v46, %v6243_v14  ;;  %v10389_v50 = vld [vmem:[#allocation30_spill] sm:$0xff]  ;;  %10403 = vst [vmem:[#allocation23_spill] sm:$0xff] %v6488_v4 }
 0x276   : > { %1543 = vrot.lane.b32.xlu1 %v6375_v44, %s4690_s19  ;;  %10379 = vst [vmem:[#allocation55_spill] sm:$0xff] %v6407_v24  ;;  %v970_v36 = vadd.f32 %v10389_v50, %v823_v28  ;;  %v10400_v26 = vld [vmem:[#allocation46_spill] sm:$0xff] }
 0x277   : > { %v1390_v8 = vpop.f32.mrf.mxu2  ;;  %1559 = vrot.lane.b32.xlu0 %v6392_v63, %s4690_s19  ;;  %1495 = vrot.lane.b32.xlu2 %v6392_v63, %s4689_s18  ;;  %10378 = vst [vmem:[#allocation54_spill] sm:$0xff] %v6404_v55 }
 0x278   : > { %v1308_v12 = vpop.f32.mrf.mxu3  ;;  %v1391_v11 = vadd.f32 %v1390_v8, %v1349_v27  ;;  %v10388_v8 = vld [vmem:[#allocation13_spill] sm:$0xff]  ;;  %v1011_v46 = vadd.f32 %v10393_v39, %v970_v36 }
 0x279   : > { %v1270_v33 = vpop.f32.mrf.mxu1  ;;  %v1309_v49 = vadd.f32 %v1308_v12, %v1267_v18  ;;  %v1358_v51 = vpop.f32.mrf.mxu0  ;;  %v744_v18 = vadd.f32 %v6271_v34, %v6212_v19  ;;  %v750_v1 = vadd.f32 %v10388_v8, %v10387_v56  ;;  %v976_v12 = vadd.f32 %v10390_v15, %v829_v9 }
 0x27a   : > { %v1412_v22 = vadd.f32 %v1391_v11, %v1008_v0 }
 0x27b   : > { %v1411_v10 = vadd.f32 %v1309_v49, %v926_v53  ;;  %v1017_v45 = vadd.f32 %v10395_v5, %v976_v12  ;;  %v897_v11 = vadd.f32 %v10396_v31, %v750_v1  ;;  %v10397_v49 = vld [vmem:[#allocation4_spill] sm:$0xff]  ;;  %v10405_v1 = vld [vmem:[#allocation6_spill] sm:$0xff] }
 0x27c   : > { %v6436_v38 = vadd.f32 %v6431_v37, %v1412_v22  ;;  %v1020_v53 = vadd.f32 %v10397_v49, %v979_v21  ;;  %v10398_v22 = vld [vmem:[#allocation21_spill] sm:$0xff] }
 0x27d   : > { %v6440_v52 = vadd.f32 %v6431_v37, %v1411_v10 }
 0x27e   : > { %1481 = vrot.lane.b32.xlu1 %v6404_v55, %s4689_s18  ;;  %10381 = vst [vmem:[#allocation57_spill] sm:$0xff] %v6436_v38 }
 0x27f   : > { %v1393_v17 = vpop.f32.mrf.mxu2  ;;  %1497 = vrot.lane.b32.xlu0 %v6407_v24, %s4689_s18  ;;  %1607 = vrot.lane.b32.xlu2 %v6375_v44, %s4691_s20  ;;  %10382 = vst [vmem:[#allocation58_spill] sm:$0xff] %v6440_v52 }
 0x280   : > { %v1311_v48 = vpop.f32.mrf.mxu3  ;;  %v1394_v19 = vadd.f32 %v1393_v17, %v1352_v16 }
 0x281   : > { %v6417_v35 = vpop.f32.mrf.mxu1  ;;  %v1312_v61 = vadd.f32 %v1311_v48, %v1270_v33  ;;  %v1361_v29 = vpop.f32.mrf.mxu0  ;;  %v10394_v33 = vld [vmem:[#allocation20_spill] sm:$0xff] }
 0x282   : > { %v973_v48 = vadd.f32 %v10394_v33, %v826_v13 }
 0x283   : > { %v1413_v54 = vadd.f32 %v1312_v61, %v929_v30  ;;  %v938_v61 = vadd.f32 %v10400_v26, %v897_v11 }
 0x284   : > { %v1014_v10 = vadd.f32 %v10398_v22, %v973_v48 }
 0x285   : > { %v6469_v34 = vadd.f32 %v6449_v58, %v1413_v54  ;;  %v1414_v54 = vadd.f32 %v1394_v19, %v1011_v46 }
 0x286   : > { %1561 = vrot.lane.b32.xlu1 %v6407_v24, %s4690_s19 }
 0x287   : > { %v1396_v32 = vpop.f32.mrf.mxu2  ;;  %1609 = vrot.lane.b32.xlu0 %v6404_v55, %s4691_s20  ;;  %1545 = vrot.lane.b32.xlu2 %v6404_v55, %s4690_s19  ;;  %10392 = vst [vmem:[#allocation15_spill] sm:$0xff] %v6469_v34  ;;  %v6497_v36 = vadd.f32 %v6449_v58, %v1414_v54 }
 0x288   : > { %v1314_v57 = vpop.f32.mrf.mxu3  ;;  %v1397_v16 = vadd.f32 %v1396_v32, %v1355_v59  ;;  %v10401_v59 = vld [vmem:[#allocation3_spill] sm:$0xff] }
 0x289   : > { %v1276_v27 = vpop.f32.mrf.mxu1  ;;  %v891_v32 = vadd.f32 %v10401_v59, %v744_v18  ;;  %v1315_v62 = vadd.f32 %v1314_v57, %v6417_v35  ;;  %10407 = vst [vmem:[#allocation13_spill] sm:$0xff] %v6497_v36  ;;  %v6508_v57 = vpop.permute.xlu2 %1448 }
 0x28a   : > { %v1416_v56 = vadd.f32 %v1397_v16, %v1014_v10  ;;  %10410 = vst [vmem:[#allocation17_spill] sm:$0xff] %v6508_v57 }
 0x28c   : > { %v6511_v12 = vadd.f32 %v6508_v57, %v1416_v56 }
 0x28e   : > { %1499 = vrot.lane.b32.xlu1 %v6436_v38, %s4689_s18  ;;  %10411 = vst [vmem:[#allocation12_spill] sm:$0xff] %v6511_v12 }
 0x28f   : > { %v1399_v2 = vpop.f32.mrf.mxu2  ;;  %1547 = vrot.lane.b32.xlu0 %v6440_v52, %s4690_s19  ;;  %1483 = vrot.lane.b32.xlu2 %v6440_v52, %s4689_s18 }
 0x290   : > { %v1317_v42 = vpop.f32.mrf.mxu3  ;;  %v1400_v14 = vadd.f32 %v1399_v2, %v1358_v51  ;;  %v10399_v51 = vld [vmem:[#allocation11_spill] sm:$0xff] }
 0x291   : > { %v1279_v7 = vpop.f32.mrf.mxu1  ;;  %v894_v40 = vadd.f32 %v10399_v51, %v747_v3  ;;  %v1318_v2 = vadd.f32 %v1317_v42, %v1276_v27  ;;  %v932_v27 = vadd.f32 %v10405_v1, %v891_v32  ;;  %v6494_v42 = vpop.permute.xlu0 %1453 }
 0x292   : > { %v1418_v28 = vadd.f32 %v1400_v14, %v1017_v45  ;;  %10406 = vst [vmem:[#allocation9_spill] sm:$0xff] %v6494_v42 }
 0x293   : > { %v935_v43 = vadd.f32 %v10402_v47, %v894_v40  ;;  %v1415_v15 = vadd.f32 %v1315_v62, %v932_v27 }
 0x294   : > { %v6500_v18 = vadd.f32 %v6494_v42, %v1418_v28 }
 0x295   : > { %v1417_v50 = vadd.f32 %v1318_v2, %v935_v43  ;;  %v6524_v25 = vadd.f32 %v6508_v57, %v1415_v15 }
 0x296   : > { %1611 = vrot.lane.b32.xlu1 %v6440_v52, %s4691_s20  ;;  %10408 = vst [vmem:[#allocation30_spill] sm:$0xff] %v6500_v18 }
 0x297   : > { %v1402_v0 = vpop.f32.mrf.mxu2  ;;  %1485 = vrot.lane.b32.xlu0 %v6469_v34, %s4689_s18  ;;  %1563 = vrot.lane.b32.xlu2 %v6436_v38, %s4690_s19  ;;  %10413 = vst [vmem:[#allocation14_spill] sm:$0xff] %v6524_v25 }
 0x298   : > { %v1403_v17 = vadd.f32 %v1402_v0, %v1361_v29  ;;  %v1320_v30 = vpop.f32.mrf.mxu3  ;;  %v6517_v29 = vadd.f32 %v6494_v42, %v1417_v50 }
 0x299   : > { %v1321_v13 = vadd.f32 %v1320_v30, %v1279_v7 }
 0x29a   : > { %v1420_v9 = vadd.f32 %v1403_v17, %v1020_v53  ;;  %10412 = vst [vmem:[#allocation20_spill] sm:$0xff] %v6517_v29 }
 0x29b   : > { %v1419_v3 = vadd.f32 %v1321_v13, %v938_v61 }
 0x29c   : > { %v6491_v8 = vadd.f32 %v6488_v4, %v1420_v9 }
 0x29d   : > { %v6503_v35 = vadd.f32 %v6488_v4, %v1419_v3 }
 0x29e   : > { %10404 = vst [vmem:[#allocation5_spill] sm:$0xff] %v6491_v8  ;;  %1879 = vmatpush.msrb.mxu0 %v6491_v8  ;;  %1549 = vrot.lane.b32.xlu1 %v6469_v34, %s4690_s19 }
 0x29f   : > { %10409 = vst [vmem:[#allocation33_spill] sm:$0xff] %v6503_v35  ;;  %1565 = vrot.lane.b32.xlu0 %v6497_v36, %s4690_s19  ;;  %1501 = vrot.lane.b32.xlu2 %v6497_v36, %s4689_s18 }
 0x2a0   : > { %1880 = vmatpush.msrb.mxu0 %v6500_v18  ;;  %1797 = vmatpush.msrb.mxu1 %v6503_v35 }
 0x2a2   : > { %1881 = vmatpush.msrb.mxu0 %v6511_v12  ;;  %1798 = vmatpush.msrb.mxu1 %v6517_v29 }
 0x2a4   : > { %1882 = vmatpush.msrb.mxu0 %v6497_v36  ;;  %1799 = vmatpush.msrb.mxu1 %v6524_v25 }
 0x2a6   : > { %1883 = vmatpush.msrb.mxu0 %v6436_v38  ;;  %1487 = vrot.lane.b32.xlu1 %v6524_v25, %s4689_s18 }
 0x2a7   : > { %1800 = vmatpush.msrb.mxu1 %v6469_v34  ;;  %1503 = vrot.lane.b32.xlu0 %v6511_v12, %s4689_s18 }
 0x2a8   : > { %1884 = vmatpush.msrb.mxu0 %v6407_v24  ;;  %1613 = vrot.lane.b32.xlu2 %v6469_v34, %s4691_s20 }
 0x2a9   : > { %1801 = vmatpush.msrb.mxu1 %v6440_v52 }
 0x2aa   : > { %1885 = vmatpush.msrb.mxu0 %v6392_v63 }
 0x2ab   : > { %1802 = vmatpush.msrb.mxu1 %v6404_v55 }
 0x2ac   : > { %1886 = vmatpush.msrb.mxu0 %v6356_v23 }
 0x2ad   : > { %1803 = vmatpush.msrb.mxu1 %v6375_v44 }
 0x2ae   : > { %1567 = vrot.lane.b32.xlu1 %v6511_v12, %s4690_s19 }
 0x2af   : > { %1804 = vmatpush.msrb.mxu1 %v6361_v41  ;;  %1553 = vrot.lane.b32.xlu0 %v6517_v29, %s4690_s19 }
 0x2b0   : > { %1551 = vrot.lane.b32.xlu2 %v6524_v25, %s4690_s19 }
 0x2b6   : > { %1505 = vrot.lane.b32.xlu1 %v6500_v18, %s4689_s18 }
 0x2b7   : > { %1491 = vrot.lane.b32.xlu0 %v6503_v35, %s4689_s18 }
 0x2b8   : > { %1489 = vrot.lane.b32.xlu2 %v6517_v29, %s4689_s18 }
 0x2be   : > { %1555 = vrot.lane.b32.xlu1 %v6503_v35, %s4690_s19 }
 0x2bf   : > { %1571 = vrot.lane.b32.xlu0 %v6491_v8, %s4690_s19 }
 0x2c0   : > { %1569 = vrot.lane.b32.xlu2 %v6500_v18, %s4690_s19 }
 0x2c1   : > { %v6562_v21 = vpop.permute.xlu2 %1477 }
 0x2c2   : > { %10414 = vst [vmem:[#allocation7_spill] sm:$0xff] %v6562_v21 }
 0x2c6   : > { %1617 = vrot.lane.b32.xlu1 %v6517_v29, %s4691_s20 }
 0x2c7   : > { %1615 = vrot.lane.b32.xlu0 %v6524_v25, %s4691_s20 }
 0x2c8   : > { %1507 = vrot.lane.b32.xlu2 %v6491_v8, %s4689_s18 }
 0x2c9   : > { %v6570_v19 = vpop.permute.xlu2 %1557 }
 0x2ce   : > { %1623 = vrot.lane.b32.xlu1 %v6392_v63, %s4691_s20 }
 0x2cf   : > { %1621 = vrot.lane.b32.xlu0 %v6356_v23, %s4691_s20 }
 0x2d0   : > { %1619 = vrot.lane.b32.xlu2 %v6503_v35, %s4691_s20 }
 0x2d1   : > { %v6578_v14 = vpop.permute.xlu2 %1495 }
 0x2d2   : > { %10415 = vst [vmem:[#allocation4_spill] sm:$0xff] %v6578_v14 }
 0x2d6   : > { %1629 = vrot.lane.b32.xlu1 %v6497_v36, %s4691_s20 }
 0x2d7   : > { %1627 = vrot.lane.b32.xlu0 %v6436_v38, %s4691_s20 }
 0x2d8   : > { %v6582_v39 = vpop.permute.xlu1 %1493  ;;  %1625 = vrot.lane.b32.xlu2 %v6407_v24, %s4691_s20 }
 0x2d9   : > { %10416 = vst [vmem:[#allocation21_spill] sm:$0xff] %v6582_v39  ;;  %v6588_v46 = vpop.permute.xlu0 %1541  ;;  %v6590_v33 = vpop.permute.xlu2 %1607 }
 0x2de   : > { %1635 = vrot.lane.b32.xlu1 %v6491_v8, %s4691_s20 }
 0x2df   : > { %1633 = vrot.lane.b32.xlu0 %v6500_v18, %s4691_s20 }
 0x2e0   : > { %v6594_v48 = vpop.permute.xlu1 %1605  ;;  %1631 = vrot.lane.b32.xlu2 %v6511_v12, %s4691_s20 }
 0x2e1   : > { %v6600_v5 = vpop.permute.xlu0 %1479  ;;  %v6602_v45 = vpop.permute.xlu2 %1545 }
 0x2e2   : > { %10417 = vst [vmem:[#allocation11_spill] sm:$0xff] %v6600_v5 }
 0x2e6   : > { %1745 = vrot.lane.b32.xlu1 %v6517_v29, %s4693_s22 }
 0x2e7   : > { %1763 = vrot.lane.b32.xlu0 %v6491_v8, %s4693_s22 }
 0x2e8   : > { %v6606_v31 = vpop.permute.xlu1 %1543  ;;  %1747 = vrot.lane.b32.xlu2 %v6503_v35, %s4693_s22 }
 0x2e9   : > { %v6612_v11 = vpop.permute.xlu0 %1559  ;;  %v6614_v0 = vpop.permute.xlu2 %1483 }
 0x2ea   : > { %10418 = vst [vmem:[#allocation46_spill] sm:$0xff] %v6614_v0 }
 0x2ee   : > { %1759 = vrot.lane.b32.xlu1 %v6511_v12, %s4693_s22 }
 0x2ef   : > { %1743 = vrot.lane.b32.xlu0 %v6524_v25, %s4693_s22 }
 0x2f0   : > { %v6618_v7 = vpop.permute.xlu1 %1481  ;;  %1761 = vrot.lane.b32.xlu2 %v6500_v18, %s4693_s22 }
 0x2f1   : > { %10419 = vst [vmem:[#allocation3_spill] sm:$0xff] %v6618_v7  ;;  %v6624_v49 = vpop.permute.xlu0 %1497  ;;  %v6626_v53 = vpop.permute.xlu2 %1563 }
 0x2f2   : > { %10420 = vst [vmem:[#allocation8_spill] sm:$0xff] %v6624_v49 }
 0x2f6   : > { %1741 = vrot.lane.b32.xlu1 %v6469_v34, %s4693_s22 }
 0x2f7   : > { %1699 = vrot.lane.b32.xlu0 %v6491_v8, %s4692_s21 }
 0x2f8   : > { %v6630_v16 = vpop.permute.xlu1 %1561  ;;  %1683 = vrot.lane.b32.xlu2 %v6503_v35, %s4692_s21 }
 0x2f9   : > { %v6636_v17 = vpop.permute.xlu0 %1609  ;;  %v6638_v22 = vpop.permute.xlu2 %1501 }
 0x2fa   : > { %10421 = vst [vmem:[#allocation6_spill] sm:$0xff] %v6638_v22 }
 0x2fe   : > { %1697 = vrot.lane.b32.xlu1 %v6500_v18, %s4692_s21 }
 0x2ff   : > { %1681 = vrot.lane.b32.xlu0 %v6517_v29, %s4692_s21 }
 0x300   : > { %v6642_v10 = vpop.permute.xlu1 %1499  ;;  %1757 = vrot.lane.b32.xlu2 %v6497_v36, %s4693_s22 }
 0x301   : > { %10422 = vst [vmem:[#allocation60_spill] sm:$0xff] %v6642_v10  ;;  %v6648_v51 = vpop.permute.xlu0 %1547  ;;  %v10429_v10 = vld [vmem:[#allocation31_spill] sm:$0xff] }
 0x302   : > { %v6650_v40 = vpop.permute.xlu2 %1613 }
 0x306   : > { %1679 = vrot.lane.b32.xlu1 %v6524_v25, %s4692_s21 }
 0x307   : > { %1755 = vrot.lane.b32.xlu0 %v6436_v38, %s4693_s22 }
 0x308   : > { %v6654_v26 = vpop.permute.xlu1 %1611  ;;  %1739 = vrot.lane.b32.xlu2 %v6440_v52, %s4693_s22 }
 0x309   : > { %v6660_v61 = vpop.permute.xlu0 %1485 }
 0x30a   : > { %10423 = vst [vmem:[#allocation61_spill] sm:$0xff] %v6660_v61  ;;  %v6662_v2 = vpop.permute.xlu2 %1551 }
 0x30e   : > { %1753 = vrot.lane.b32.xlu1 %v6407_v24, %s4693_s22 }
 0x30f   : > { %1737 = vrot.lane.b32.xlu0 %v6404_v55, %s4693_s22 }
 0x310   : > { %v6666_v30 = vpop.permute.xlu1 %1549  ;;  %1695 = vrot.lane.b32.xlu2 %v6511_v12, %s4692_s21 }
 0x311   : > { %v6672_v54 = vpop.permute.xlu0 %1565 }
 0x312   : > { %v6674_v28 = vpop.permute.xlu2 %1489 }
 0x313   : > { %10424 = vst [vmem:[#allocation62_spill] sm:$0xff] %v6674_v28 }
 0x316   : > { %1735 = vrot.lane.b32.xlu1 %v6375_v44, %s4693_s22 }
 0x317   : > { %1693 = vrot.lane.b32.xlu0 %v6497_v36, %s4692_s21 }
 0x318   : > { %v6678_v9 = vpop.permute.xlu1 %1487  ;;  %1677 = vrot.lane.b32.xlu2 %v6469_v34, %s4692_s21 }
 0x319   : > { %10425 = vst [vmem:[#allocation63_spill] sm:$0xff] %v6678_v9  ;;  %v6684_v13 = vpop.permute.xlu0 %1503 }
 0x31a   : > { %10426 = vst [vmem:[#allocation64_spill] sm:$0xff] %v6684_v13  ;;  %v6686_v59 = vpop.permute.xlu2 %1569 }
 0x31e   : > { %1691 = vrot.lane.b32.xlu1 %v6436_v38, %s4692_s21 }
 0x31f   : > { %1675 = vrot.lane.b32.xlu0 %v6440_v52, %s4692_s21 }
 0x320   : > { %v6690_v32 = vpop.permute.xlu1 %1567  ;;  %1751 = vrot.lane.b32.xlu2 %v6392_v63, %s4693_s22 }
 0x321   : > { %v6696_v47 = vpop.permute.xlu0 %1553 }
 0x322   : > { %v6698_v43 = vpop.permute.xlu2 %1507 }
 0x323   : > { %10427 = vst [vmem:[#allocation65_spill] sm:$0xff] %v6698_v43 }
 0x326   : > { %1673 = vrot.lane.b32.xlu1 %v6404_v55, %s4692_s21 }
 0x327   : > { %1749 = vrot.lane.b32.xlu0 %v6356_v23, %s4693_s22 }
 0x328   : > { %v6702_v62 = vpop.permute.xlu1 %1505  ;;  %1733 = vrot.lane.b32.xlu2 %v6361_v41, %s4693_s22 }
 0x329   : > { %10428 = vst [vmem:[#allocation66_spill] sm:$0xff] %v6702_v62  ;;  %v6708_v56 = vpop.permute.xlu0 %1491 }
 0x32a   : > { %v6710_v3 = vpop.permute.xlu2 %1619 }
 0x32e   : > { %1687 = vrot.lane.b32.xlu1 %v6392_v63, %s4692_s21 }
 0x32f   : > { %1671 = vrot.lane.b32.xlu0 %v6375_v44, %s4692_s21 }
 0x330   : > { %v6714_v1 = vpop.permute.xlu1 %1555  ;;  %1689 = vrot.lane.b32.xlu2 %v6407_v24, %s4692_s21 }
 0x331   : > { %v6720_v27 = vpop.permute.xlu0 %1571 }
 0x332   : > { %v6722_v50 = vpop.permute.xlu2 %1625 }
 0x336   : > { %2125 = vrot.lane.b32.xlu1 %v6361_v41, %s4694_s23 }
 0x337   : > { %1685 = vrot.lane.b32.xlu0 %v6356_v23, %s4692_s21 }
 0x338   : > { %v6726_v15 = vpop.permute.xlu1 %1617  ;;  %1669 = vrot.lane.b32.xlu2 %v6361_v41, %s4692_s21 }
 0x339   : > { %v6732_v37 = vpop.permute.xlu0 %1615 }
 0x33a   : > { %v6734_v58 = vpop.permute.xlu2 %1631 }
 0x33e   : > { %2131 = vrot.lane.b32.xlu1 %v6440_v52, %s4694_s23 }
 0x33f   : > { %2129 = vrot.lane.b32.xlu0 %v6404_v55, %s4694_s23 }
 0x340   : > { %v6738_v57 = vpop.permute.xlu1 %1623  ;;  %2127 = vrot.lane.b32.xlu2 %v6375_v44, %s4694_s23 }
 0x341   : > { %v6744_v42 = vpop.permute.xlu0 %1621 }
 0x342   : > { %v1748_v4 = vpop.permute.xlu2 %1747 }
 0x346   : > { %2137 = vrot.lane.b32.xlu1 %v6517_v29, %s4694_s23 }
 0x347   : > { %2135 = vrot.lane.b32.xlu0 %v6524_v25, %s4694_s23 }
 0x348   : > { %v6748_v60 = vpop.permute.xlu1 %1629  ;;  %2133 = vrot.lane.b32.xlu2 %v6469_v34, %s4694_s23 }
 0x349   : > { %v6754_v6 = vpop.permute.xlu0 %1627 }
 0x34a   : > { %v1762_v20 = vpop.permute.xlu2 %1761 }
 0x34e   : > { %2219 = vrot.lane.b32.xlu1 %v6491_v8, %s4695_s24 }
 0x34f   : > { %2203 = vrot.lane.b32.xlu0 %v6503_v35, %s4695_s24 }
 0x350   : > { %v6758_v39 = vpop.permute.xlu1 %1635  ;;  %2139 = vrot.lane.b32.xlu2 %v6503_v35, %s4694_s23 }
 0x351   : > { %v6764_v21 = vpop.permute.xlu0 %1633 }
 0x352   : > { %v1684_v14 = vpop.permute.xlu2 %1683 }
 0x356   : > { %2199 = vrot.lane.b32.xlu1 %v6524_v25, %s4695_s24 }
 0x357   : > { %2217 = vrot.lane.b32.xlu0 %v6500_v18, %s4695_s24 }
 0x358   : > { %v1746_v5 = vpop.permute.xlu1 %1745  ;;  %2201 = vrot.lane.b32.xlu2 %v6517_v29, %s4695_s24 }
 0x359   : > { %v1764_v49 = vpop.permute.xlu0 %1763  ;;  %v1771_v9 = vsel %vm10164_vm4, %v1746_v5, %v1762_v20  ;;  %v1779_v62 = vsel %vm10164_vm4, %v1762_v20, %v1746_v5 }
 0x35a   : > { %v1758_v7 = vpop.permute.xlu2 %1757  ;;  %v1772_v0 = vsel %vm10164_vm4, %v1748_v4, %v1764_v49  ;;  %v1780_v22 = vsel %vm10164_vm4, %v1764_v49, %v1748_v4 }
 0x35b   : > { %4193 = vmatpush.msk.msrb.mxu3 %vm5182_vm3, %v1772_v0  ;;  %4217 = vmatpush.msk.msrb.mxu2 %vm5193_vm5, %v1780_v22 }
 0x35d   : > { %4194 = vmatpush.msk.msrb.mxu3 %vm5182_vm3, %v1771_v9  ;;  %4218 = vmatpush.msk.msrb.mxu2 %vm5193_vm5, %v1779_v62 }
 0x35e   : > { %2213 = vrot.lane.b32.xlu1 %v6497_v36, %s4695_s24 }
 0x35f   : > { %2197 = vrot.lane.b32.xlu0 %v6469_v34, %s4695_s24 }
 0x360   : > { %v1760_v4 = vpop.permute.xlu1 %1759  ;;  %2215 = vrot.lane.b32.xlu2 %v6511_v12, %s4695_s24 }
 0x361   : > { %v1744_v0 = vpop.permute.xlu0 %1743 }
 0x362   : > { %v1740_v49 = vpop.permute.xlu2 %1739  ;;  %v1770_v22 = vsel %vm10164_vm4, %v1744_v0, %v1760_v4  ;;  %v1778_v9 = vsel %vm10164_vm4, %v1760_v4, %v1744_v0 }
 0x363   : > { %4195 = vmatpush.msk.msrb.mxu3 %vm5182_vm3, %v1770_v22  ;;  %4219 = vmatpush.msk.msrb.mxu2 %vm5193_vm5, %v1778_v9 }
 0x366   : > { %2193 = vrot.lane.b32.xlu1 %v6404_v55, %s4695_s24 }
 0x367   : > { %2211 = vrot.lane.b32.xlu0 %v6436_v38, %s4695_s24 }
 0x368   : > { %v1742_v20 = vpop.permute.xlu1 %1741  ;;  %2195 = vrot.lane.b32.xlu2 %v6440_v52, %s4695_s24 }
 0x369   : > { %v1769_v5 = vsel %vm10164_vm4, %v1742_v20, %v1758_v7  ;;  %v1777_v62 = vsel %vm10164_vm4, %v1758_v7, %v1742_v20  ;;  %v1700_v4 = vpop.permute.xlu0 %1699 }
 0x36a   : > { %4196 = vmatpush.msk.msrb.mxu3 %vm5182_vm3, %v1769_v5  ;;  %4220 = vmatpush.msk.msrb.mxu2 %vm5193_vm5, %v1777_v62  ;;  %v1696_v0 = vpop.permute.xlu2 %1695  ;;  %v1716_v22 = vsel %vm10165_vm2, %v1700_v4, %v1684_v14  ;;  %v1708_v9 = vsel %vm10165_vm2, %v1684_v14, %v1700_v4 }
 0x36b   : > { %4185 = vmatpush.msk.msrb.mxu1 %vm5143_vm0, %v1716_v22  ;;  %4209 = vmatpush.msk.msrb.mxu0 %vm5147_vm1, %v1708_v9 }
 0x36e   : > { %2283 = vrot.lane.b32.xlu1 %v6491_v8, %s4696_s25 }
 0x36f   : > { %2267 = vrot.lane.b32.xlu0 %v6503_v35, %s4696_s25 }
 0x370   : > { %v1698_v7 = vpop.permute.xlu1 %1697  ;;  %2209 = vrot.lane.b32.xlu2 %v6407_v24, %s4695_s24 }
 0x371   : > { %v1682_v20 = vpop.permute.xlu0 %1681 }
 0x372   : > { %v1678_v5 = vpop.permute.xlu2 %1677  ;;  %v1715_v14 = vsel %vm10165_vm2, %v1698_v7, %v1682_v20  ;;  %v1707_v62 = vsel %vm10165_vm2, %v1682_v20, %v1698_v7 }
 0x373   : > { %4186 = vmatpush.msk.msrb.mxu1 %vm5143_vm0, %v1715_v14  ;;  %4210 = vmatpush.msk.msrb.mxu0 %vm5147_vm1, %v1707_v62 }
 0x376   : > { %2265 = vrot.lane.b32.xlu1 %v6517_v29, %s4696_s25 }
 0x377   : > { %2207 = vrot.lane.b32.xlu0 %v6392_v63, %s4695_s24 }
 0x378   : > { %v1680_v4 = vpop.permute.xlu1 %1679  ;;  %2191 = vrot.lane.b32.xlu2 %v6375_v44, %s4695_s24 }
 0x379   : > { %v1706_v22 = vsel %vm10165_vm2, %v1680_v4, %v1696_v0  ;;  %v1714_v9 = vsel %vm10165_vm2, %v1696_v0, %v1680_v4  ;;  %v1756_v7 = vpop.permute.xlu0 %1755 }
 0x37a   : > { %4211 = vmatpush.msk.msrb.mxu0 %vm5147_vm1, %v1706_v22  ;;  %4187 = vmatpush.msk.msrb.mxu1 %vm5143_vm0, %v1714_v9  ;;  %v1752_v20 = vpop.permute.xlu2 %1751  ;;  %v1768_v14 = vsel %vm10164_vm4, %v1740_v49, %v1756_v7  ;;  %v1776_v62 = vsel %vm10164_vm4, %v1756_v7, %v1740_v49 }
 0x37b   : > { %4197 = vmatpush.msk.msrb.mxu3 %vm5182_vm3, %v1768_v14  ;;  %4221 = vmatpush.msk.msrb.mxu2 %vm5193_vm5, %v1776_v62 }
 0x37e   : > { %2205 = vrot.lane.b32.xlu1 %v6356_v23, %s4695_s24 }
 0x37f   : > { %2189 = vrot.lane.b32.xlu0 %v6361_v41, %s4695_s24 }
 0x380   : > { %v1754_v0 = vpop.permute.xlu1 %1753  ;;  %2281 = vrot.lane.b32.xlu2 %v6500_v18, %s4696_s25 }
 0x381   : > { %v1738_v4 = vpop.permute.xlu0 %1737 }
 0x382   : > { %v1734_v22 = vpop.permute.xlu2 %1733  ;;  %v1767_v49 = vsel %vm10164_vm4, %v1738_v4, %v1754_v0  ;;  %v1775_v9 = vsel %vm10164_vm4, %v1754_v0, %v1738_v4 }
 0x383   : > { %4198 = vmatpush.msk.msrb.mxu3 %vm5182_vm3, %v1767_v49  ;;  %4222 = vmatpush.msk.msrb.mxu2 %vm5193_vm5, %v1775_v9 }
 0x386   : > { %2155 = vrot.lane.b32.xlu1 %v6491_v8, %s4694_s23 }
 0x387   : > { %2279 = vrot.lane.b32.xlu0 %v6511_v12, %s4696_s25 }
 0x388   : > { %v1736_v7 = vpop.permute.xlu1 %1735  ;;  %2263 = vrot.lane.b32.xlu2 %v6524_v25, %s4696_s25 }
 0x389   : > { %v1766_v14 = vsel %vm10164_vm4, %v1736_v7, %v1752_v20  ;;  %v1774_v62 = vsel %vm10164_vm4, %v1752_v20, %v1736_v7  ;;  %v1694_v0 = vpop.permute.xlu0 %1693 }
 0x38a   : > { %4199 = vmatpush.msk.msrb.mxu3 %vm5182_vm3, %v1766_v14  ;;  %4223 = vmatpush.msk.msrb.mxu2 %vm5193_vm5, %v1774_v62  ;;  %v1690_v4 = vpop.permute.xlu2 %1689  ;;  %v1713_v49 = vsel %vm10165_vm2, %v1694_v0, %v1678_v5  ;;  %v1705_v9 = vsel %vm10165_vm2, %v1678_v5, %v1694_v0 }
 0x38b   : > { %4188 = vmatpush.msk.msrb.mxu1 %vm5143_vm0, %v1713_v49  ;;  %4212 = vmatpush.msk.msrb.mxu0 %vm5147_vm1, %v1705_v9 }
 0x38e   : > { %2153 = vrot.lane.b32.xlu1 %v6500_v18, %s4694_s23 }
 0x38f   : > { %2277 = vrot.lane.b32.xlu0 %v6497_v36, %s4696_s25 }
 0x390   : > { %v1692_v20 = vpop.permute.xlu1 %1691  ;;  %2261 = vrot.lane.b32.xlu2 %v6469_v34, %s4696_s25 }
 0x391   : > { %v1676_v7 = vpop.permute.xlu0 %1675 }
 0x392   : > { %v6902_v14 = vpop.permute.xlu2 %1669  ;;  %v1712_v5 = vsel %vm10165_vm2, %v1692_v20, %v1676_v7  ;;  %v1704_v62 = vsel %vm10165_vm2, %v1676_v7, %v1692_v20 }
 0x393   : > { %4189 = vmatpush.msk.msrb.mxu1 %vm5143_vm0, %v1712_v5  ;;  %4213 = vmatpush.msk.msrb.mxu0 %vm5147_vm1, %v1704_v62 }
 0x396   : > { %2151 = vrot.lane.b32.xlu1 %v6511_v12, %s4694_s23 }
 0x397   : > { %2275 = vrot.lane.b32.xlu0 %v6436_v38, %s4696_s25 }
 0x398   : > { %v1674_v0 = vpop.permute.xlu1 %1673  ;;  %2259 = vrot.lane.b32.xlu2 %v6440_v52, %s4696_s25 }
 0x399   : > { %v1703_v49 = vsel %vm10165_vm2, %v1674_v0, %v1690_v4  ;;  %v1711_v9 = vsel %vm10165_vm2, %v1690_v4, %v1674_v0  ;;  %v1750_v20 = vpop.permute.xlu0 %1749  ;;  %v1644_v4 = vsel %vm10166_vm7, %v6710_v3, %v6758_v39  ;;  %v1652_v0 = vsel %vm10166_vm7, %v6758_v39, %v6710_v3 }
 0x39a   : > { %4214 = vmatpush.msk.msrb.mxu0 %vm5147_vm1, %v1703_v49  ;;  %4190 = vmatpush.msk.msrb.mxu1 %vm5143_vm0, %v1711_v9  ;;  %v6926_v7 = vpop.permute.xlu2 %2127  ;;  %v1765_v5 = vsel %vm10164_vm4, %v1734_v22, %v1750_v20  ;;  %v1773_v62 = vsel %vm10164_vm4, %v1750_v20, %v1734_v22  ;;  %v1651_v39 = vsel %vm10166_vm7, %v6764_v21, %v6726_v15  ;;  %v4553_v22 = vld [vmem:[%s10060_s1 + $0x88] sm:$0xff]  ;;  %vm10435_vm4 = vcmp.lt.s32.totalorder %v10429_v10, 16 }
 0x39b   : > { %4200 = vmatpush.msk.msrb.mxu3 %vm5182_vm3, %v1765_v5  ;;  %4224 = vmatpush.msk.msrb.mxu2 %vm5193_vm5, %v1773_v62  ;;  %v1643_v3 = vsel %vm10166_vm7, %v6726_v15, %v6764_v21  ;;  %v1650_v21 = vsel %vm10166_vm7, %v6734_v58, %v6732_v37  ;;  %v1642_v15 = vsel %vm10166_vm7, %v6732_v37, %v6734_v58 }
 0x39c   : > { %4201 = vmatmul.msk.f32.vlgmr.msrb.gmra.mxu3 %vm645_vm10, %v4553_v22  ;;  %4225 = vmatmul.msk.f32.vlgmr.msrb.gmra.mxu2 %vm645_vm10, %v4553_v22  ;;  %v1649_v5 = vsel %vm10166_vm7, %v6748_v60, %v6650_v40  ;;  %v4554_v22 = vld [vmem:[%s10060_s1 + $0x98] sm:$0xff] }
 0x39d   : > { %4249 = vmatpush.msk.msra.mxu3 %vm5538_vm11, %v1652_v0  ;;  %4273 = vmatpush.msk.msra.mxu2 %vm5193_vm5, %v1644_v4  ;;  %v1641_v4 = vsel %vm10166_vm7, %v6650_v40, %v6748_v60  ;;  %v1648_v0 = vsel %vm10166_vm7, %v6754_v6, %v6654_v26  ;;  %v1640_v60 = vsel %vm10166_vm7, %v6654_v26, %v6754_v6 }
 0x39e   : > { %2149 = vrot.lane.b32.xlu1 %v6497_v36, %s4694_s23  ;;  %v1647_v40 = vsel %vm10166_vm7, %v6722_v50, %v6636_v17  ;;  %v1646_v26 = vsel %vm10166_vm7, %v6738_v57, %v6590_v33 }
 0x39f   : > { %4250 = vmatpush.msk.msra.mxu3 %vm5538_vm11, %v1651_v39  ;;  %4274 = vmatpush.msk.msra.mxu2 %vm5193_vm5, %v1643_v3  ;;  %v1639_v39 = vsel %vm10166_vm7, %v6636_v17, %v6722_v50  ;;  %v1638_v17 = vsel %vm10166_vm7, %v6590_v33, %v6738_v57  ;;  %v1645_v3 = vsel %vm10166_vm7, %v6744_v42, %v6594_v48 }
 0x3a0   : > { %v1688_v9 = vpop.permute.xlu1 %1687  ;;  %2273 = vrot.lane.b32.xlu0 %v6407_v24, %s4696_s25  ;;  %2257 = vrot.lane.b32.xlu2 %v6404_v55, %s4696_s25  ;;  %v1637_v57 = vsel %vm10166_vm7, %v6594_v48, %v6744_v42  ;;  %v1588_v42 = vsel %vm10435_vm4, %v6720_v27, %v6714_v1  ;;  %v4555_v48 = vld [vmem:[%s10060_s1 + $0x80] sm:$0xff]  ;;  %vm10437_vm7 = vmmov %vm10435_vm4 }
 0x3a1   : > { %4251 = vmatpush.msk.msra.mxu3 %vm5538_vm11, %v1650_v21  ;;  %4275 = vmatpush.msk.msra.mxu2 %vm5193_vm5, %v1642_v15  ;;  %v1672_v20 = vpop.permute.xlu0 %1671  ;;  %v1587_v15 = vsel %vm10435_vm4, %v6686_v59, %v6696_v47 }
 0x3a2   : > { %v6987_v62 = vpop.permute.xlu2 %2133  ;;  %v1710_v37 = vsel %vm10165_vm2, %v1688_v9, %v1672_v20  ;;  %v1702_v58 = vsel %vm10165_vm2, %v1672_v20, %v1688_v9 }
 0x3a3   : > { %4252 = vmatpush.msk.msra.mxu3 %vm5538_vm11, %v1649_v5  ;;  %4276 = vmatpush.msk.msra.mxu2 %vm5193_vm5, %v1641_v4 }
 0x3a4   : > { %4191 = vmatpush.msk.msrb.mxu1 %vm5143_vm0, %v1710_v37  ;;  %4215 = vmatpush.msk.msrb.mxu0 %vm5147_vm1, %v1702_v58 }
 0x3a5   : > { %4253 = vmatpush.msk.msra.mxu3 %vm5538_vm11, %v1648_v0  ;;  %4277 = vmatpush.msk.msra.mxu2 %vm5193_vm5, %v1640_v60 }
 0x3a6   : > { %2147 = vrot.lane.b32.xlu1 %v6436_v38, %s4694_s23  ;;  %4202 = vmatmul.msk.f32.gmra.mxu3 %vm645_vm10, %v4554_v22 }
 0x3a7   : > { %4254 = vmatpush.msk.msra.mxu3 %vm5538_vm11, %v1647_v40  ;;  %4278 = vmatpush.msk.msra.mxu2 %vm5193_vm5, %v1639_v39 }
 0x3a8   : > { %v7031_v6 = vpop.permute.xlu1 %2125  ;;  %2271 = vrot.lane.b32.xlu0 %v6392_v63, %s4696_s25  ;;  %2255 = vrot.lane.b32.xlu2 %v6375_v44, %s4696_s25 }
 0x3a9   : > { %4255 = vmatpush.msk.msra.mxu3 %vm5538_vm11, %v1646_v26  ;;  %4279 = vmatpush.msk.msra.mxu2 %vm5193_vm5, %v1638_v17  ;;  %v1686_v50 = vpop.permute.xlu0 %1685  ;;  %v10453_v26 = vld [vmem:[#allocation65_spill] sm:$0xff] }
 0x3aa   : > { %v7057_v9 = vpop.permute.xlu2 %2139  ;;  %v1709_v33 = vsel %vm10165_vm2, %v1686_v50, %v6902_v14  ;;  %v1701_v21 = vsel %vm10165_vm2, %v6902_v14, %v1686_v50  ;;  %4226 = vmatmul.msk.f32.gmra.mxu2 %vm645_vm10, %v4554_v22  ;;  %vm10436_vm2 = vcmp.ge.s32.totalorder %v10429_v10, 16  ;;  %v1580_v14 = vsel %vm10437_vm7, %v6714_v1, %v6720_v27  ;;  %v4556_v27 = vld [vmem:[%s10060_s1 + $0xa8] sm:$0xff] }
 0x3ab   : > { %4256 = vmatpush.msk.msra.mxu3 %vm5538_vm11, %v1645_v3  ;;  %4280 = vmatpush.msk.msra.mxu2 %vm5193_vm5, %v1637_v57  ;;  %vm10438_vm6 = vmmov %vm10436_vm2  ;;  %v10458_v3 = vld [vmem:[#allocation66_spill] sm:$0xff] }
 0x3ac   : > { %4192 = vmatpush.msk.msrb.mxu1 %vm5143_vm0, %v1709_v33  ;;  %4216 = vmatpush.msk.msrb.mxu0 %vm5147_vm1, %v1701_v21  ;;  %v10462_v21 = vld [vmem:[#allocation64_spill] sm:$0xff] }
 0x3ad   : > { %1813 = vmatmul.f32.vlgmr.msrb.gmra.mxu1 %v4555_v48  ;;  %1895 = vmatmul.f32.vlgmr.msrb.gmra.mxu0 %v4555_v48 }
 0x3ae   : > { %4233 = vmatpush.msk.msra.mxu1 %vm10436_vm2, %v1588_v42  ;;  %2043 = vmatpush.msra.mxu0 %v1580_v14  ;;  %vm10439_vm2 = vmmov %vm10435_vm4 }
 0x3af   : > { %2145 = vrot.lane.b32.xlu1 %v6407_v24, %s4694_s23  ;;  %v1579_v20 = vsel %vm10439_vm2, %v6696_v47, %v6686_v59  ;;  %vm10440_vm7 = vmmov %vm10439_vm2  ;;  %4203 = vmatmul.msk.f32.gmra.mxu3 %vm645_vm10, %v4556_v27  ;;  %v1585_v37 = vsel %vm10439_vm2, %v6672_v54, %v6666_v30 }
 0x3b0   : > { %4234 = vmatpush.msk.msra.mxu1 %vm10438_vm6, %v1587_v15  ;;  %v7103_v5 = vpop.permute.xlu1 %2131  ;;  %2269 = vrot.lane.b32.xlu0 %v6356_v23, %s4696_s25  ;;  %v1586_v1 = vsel %vm10440_vm7, %v6690_v32, %v6662_v2  ;;  %vm10441_vm4 = vmmov %vm10439_vm2  ;;  %v4560_v15 = vld [vmem:[%s10060_s1 + $0xc8] sm:$0xff] }
 0x3b1   : > { %2044 = vmatpush.msra.mxu0 %v1579_v20  ;;  %2253 = vrot.lane.b32.xlu2 %v6361_v41, %s4696_s25  ;;  %v1578_v59 = vsel %vm10441_vm4, %v6662_v2, %v6690_v32  ;;  %v7119_v47 = vpop.permute.xlu0 %2129  ;;  %vm10442_vm7 = vmmov %vm10438_vm6  ;;  %v4557_v32 = vld [vmem:[%s10060_s1 + $0x90] sm:$0xff] }
 0x3b2   : > { %4235 = vmatpush.msk.msra.mxu1 %vm10438_vm6, %v1586_v1  ;;  %v7125_v4 = vpop.permute.xlu2 %2201  ;;  %4227 = vmatmul.msk.f32.gmra.mxu2 %vm645_vm10, %v4556_v27  ;;  %vm10443_vm6 = vmmov %vm10439_vm2  ;;  %v10465_v1 = vld [vmem:[#allocation61_spill] sm:$0xff] }
 0x3b3   : > { %2045 = vmatpush.msra.mxu0 %v1578_v59  ;;  %v1577_v2 = vsel %vm10443_vm6, %v6666_v30, %v6672_v54  ;;  %vm10444_vm4 = vmmov %vm10439_vm2  ;;  %v10466_v59 = vld [vmem:[#allocation6_spill] sm:$0xff] }
 0x3b4   : > { %4236 = vmatpush.msk.msra.mxu1 %vm10442_vm7, %v1585_v37  ;;  %v1584_v58 = vsel %vm10444_vm4, %v6626_v53, %v6648_v51  ;;  %vm10445_vm2 = vmmov %vm10442_vm7  ;;  %v1575_v0 = vsel %vm10444_vm4, %v6602_v45, %v6630_v16 }
 0x3b5   : > { %2046 = vmatpush.msra.mxu0 %v1577_v2  ;;  %1816 = vmatmul.f32.gmra.mxu1 %v4557_v32  ;;  %vm10446_vm7 = vmmov %vm10444_vm4  ;;  %v4561_v2 = vld [vmem:[%s10060_s1 + $0xb0] sm:$0xff] }
 0x3b6   : > { %1898 = vmatmul.f32.gmra.mxu0 %v4557_v32  ;;  %4237 = vmatpush.msk.msra.mxu1 %vm10445_vm2, %v1584_v58  ;;  %v1576_v30 = vsel %vm10446_vm7, %v6648_v51, %v6626_v53  ;;  %vm10447_vm6 = vmmov %vm10444_vm4  ;;  %v4558_v51 = vld [vmem:[%s10060_s1 + $0xb8] sm:$0xff]  ;;  %v10469_v32 = vld [vmem:[#allocation46_spill] sm:$0xff] }
 0x3b7   : > { %2047 = vmatpush.msra.mxu0 %v1576_v30  ;;  %v1583_v54 = vsel %vm10447_vm6, %v6630_v16, %v6602_v45  ;;  %vm10448_vm15 = vmmov %vm10445_vm2  ;;  %4204 = vmatmul.msk.f32.gmra.mxu3 %vm645_vm10, %v4558_v51  ;;  %v10470_v58 = vld [vmem:[#allocation60_spill] sm:$0xff] }
 0x3b8   : > { %4238 = vmatpush.msk.msra.mxu1 %vm10448_vm15, %v1583_v54  ;;  %v7161_v60 = vpop.permute.xlu1 %2137  ;;  %2141 = vrot.lane.b32.xlu0 %v6356_v23, %s4694_s23  ;;  %vm10449_vm2 = vmmov %vm10444_vm4 }
 0x3b9   : > { %2048 = vmatpush.msra.mxu0 %v1575_v0  ;;  %2143 = vrot.lane.b32.xlu2 %v6392_v63, %s4694_s23  ;;  %v1582_v53 = vsel %vm10449_vm2, %v6612_v11, %v6606_v31  ;;  %vm10450_vm7 = vmmov %vm10449_vm2  ;;  %v7177_v16 = vpop.permute.xlu0 %2135  ;;  %v10472_v0 = vld [vmem:[#allocation3_spill] sm:$0xff] }
 0x3ba   : > { %4239 = vmatpush.msk.msra.mxu1 %vm10448_vm15, %v1582_v53  ;;  %v1574_v45 = vsel %vm10450_vm7, %v6606_v31, %v6612_v11  ;;  %v7183_v40 = vpop.permute.xlu2 %2215  ;;  %vm10451_vm6 = vmmov %vm10449_vm2  ;;  %4228 = vmatmul.msk.f32.gmra.mxu2 %vm645_vm10, %v4558_v51  ;;  %v1573_v31 = vsel %vm10449_vm2, %v6588_v46, %v6570_v19  ;;  %v4559_v11 = vld [vmem:[%s10060_s1 + $0xa0] sm:$0xff]  ;;  %v10473_v53 = vld [vmem:[#allocation8_spill] sm:$0xff] }
 0x3bb   : > { %2049 = vmatpush.msra.mxu0 %v1574_v45  ;;  %v1581_v39 = vsel %vm10451_vm6, %v6570_v19, %v6588_v46  ;;  %vm10452_vm4 = vmmov %vm10448_vm15  ;;  %vm10454_vm15 = vcmp.lt.s32.totalorder %v10429_v10, 17  ;;  %v10457_v46 = vld [vmem:[#allocation62_spill] sm:$0xff] }
 0x3bc   : > { %4240 = vmatpush.msk.msra.mxu1 %vm10452_vm4, %v1581_v39  ;;  %v1524_v17 = vsel %vm10454_vm15, %v10453_v26, %v6708_v56  ;;  %vm10456_vm7 = vmmov %vm10454_vm15 }
 0x3bd   : > { %2050 = vmatpush.msra.mxu0 %v1573_v31  ;;  %1819 = vmatmul.f32.gmra.mxu1 %v4559_v11  ;;  %v1516_v19 = vsel %vm10456_vm7, %v6708_v56, %v10453_v26  ;;  %vm10459_vm6 = vmmov %vm10456_vm7  ;;  %v10461_v56 = vld [vmem:[#allocation63_spill] sm:$0xff] }
 0x3be   : > { %1901 = vmatmul.f32.gmra.mxu0 %v4559_v11  ;;  %4241 = vmatpush.msk.msra.mxu1 %vm5694_vm12, %v1524_v17  ;;  %v1523_v22 = vsel %vm10459_vm6, %v10458_v3, %v10457_v46  ;;  %vm10460_vm4 = vmmov %vm10459_vm6  ;;  %v10476_v31 = vld [vmem:[#allocation11_spill] sm:$0xff]  ;;  %v10477_v11 = vld [vmem:[#allocation4_spill] sm:$0xff] }
 0x3bf   : > { %4265 = vmatpush.msk.msra.mxu0 %vm5147_vm1, %v1516_v19  ;;  %v1515_v57 = vsel %vm10460_vm4, %v10457_v46, %v10458_v3  ;;  %vm10463_vm2 = vmmov %vm10460_vm4  ;;  %4205 = vmatmul.msk.f32.gmra.mxu3 %vm645_vm10, %v4560_v15  ;;  %v4562_v46 = vld [vmem:[%s10060_s1 + $0xd8] sm:$0xff] }
 0x3c0   : > { %4242 = vmatpush.msk.msra.mxu1 %vm5694_vm12, %v1523_v22  ;;  %v2220_v33 = vpop.permute.xlu1 %2219  ;;  %v1522_v42 = vsel %vm10463_vm2, %v10462_v21, %v10461_v56  ;;  %vm10464_vm15 = vmmov %vm10463_vm2  ;;  %v1512_v54 = vsel %vm10463_vm2, %v10469_v32, %v10470_v58  ;;  %v10480_v22 = vld [vmem:[#allocation7_spill] sm:$0xff] }
 0x3c1   : > { %4266 = vmatpush.msk.msra.mxu0 %vm5147_vm1, %v1515_v57  ;;  %v1514_v48 = vsel %vm10464_vm15, %v10461_v56, %v10462_v21  ;;  %v2204_v14 = vpop.permute.xlu0 %2203  ;;  %vm10467_vm7 = vmmov %vm10463_vm2  ;;  %v10481_v57 = vld [vmem:[#allocation21_spill] sm:$0xff] }
 0x3c2   : > { %4243 = vmatpush.msk.msra.mxu1 %vm5694_vm12, %v1522_v42  ;;  %v7239_v20 = vpop.permute.xlu2 %2195  ;;  %v1521_v27 = vsel %vm10467_vm7, %v10466_v59, %v10465_v1  ;;  %4229 = vmatmul.msk.f32.gmra.mxu2 %vm645_vm10, %v4560_v15  ;;  %vm10468_vm6 = vmmov %vm10463_vm2  ;;  %v1517_v56 = vsel %vm10463_vm2, %v10481_v57, %v10480_v22  ;;  %v2228_v42 = vsel %vm1119_vm14, %v2204_v14, %v2220_v33 }
 0x3c3   : > { %4267 = vmatpush.msk.msra.mxu0 %vm5147_vm1, %v1514_v48  ;;  %v1513_v37 = vsel %vm10468_vm6, %v10465_v1, %v10466_v59  ;;  %vm10471_vm4 = vmmov %vm10463_vm2  ;;  %v2236_v48 = vsel %vm1119_vm14, %v2220_v33, %v2204_v14  ;;  %v4563_v1 = vld [vmem:[%s10060_s1 + $0xc0] sm:$0xff] }
 0x3c4   : > { %4244 = vmatpush.msk.msra.mxu1 %vm5694_vm12, %v1521_v27  ;;  %v1520_v30 = vsel %vm10471_vm4, %v10470_v58, %v10469_v32  ;;  %vm10474_vm15 = vmmov %vm10463_vm2 }
 0x3c5   : > { %4268 = vmatpush.msk.msra.mxu0 %vm5147_vm1, %v1513_v37  ;;  %1822 = vmatmul.f32.gmra.mxu1 %v4561_v2  ;;  %v1519_v45 = vsel %vm10474_vm15, %v10473_v53, %v10472_v0  ;;  %vm10475_vm7 = vmmov %vm10463_vm2 }
 0x3c6   : > { %1904 = vmatmul.f32.gmra.mxu0 %v4561_v2  ;;  %4245 = vmatpush.msk.msra.mxu1 %vm5694_vm12, %v1520_v30  ;;  %v1511_v51 = vsel %vm10475_vm7, %v10472_v0, %v10473_v53  ;;  %vm10478_vm6 = vmmov %vm10463_vm2  ;;  %v4566_v53 = vld [vmem:[%s10060_s1 + $0xf8] sm:$0xff]  ;;  %vm10484_vm7 = vcmp.lt.s32.totalorder %v10429_v10, 111 }
 0x3c7   : > { %4269 = vmatpush.msk.msra.mxu0 %vm5147_vm1, %v1512_v54  ;;  %v1518_v26 = vsel %vm10478_vm6, %v10477_v11, %v10476_v31  ;;  %vm10479_vm4 = vmmov %vm10463_vm2  ;;  %4206 = vmatmul.msk.f32.gmra.mxu3 %vm645_vm10, %v4562_v46 }
 0x3c8   : > { %4246 = vmatpush.msk.msra.mxu1 %vm5694_vm12, %v1519_v45  ;;  %v2200_v39 = vpop.permute.xlu1 %2199  ;;  %v1510_v17 = vsel %vm10479_vm4, %v10476_v31, %v10477_v11  ;;  %vm10482_vm15 = vmmov %vm10463_vm2  ;;  %v4567_v11 = vld [vmem:[%s10060_s1 + $0xe0] sm:$0xff] }
 0x3c9   : > { %4270 = vmatpush.msk.msra.mxu0 %vm5147_vm1, %v1511_v51  ;;  %v2218_v19 = vpop.permute.xlu0 %2217  ;;  %v1509_v21 = vsel %vm10482_vm15, %v10480_v22, %v10481_v57  ;;  %v2226_v27 = vsel %vm1119_vm14, %v2200_v39, %v7183_v40  ;;  %v2234_v37 = vsel %vm1119_vm14, %v7183_v40, %v2200_v39  ;;  %v4565_v40 = vld [vmem:[%s10060_s1 + $0xd0] sm:$0xff]  ;;  %vm10485_vm6 = vmmov %vm10484_vm7  ;;  %vm10489_vm15 = vcmp.lt.s32.totalorder %v10429_v10, 113 }
 0x3ca   : > { %4247 = vmatpush.msk.msra.mxu1 %vm5694_vm12, %v1518_v26  ;;  %v2210_v3 = vpop.permute.xlu2 %2209  ;;  %4230 = vmatmul.msk.f32.gmra.mxu2 %vm645_vm10, %v4562_v46  ;;  %v2227_v59 = vsel %vm1119_vm14, %v7125_v4, %v2218_v19  ;;  %v2235_v33 = vsel %vm1119_vm14, %v2218_v19, %v7125_v4  ;;  %v4564_v4 = vld [vmem:[%s10060_s1 + $0xe8] sm:$0xff]  ;;  %vm10487_vm4 = vmmov %vm10485_vm6 }
 0x3cb   : > { %4271 = vmatpush.msk.msra.mxu0 %vm5147_vm1, %v1510_v17  ;;  %v4568_v19 = vld [vmem:[%s10060_s1 + $0x8] sm:$0xff]  ;;  %vm10488_vm2 = vmmov %vm10487_vm4 }
 0x3cc   : > { %4248 = vmatpush.msk.msra.mxu1 %vm5694_vm12, %v1517_v56  ;;  %v4569_v56 = vld [vmem:[%s10060_s1 + $0xf0] sm:$0xff] }
 0x3cd   : > { %4272 = vmatpush.msk.msra.mxu0 %vm5147_vm1, %v1509_v21  ;;  %1825 = vmatmul.f32.gmra.mxu1 %v4563_v1 }
 0x3ce   : > { %2317 = vmatpush.msrb.mxu1 %v2228_v42  ;;  %1907 = vmatmul.f32.gmra.mxu0 %v4563_v1 }
 0x3cf   : > { %4313 = vmatpush.msk.msrb.mxu0 %vm303_vm13, %v2236_v48  ;;  %4207 = vmatmul.msk.f32.gmra.mxu3 %vm645_vm10, %v4564_v4 }
 0x3d0   : > { %2318 = vmatpush.msrb.mxu1 %v2227_v59  ;;  %v2214_v14 = vpop.permute.xlu1 %2213 }
 0x3d1   : > { %4314 = vmatpush.msk.msrb.mxu0 %vm303_vm13, %v2235_v33  ;;  %v2198_v2 = vpop.permute.xlu0 %2197 }
 0x3d2   : > { %2319 = vmatpush.msrb.mxu1 %v2226_v27  ;;  %v2192_v32 = vpop.permute.xlu2 %2191  ;;  %v2225_v58 = vsel %vm1119_vm14, %v2198_v2, %v2214_v14  ;;  %v2233_v30 = vsel %vm1119_vm14, %v2214_v14, %v2198_v2  ;;  %4231 = vmatmul.msk.f32.gmra.mxu2 %vm645_vm10, %v4564_v4  ;;  %v4570_v14 = vld [vmem:[%s10060_s1 + $0x18] sm:$0xff]  ;;  %v4571_v27 = vld [vmem:[%s10060_s1] sm:$0xff] }
 0x3d3   : > { %4315 = vmatpush.msk.msrb.mxu0 %vm303_vm13, %v2234_v37 }
 0x3d4   : > { %2320 = vmatpush.msrb.mxu1 %v2225_v58 }
 0x3d5   : > { %4316 = vmatpush.msk.msrb.mxu0 %vm303_vm13, %v2233_v30  ;;  %1828 = vmatmul.f32.gmra.mxu1 %v4565_v40  ;;  %v4572_v30 = vld [vmem:[%s10060_s1 + $0x28] sm:$0xff] }
 0x3d6   : > { %1910 = vmatmul.f32.gmra.mxu0 %v4565_v40  ;;  %v4573_v40 = vld [vmem:[%s10060_s1 + $0x10] sm:$0xff] }
 0x3d7   : > { %4208 = vmatmul.msk.f32.gmra.mxu3 %vm645_vm10, %v4566_v53 }
 0x3d8   : > { %v2194_v54 = vpop.permute.xlu1 %2193 }
 0x3d9   : > { %v2212_v0 = vpop.permute.xlu0 %2211  ;;  %v2231_v31 = vsel %vm1119_vm14, %v2210_v3, %v2194_v54  ;;  %v2223_v26 = vsel %vm1119_vm14, %v2194_v54, %v2210_v3 }
 0x3da   : > { %v2282_v45 = vpop.permute.xlu2 %2281  ;;  %v2224_v51 = vsel %vm1119_vm14, %v7239_v20, %v2212_v0  ;;  %v2232_v39 = vsel %vm1119_vm14, %v2212_v0, %v7239_v20  ;;  %4232 = vmatmul.msk.f32.gmra.mxu2 %vm645_vm10, %v4566_v53 }
 0x3db   : > { %2321 = vmatpush.msrb.mxu1 %v2224_v51  ;;  %4317 = vmatpush.msk.msrb.mxu0 %vm303_vm13, %v2232_v39 }
 0x3dd   : > { %1831 = vmatmul.f32.gmra.mxu1 %v4567_v11  ;;  %4318 = vmatpush.msk.msrb.mxu0 %vm303_vm13, %v2231_v31 }
 0x3de   : > { %1913 = vmatmul.f32.gmra.mxu0 %v4567_v11  ;;  %2322 = vmatpush.msrb.mxu1 %v2223_v26  ;;  %v4574_v26 = vld [vmem:[%s10060_s1 + $0x38] sm:$0xff] }
 0x3df   : > { %4257 = vmatmul.msk.f32.vlgmr.msra.gmra.mxu3 %vm645_vm10, %v4568_v19 }
 0x3e0   : > { %v2284_v20 = vpop.permute.xlu1 %2283 }
 0x3e1   : > { %v2268_v17 = vpop.permute.xlu0 %2267 }
 0x3e2   : > { %v2292_v46 = vsel %vm10484_vm7, %v2268_v17, %v2284_v20  ;;  %v2300_v22 = vsel %vm10485_vm6, %v2284_v20, %v2268_v17  ;;  %4281 = vmatmul.msk.f32.vlgmr.msra.gmra.mxu2 %vm645_vm10, %v4568_v19  ;;  %v2264_v57 = vpop.permute.xlu2 %2263  ;;  %vm10490_vm7 = vmmov %vm10489_vm15 }
 0x3e3   : > { %4297 = vmatpush.msk.msrb.mxu3 %vm5182_vm3, %v2292_v46  ;;  %4329 = vmatpush.msk.msrb.mxu2 %vm5904_vm8, %v2300_v22  ;;  %vm10492_vm6 = vmmov %vm10488_vm2 }
 0x3e5   : > { %1834 = vmatmul.f32.gmra.mxu1 %v4569_v56 }
 0x3e6   : > { %1916 = vmatmul.f32.gmra.mxu0 %v4569_v56 }
 0x3e7   : > { %4258 = vmatmul.msk.f32.gmra.mxu3 %vm645_vm10, %v4570_v14 }
 0x3e8   : > { %v2266_v21 = vpop.permute.xlu1 %2265 }
 0x3e9   : > { %v2291_v42 = vsel %vm10487_vm4, %v2266_v21, %v2282_v45  ;;  %v2299_v48 = vsel %vm10488_vm2, %v2282_v45, %v2266_v21  ;;  %v2208_v1 = vpop.permute.xlu0 %2207  ;;  %vm10493_vm4 = vmmov %vm10488_vm2  ;;  %v4576_v21 = vld [vmem:[%s10060_s1 + $0x48] sm:$0xff] }
 0x3ea   : > { %4298 = vmatpush.msk.msrb.mxu3 %vm5182_vm3, %v2291_v42  ;;  %4330 = vmatpush.msk.msrb.mxu2 %vm5904_vm8, %v2299_v48  ;;  %v2222_v59 = vsel %vm1119_vm14, %v2192_v32, %v2208_v1  ;;  %v2230_v33 = vsel %vm1119_vm14, %v2208_v1, %v2192_v32  ;;  %v2262_v37 = vpop.permute.xlu2 %2261  ;;  %vm10494_vm2 = vmmov %vm10490_vm7 }
 0x3eb   : > { %4282 = vmatmul.msk.f32.gmra.mxu2 %vm645_vm10, %v4570_v14  ;;  %2323 = vmatpush.msrb.mxu1 %v2222_v59 }
 0x3ec   : > { %4319 = vmatpush.msk.msrb.mxu0 %vm303_vm13, %v2230_v33 }
 0x3ed   : > { %1977 = vmatmul.f32.vlgmr.msra.gmra.mxu1 %v4571_v27 }
 0x3ee   : > { %2059 = vmatmul.f32.vlgmr.msra.gmra.mxu0 %v4571_v27  ;;  %v4578_v27 = vld [vmem:[%s10060_s1 + $0x58] sm:$0xff] }
 0x3ef   : > { %4259 = vmatmul.msk.f32.gmra.mxu3 %vm645_vm10, %v4572_v30 }
 0x3f0   : > { %v2206_v2 = vpop.permute.xlu1 %2205 }
 0x3f1   : > { %v2190_v4 = vpop.permute.xlu0 %2189 }
 0x3f2   : > { %v2221_v32 = vsel %vm1119_vm14, %v2190_v4, %v2206_v2  ;;  %v2229_v58 = vsel %vm1119_vm14, %v2206_v2, %v2190_v4  ;;  %v2260_v0 = vpop.permute.xlu2 %2259 }
 0x3f3   : > { %4283 = vmatmul.msk.f32.gmra.mxu2 %vm645_vm10, %v4572_v30  ;;  %2324 = vmatpush.msrb.mxu1 %v2221_v32 }
 0x3f4   : > { %4320 = vmatpush.msk.msrb.mxu0 %vm303_vm13, %v2229_v58 }
 0x3f5   : > { %1980 = vmatmul.f32.gmra.mxu1 %v4573_v40 }
 0x3f6   : > { %2062 = vmatmul.f32.gmra.mxu0 %v4573_v40 }
 0x3f7   : > { %4260 = vmatmul.msk.f32.gmra.mxu3 %vm645_vm10, %v4574_v26 }
 0x3f8   : > { %v2156_v54 = vpop.permute.xlu1 %2155 }
 0x3f9   : > { %v2172_v53 = vsel %vm10489_vm15, %v2156_v54, %v7057_v9  ;;  %v2164_v45 = vsel %vm10490_vm7, %v7057_v9, %v2156_v54  ;;  %v2280_v39 = vpop.permute.xlu0 %2279  ;;  %v4575_v9 = vld [vmem:[%s10060_s1 + $0x20] sm:$0xff]  ;;  %vm10495_vm15 = vmmov %vm10494_vm2  ;;  %v4580_v54 = vld [vmem:[%s10060_s1 + $0x68] sm:$0xff] }
 0x3fa   : > { %4321 = vmatpush.msk.msrb.mxu0 %vm5958_vm9, %v2172_v53  ;;  %4289 = vmatpush.msk.msrb.mxu1 %vm5143_vm0, %v2164_v45  ;;  %v2290_v31 = vsel %vm10492_vm6, %v2264_v57, %v2280_v39  ;;  %v2298_v11 = vsel %vm10493_vm4, %v2280_v39, %v2264_v57  ;;  %v2258_v22 = vpop.permute.xlu2 %2257  ;;  %vm10496_vm7 = vmmov %vm10493_vm4 }
 0x3fb   : > { %4284 = vmatmul.msk.f32.gmra.mxu2 %vm645_vm10, %v4574_v26  ;;  %4299 = vmatpush.msk.msrb.mxu3 %vm5182_vm3, %v2290_v31  ;;  %vm10497_vm6 = vmmov %vm10493_vm4 }
 0x3fc   : > { %4331 = vmatpush.msk.msrb.mxu2 %vm5904_vm8, %v2298_v11  ;;  %vm10498_vm4 = vmmov %vm10494_vm2 }
 0x3fd   : > { %1983 = vmatmul.f32.gmra.mxu1 %v4575_v9 }
 0x3fe   : > { %2065 = vmatmul.f32.gmra.mxu0 %v4575_v9  ;;  %v4582_v9 = vld [vmem:[%s10060_s1 + $0x78] sm:$0xff] }
 0x3ff   : > { %4261 = vmatmul.msk.f32.gmra.mxu3 %vm645_vm10, %v4576_v21 }
 0x400   : > { %v2154_v20 = vpop.permute.xlu1 %2153 }
 0x401   : > { %v2171_v17 = vsel %vm10494_vm2, %v2154_v20, %v7161_v60  ;;  %v2163_v19 = vsel %vm10495_vm15, %v7161_v60, %v2154_v20  ;;  %v2278_v46 = vpop.permute.xlu0 %2277  ;;  %v4577_v60 = vld [vmem:[%s10060_s1 + $0x30] sm:$0xff]  ;;  %vm10499_vm15 = vmmov %vm10497_vm6 }
 0x402   : > { %4322 = vmatpush.msk.msrb.mxu0 %vm5958_vm9, %v2171_v17  ;;  %4290 = vmatpush.msk.msrb.mxu1 %vm5143_vm0, %v2163_v19  ;;  %v2289_v57 = vsel %vm10496_vm7, %v2262_v37, %v2278_v46  ;;  %v2297_v56 = vsel %vm10497_vm6, %v2278_v46, %v2262_v37  ;;  %vm10500_vm7 = vmmov %vm10497_vm6  ;;  %v4579_v37 = vld [vmem:[%s10060_s1 + $0x40] sm:$0xff] }
 0x403   : > { %4285 = vmatmul.msk.f32.gmra.mxu2 %vm645_vm10, %v4576_v21  ;;  %4300 = vmatpush.msk.msrb.mxu3 %vm5182_vm3, %v2289_v57  ;;  %vm10501_vm6 = vmmov %vm10494_vm2 }
 0x404   : > { %4332 = vmatpush.msk.msrb.mxu2 %vm5904_vm8, %v2297_v56 }
 0x405   : > { %1986 = vmatmul.f32.gmra.mxu1 %v4577_v60 }
 0x406   : > { %2068 = vmatmul.f32.gmra.mxu0 %v4577_v60 }
 0x407   : > { %4262 = vmatmul.msk.f32.gmra.mxu3 %vm645_vm10, %v4578_v27 }
 0x408   : > { %v2152_v42 = vpop.permute.xlu1 %2151 }
 0x409   : > { %v2170_v48 = vsel %vm10498_vm4, %v2152_v42, %v7177_v16  ;;  %v2162_v1 = vsel %vm10494_vm2, %v7177_v16, %v2152_v42  ;;  %v2276_v59 = vpop.permute.xlu0 %2275  ;;  %v2256_v16 = vpop.permute.xlu2 %2255  ;;  %vm10502_vm4 = vmmov %vm10494_vm2 }
 0x40a   : > { %4323 = vmatpush.msk.msrb.mxu0 %vm5958_vm9, %v2170_v48  ;;  %4291 = vmatpush.msk.msrb.mxu1 %vm5143_vm0, %v2162_v1  ;;  %v2288_v33 = vsel %vm10499_vm15, %v2260_v0, %v2276_v59  ;;  %v2296_v14 = vsel %vm10500_vm7, %v2276_v59, %v2260_v0  ;;  %vm10503_vm2 = vmmov %vm10500_vm7  ;;  %v4584_v48 = vld [vmem:[%s10060_s1 + $0x70] sm:$0xff] }
 0x40b   : > { %4286 = vmatmul.msk.f32.gmra.mxu2 %vm645_vm10, %v4578_v27  ;;  %4301 = vmatpush.msk.msrb.mxu3 %vm5182_vm3, %v2288_v33  ;;  %vm10504_vm15 = vmmov %vm10503_vm2 }
 0x40c   : > { %4333 = vmatpush.msk.msrb.mxu2 %vm5904_vm8, %v2296_v14  ;;  %vm10505_vm7 = vmmov %vm10502_vm4 }
 0x40d   : > { %1989 = vmatmul.f32.gmra.mxu1 %v4579_v37 }
 0x40e   : > { %2071 = vmatmul.f32.gmra.mxu0 %v4579_v37  ;;  %v4586_v37 = vld [vmem:[%s10060_s1 + $0x100] sm:$0xff] }
 0x40f   : > { %4263 = vmatmul.msk.f32.gmra.mxu3 %vm645_vm10, %v4580_v54 }
 0x410   : > { %v2150_v2 = vpop.permute.xlu1 %2149 }
 0x411   : > { %v2169_v4 = vsel %vm10501_vm6, %v2150_v2, %v6987_v62  ;;  %v2161_v32 = vsel %vm10502_vm4, %v6987_v62, %v2150_v2  ;;  %v4581_v62 = vld [vmem:[%s10060_s1 + $0x50] sm:$0xff]  ;;  %v2254_v0 = vpop.permute.xlu2 %2253  ;;  %vm10506_vm6 = vmmov %vm10502_vm4  ;;  %v4587_v2 = vld [vmem:[%s10060_s1 + $0x118] sm:$0xff] }
 0x412   : > { %4324 = vmatpush.msk.msrb.mxu0 %vm5958_vm9, %v2169_v4  ;;  %v2274_v58 = vpop.permute.xlu0 %2273  ;;  %4292 = vmatpush.msk.msrb.mxu1 %vm5143_vm0, %v2161_v32  ;;  %vm10507_vm4 = vmmov %vm10503_vm2 }
 0x413   : > { %v2287_v30 = vsel %vm10503_vm2, %v2258_v22, %v2274_v58  ;;  %v2295_v40 = vsel %vm10504_vm15, %v2274_v58, %v2258_v22  ;;  %4287 = vmatmul.msk.f32.gmra.mxu2 %vm645_vm10, %v4580_v54  ;;  %vm10508_vm15 = vmmov %vm10506_vm6 }
 0x414   : > { %4302 = vmatpush.msk.msrb.mxu3 %vm5182_vm3, %v2287_v30  ;;  %4334 = vmatpush.msk.msrb.mxu2 %vm5904_vm8, %v2295_v40  ;;  %v4588_v30 = vld [vmem:[%s10060_s1 + $0x110] sm:$0xff]  ;;  %v4589_v40 = vld [vmem:[%s10060_s1 + $0x128] sm:$0xff] }
 0x415   : > { %1992 = vmatmul.f32.gmra.mxu1 %v4581_v62 }
 0x416   : > { %2074 = vmatmul.f32.gmra.mxu0 %v4581_v62 }
 0x417   : > { %4264 = vmatmul.msk.f32.gmra.mxu3 %vm645_vm10, %v4582_v9 }
 0x418   : > { %v2148_v53 = vpop.permute.xlu1 %2147 }
 0x419   : > { %v2168_v45 = vsel %vm10505_vm7, %v2148_v53, %v7103_v5  ;;  %v2160_v39 = vsel %vm10506_vm6, %v7103_v5, %v2148_v53  ;;  %v4583_v5 = vld [vmem:[%s10060_s1 + $0x60] sm:$0xff]  ;;  %v2144_v20 = vpop.permute.xlu2 %2143  ;;  %vm10509_vm7 = vmmov %vm10506_vm6 }
 0x41a   : > { %4325 = vmatpush.msk.msrb.mxu0 %vm5958_vm9, %v2168_v45  ;;  %v2272_v31 = vpop.permute.xlu0 %2271  ;;  %4293 = vmatpush.msk.msrb.mxu1 %vm5143_vm0, %v2160_v39  ;;  %vm10510_vm6 = vmmov %vm10503_vm2  ;;  %v4590_v45 = vld [vmem:[%s10060_s1 + $0x120] sm:$0xff]  ;;  %v4591_v39 = vld [vmem:[%s10060_s1 + $0x138] sm:$0xff] }
 0x41b   : > { %v2286_v11 = vsel %vm10507_vm4, %v2256_v16, %v2272_v31  ;;  %v2294_v26 = vsel %vm10503_vm2, %v2272_v31, %v2256_v16  ;;  %4288 = vmatmul.msk.f32.gmra.mxu2 %vm645_vm10, %v4582_v9  ;;  %vm10511_vm4 = vmmov %vm10503_vm2 }
 0x41c   : > { %4303 = vmatpush.msk.msrb.mxu3 %vm5182_vm3, %v2286_v11  ;;  %4335 = vmatpush.msk.msrb.mxu2 %vm5904_vm8, %v2294_v26  ;;  %vm10512_vm2 = vmmov %vm10509_vm7 }
 0x41d   : > { %1995 = vmatmul.f32.gmra.mxu1 %v4583_v5  ;;  %v2158_v60 = vsel %vm10512_vm2, %v6926_v7, %v2144_v20 }
 0x41e   : > { %2077 = vmatmul.f32.gmra.mxu0 %v4583_v5  ;;  %v4592_v5 = vld [vmem:[%s10060_s1 + $0x130] sm:$0xff] }
 0x41f   : > { %v7567_v21 = vpop.f32.mrf.mxu3  ;;  %v7579_v42 = vpop.f32.mrf.mxu2 }
 0x421   : > { %v2146_v17 = vpop.permute.xlu1 %2145 }
 0x422   : > { %v2167_v19 = vsel %vm10508_vm15, %v2146_v17, %v7119_v47  ;;  %v2270_v46 = vpop.permute.xlu0 %2269  ;;  %v2159_v22 = vsel %vm10509_vm7, %v7119_v47, %v2146_v17  ;;  %vm10513_vm15 = vmmov %vm10512_vm2 }
 0x423   : > { %4326 = vmatpush.msk.msrb.mxu0 %vm5958_vm9, %v2167_v19  ;;  %4294 = vmatpush.msk.msrb.mxu1 %vm5143_vm0, %v2159_v22  ;;  %v2285_v57 = vsel %vm10510_vm6, %v2254_v0, %v2270_v46  ;;  %v2293_v56 = vsel %vm10511_vm4, %v2270_v46, %v2254_v0  ;;  %v2166_v47 = vsel %vm10513_vm15, %v2144_v20, %v6926_v7  ;;  %v4585_v7 = vld [vmem:[%s10060_s1 + $0x108] sm:$0xff]  ;;  %vm10514_vm7 = vmmov %vm10512_vm2 }
 0x424   : > { %4304 = vmatpush.msk.msrb.mxu3 %vm5182_vm3, %v2285_v57  ;;  %4336 = vmatpush.msk.msrb.mxu2 %vm5904_vm8, %v2293_v56  ;;  %vm10515_vm6 = vmmov %vm10512_vm2  ;;  %v4593_v20 = vld [vmem:[%s10060_s1 + $0x148] sm:$0xff]  ;;  %v4594_v57 = vld [vmem:[%s10060_s1 + $0x140] sm:$0xff] }
 0x425   : > { %4295 = vmatpush.msk.msrb.mxu1 %vm5143_vm0, %v2158_v60  ;;  %4327 = vmatpush.msk.msrb.mxu0 %vm5958_vm9, %v2166_v47  ;;  %v4595_v56 = vld [vmem:[%s10060_s1 + $0x158] sm:$0xff] }
 0x426   : > { %1998 = vmatmul.f32.gmra.mxu1 %v4584_v48  ;;  %4305 = vmatmul.msk.f32.vlgmr.msrb.gmra.mxu3 %vm645_vm10, %v4585_v7 }
 0x427   : > { %2080 = vmatmul.f32.gmra.mxu0 %v4584_v48  ;;  %4337 = vmatmul.msk.f32.vlgmr.msrb.gmra.mxu2 %vm645_vm10, %v4585_v7 }
 0x429   : > { %v7607_v16 = vpop.f32.mrf.mxu3 }
 0x42a   : > { %v2142_v1 = vpop.permute.xlu0 %2141  ;;  %v7593_v59 = vpop.f32.mrf.mxu1 }
 0x42b   : > { %v7595_v33 = vpop.f32.mrf.mxu0  ;;  %v2157_v14 = vsel %vm10514_vm7, %v7031_v6, %v2142_v1  ;;  %v2165_v27 = vsel %vm10515_vm6, %v2142_v1, %v7031_v6  ;;  %v4596_v1 = vld [vmem:[%s10060_s1 + $0x150] sm:$0xff] }
 0x42c   : > { %4296 = vmatpush.msk.msrb.mxu1 %vm5143_vm0, %v2157_v14  ;;  %4328 = vmatpush.msk.msrb.mxu0 %vm5958_vm9, %v2165_v27  ;;  %v4597_v14 = vld [vmem:[%s10060_s1 + $0x168] sm:$0xff] }
 0x42d   : > { %v7616_v6 = vpop.f32.mrf.mxu2 }
 0x42e   : > { %2333 = vmatmul.f32.vlgmr.msrb.gmra.mxu1 %v4586_v37  ;;  %4306 = vmatmul.msk.f32.gmra.mxu3 %vm645_vm10, %v4587_v2 }
 0x42f   : > { %2415 = vmatmul.f32.vlgmr.msrb.gmra.mxu0 %v4586_v37  ;;  %4338 = vmatmul.msk.f32.gmra.mxu2 %vm645_vm10, %v4587_v2 }
 0x432   : > { %v7619_v4 = vpop.f32.mrf.mxu1  ;;  %v7623_v58 = vpop.f32.mrf.mxu3 }
 0x433   : > { %v7621_v32 = vpop.f32.mrf.mxu0 }
 0x435   : > { %v7632_v54 = vpop.f32.mrf.mxu2 }
 0x436   : > { %2336 = vmatmul.f32.gmra.mxu1 %v4588_v30  ;;  %4307 = vmatmul.msk.f32.gmra.mxu3 %vm645_vm10, %v4589_v40 }
 0x437   : > { %2418 = vmatmul.f32.gmra.mxu0 %v4588_v30  ;;  %4339 = vmatmul.msk.f32.gmra.mxu2 %vm645_vm10, %v4589_v40  ;;  %v4598_v40 = vld [vmem:[%s10060_s1 + $0x160] sm:$0xff] }
 0x43a   : > { %v7635_v62 = vpop.f32.mrf.mxu1  ;;  %v7639_v53 = vpop.f32.mrf.mxu3 }
 0x43b   : > { %v7637_v0 = vpop.f32.mrf.mxu0 }
 0x43d   : > { %v7648_v31 = vpop.f32.mrf.mxu2 }
 0x43e   : > { %2339 = vmatmul.f32.gmra.mxu1 %v4590_v45  ;;  %4308 = vmatmul.msk.f32.gmra.mxu3 %vm645_vm10, %v4591_v39 }
 0x43f   : > { %2421 = vmatmul.f32.gmra.mxu0 %v4590_v45  ;;  %4340 = vmatmul.msk.f32.gmra.mxu2 %vm645_vm10, %v4591_v39  ;;  %v4599_v45 = vld [vmem:[%s10060_s1 + $0x178] sm:$0xff] }
 0x442   : > { %v7651_v11 = vpop.f32.mrf.mxu1  ;;  %v7655_v9 = vpop.f32.mrf.mxu3 }
 0x443   : > { %v7653_v26 = vpop.f32.mrf.mxu0 }
 0x445   : > { %v7664_v17 = vpop.f32.mrf.mxu2 }
 0x446   : > { %2342 = vmatmul.f32.gmra.mxu1 %v4592_v5  ;;  %4309 = vmatmul.msk.f32.gmra.mxu3 %vm645_vm10, %v4593_v20 }
 0x447   : > { %2424 = vmatmul.f32.gmra.mxu0 %v4592_v5  ;;  %4341 = vmatmul.msk.f32.gmra.mxu2 %vm645_vm10, %v4593_v20 }
 0x44a   : > { %v7667_v19 = vpop.f32.mrf.mxu1  ;;  %v7671_v22 = vpop.f32.mrf.mxu3 }
 0x44b   : > { %v7669_v46 = vpop.f32.mrf.mxu0 }
 0x44d   : > { %v7680_v60 = vpop.f32.mrf.mxu2 }
 0x44e   : > { %2345 = vmatmul.f32.gmra.mxu1 %v4594_v57  ;;  %4310 = vmatmul.msk.f32.gmra.mxu3 %vm645_vm10, %v4595_v56 }
 0x44f   : > { %2427 = vmatmul.f32.gmra.mxu0 %v4594_v57  ;;  %4342 = vmatmul.msk.f32.gmra.mxu2 %vm645_vm10, %v4595_v56  ;;  %v4600_v56 = vld [vmem:[%s10060_s1 + $0x170] sm:$0xff] }
 0x452   : > { %v7683_v47 = vpop.f32.mrf.mxu1  ;;  %v7687_v7 = vpop.f32.mrf.mxu3 }
 0x453   : > { %v7685_v48 = vpop.f32.mrf.mxu0 }
 0x455   : > { %v7696_v27 = vpop.f32.mrf.mxu2 }
 0x456   : > { %2348 = vmatmul.f32.gmra.mxu1 %v4596_v1  ;;  %4311 = vmatmul.msk.f32.gmra.mxu3 %vm645_vm10, %v4597_v14 }
 0x457   : > { %2430 = vmatmul.f32.gmra.mxu0 %v4596_v1  ;;  %4343 = vmatmul.msk.f32.gmra.mxu2 %vm645_vm10, %v4597_v14 }
 0x45a   : > { %v7699_v37 = vpop.f32.mrf.mxu1  ;;  %v7703_v30 = vpop.f32.mrf.mxu3 }
 0x45b   : > { %v7701_v2 = vpop.f32.mrf.mxu0 }
 0x45d   : > { %v7712_v39 = vpop.f32.mrf.mxu2 }
 0x45e   : > { %2351 = vmatmul.f32.gmra.mxu1 %v4598_v40  ;;  %4312 = vmatmul.msk.f32.gmra.mxu3 %vm645_vm10, %v4599_v45 }
 0x45f   : > { %2433 = vmatmul.f32.gmra.mxu0 %v4598_v40  ;;  %4344 = vmatmul.msk.f32.gmra.mxu2 %vm645_vm10, %v4599_v45 }
 0x462   : > { %v7715_v5 = vpop.f32.mrf.mxu1  ;;  %v2019_v57 = vpop.f32.mrf.mxu3 }
 0x463   : > { %v7717_v20 = vpop.f32.mrf.mxu0 }
 0x465   : > { %v2101_v1 = vpop.f32.mrf.mxu2 }
 0x466   : > { %2354 = vmatmul.f32.gmra.mxu1 %v4600_v56 }
 0x467   : > { %2436 = vmatmul.f32.gmra.mxu0 %v4600_v56 }
 0x46a   : > { %v1978_v14 = vpop.f32.mrf.mxu1  ;;  %v7722_v35 = vpop.f32.mrf.mxu3 }
 0x46b   : > { %v2060_v8 = vpop.f32.mrf.mxu0 }
 0x46e   : > { %v2104_v18 = vpop.f32.mrf.mxu2 }
 0x472   : > { %v1981_v40 = vpop.f32.mrf.mxu1  ;;  %v7724_v45 = vpop.f32.mrf.mxu3 }
 0x473   : > { %v2063_v29 = vpop.f32.mrf.mxu0 }
 0x476   : > { %v7726_v12 = vpop.f32.mrf.mxu2 }
 0x47a   : > { %v7728_v25 = vpop.f32.mrf.mxu1  ;;  %v7732_v34 = vpop.f32.mrf.mxu3 }
 0x47b   : > { %v7730_v36 = vpop.f32.mrf.mxu0  ;;  %10516 = vst [vmem:[#allocation65_spill] sm:$0xff] %v7732_v34  ;;  %v1856_v34 = vadd.f32 %v7567_v21, %v7593_v59 }
 0x47e   : > { %v7734_v38 = vpop.f32.mrf.mxu2 }
 0x47f   : > { %10517 = vst [vmem:[#allocation62_spill] sm:$0xff] %v7734_v38  ;;  %v1938_v38 = vadd.f32 %v7579_v42, %v7595_v33 }
 0x482   : > { %v7736_v56 = vpop.f32.mrf.mxu1  ;;  %v7740_v24 = vpop.f32.mrf.mxu3 }
 0x483   : > { %v7738_v52 = vpop.f32.mrf.mxu0  ;;  %10519 = vst [vmem:[#allocation63_spill] sm:$0xff] %v7740_v24  ;;  %v1979_v24 = vadd.f32 %v1978_v14, %v1856_v34 }
 0x484   : > { %10518 = vst [vmem:[#allocation66_spill] sm:$0xff] %v7738_v52  ;;  %v10532_v52 = vld [vmem:[#allocation47_spill] sm:$0xff] }
 0x486   : > { %v7742_v55 = vpop.f32.mrf.mxu2 }
 0x487   : > { %10520 = vst [vmem:[#allocation64_spill] sm:$0xff] %v7742_v55  ;;  %v2061_v55 = vadd.f32 %v2060_v8, %v1938_v38 }
 0x48a   : > { %v7744_v63 = vpop.f32.mrf.mxu1  ;;  %v7748_v23 = vpop.f32.mrf.mxu3 }
 0x48b   : > { %10521 = vst [vmem:[#allocation61_spill] sm:$0xff] %v7744_v63  ;;  %v7746_v44 = vpop.f32.mrf.mxu0  ;;  %v2020_v63 = vadd.f32 %v2019_v57, %v1979_v24 }
 0x48c   : > { %10522 = vst [vmem:[#allocation6_spill] sm:$0xff] %v7746_v44 }
 0x48d   : > { %10523 = vst [vmem:[#allocation46_spill] sm:$0xff] %v7748_v23 }
 0x48e   : > { %v7750_v41 = vpop.f32.mrf.mxu2 }
 0x48f   : > { %10524 = vst [vmem:[#allocation60_spill] sm:$0xff] %v7750_v41 }
 0x492   : > { %v7752_v51 = vpop.f32.mrf.mxu1  ;;  %v7756_v15 = vpop.f32.mrf.mxu3 }
 0x493   : > { %10525 = vst [vmem:[#allocation3_spill] sm:$0xff] %v7752_v51  ;;  %v7754_v3 = vpop.f32.mrf.mxu0  ;;  %v2102_v51 = vadd.f32 %v2101_v1, %v2061_v55 }
 0x494   : > { %10526 = vst [vmem:[#allocation8_spill] sm:$0xff] %v7754_v3 }
 0x495   : > { %10527 = vst [vmem:[#allocation11_spill] sm:$0xff] %v7756_v15 }
 0x496   : > { %v7758_v50 = vpop.f32.mrf.mxu2 }
 0x497   : > { %10528 = vst [vmem:[#allocation4_spill] sm:$0xff] %v7758_v50 }
 0x49a   : > { %v7760_v49 = vpop.f32.mrf.mxu1  ;;  %v7764_v28 = vpop.f32.mrf.mxu3 }
 0x49b   : > { %10529 = vst [vmem:[#allocation7_spill] sm:$0xff] %v7760_v49  ;;  %v7762_v43 = vpop.f32.mrf.mxu0 }
 0x49c   : > { %10530 = vst [vmem:[#allocation21_spill] sm:$0xff] %v7764_v28 }
 0x49e   : > { %v7766_v13 = vpop.f32.mrf.mxu2 }
 0x49f   : > { %10531 = vst [vmem:[#allocation67_spill] sm:$0xff] %v7766_v13 }
 0x4a3   : > { %v7768_v61 = vpop.f32.mrf.mxu1 }
 0x4a4   : > { %v7770_v10 = vpop.f32.mrf.mxu0 }
 0x4a9   : > { %v2375_v23 = vpop.f32.mrf.mxu3 }
 0x4aa   : > { %v2457_v41 = vpop.f32.mrf.mxu2 }
 0x4ab   : > { %v2334_v15 = vpop.f32.mrf.mxu1 }
 0x4ac   : > { %v2376_v50 = vadd.f32 %v2375_v23, %v2334_v15  ;;  %v2416_v28 = vpop.f32.mrf.mxu0 }
 0x4ad   : > { %v2458_v13 = vadd.f32 %v2457_v41, %v2416_v28  ;;  %v1941_v41 = vadd.f32 %v7616_v6, %v7621_v32 }
 0x4ae   : > { %v2481_v3 = vadd.f32 %v2376_v50, %v2020_v63 }
 0x4af   : > { %v2482_v44 = vadd.f32 %v2458_v13, %v2102_v51  ;;  %v2064_v55 = vadd.f32 %v2063_v29, %v1941_v41  ;;  %v1859_v13 = vadd.f32 %v7607_v16, %v7619_v4  ;;  %v10533_v51 = vld [vmem:[#allocation50_spill] sm:$0xff] }
 0x4b0   : > { %v7777_v49 = vadd.f32 %v2481_v3, %v10532_v52 }
 0x4b1   : > { %v7780_v21 = vadd.f32 %v2482_v44, %v10532_v52  ;;  %v2378_v59 = vpop.f32.mrf.mxu3  ;;  %v2105_v34 = vadd.f32 %v2104_v18, %v2064_v55  ;;  %v1982_v29 = vadd.f32 %v1981_v40, %v1859_v13  ;;  %v1862_v40 = vadd.f32 %v7623_v58, %v7635_v62 }
 0x4b2   : > { %2577 = vrot.lane.b32.xlu2 %v7777_v49, %s4690_s19  ;;  %2513 = vrot.lane.b32.xlu1 %v7777_v49, %s4689_s18  ;;  %v2460_v24 = vpop.f32.mrf.mxu2  ;;  %v1944_v58 = vadd.f32 %v7632_v54, %v7637_v0 }
 0x4b3   : > { %2529 = vrot.lane.b32.xlu0 %v7780_v21, %s4689_s18  ;;  %v2337_v23 = vpop.f32.mrf.mxu1  ;;  %v2023_v33 = vadd.f32 %v7722_v35, %v1982_v29 }
 0x4b4   : > { %v2419_v63 = vpop.f32.mrf.mxu0  ;;  %v2379_v3 = vadd.f32 %v2378_v59, %v2337_v23 }
 0x4b5   : > { %v2461_v38 = vadd.f32 %v2460_v24, %v2419_v63  ;;  %v1985_v24 = vadd.f32 %v7728_v25, %v1862_v40  ;;  %v1874_v40 = vadd.f32 %v7687_v7, %v7699_v37 }
 0x4b6   : > { %v2483_v4 = vadd.f32 %v2379_v3, %v2023_v33  ;;  %v1877_v3 = vadd.f32 %v7703_v30, %v7715_v5  ;;  %v1959_v33 = vadd.f32 %v7712_v39, %v7717_v20  ;;  %v10540_v20 = vld [vmem:[#allocation21_spill] sm:$0xff] }
 0x4b7   : > { %v2484_v50 = vadd.f32 %v2461_v38, %v2105_v34  ;;  %v2026_v63 = vadd.f32 %v7724_v45, %v1985_v24  ;;  %v10534_v34 = vld [vmem:[#allocation53_spill] sm:$0xff] }
 0x4b8   : > { %v7817_v57 = vadd.f32 %v2483_v4, %v10533_v51  ;;  %v1868_v4 = vadd.f32 %v7655_v9, %v7667_v19  ;;  %v2000_v30 = vadd.f32 %v7768_v61, %v1877_v3  ;;  %v1871_v9 = vadd.f32 %v7671_v22, %v7683_v47  ;;  %v10535_v61 = vld [vmem:[#allocation7_spill] sm:$0xff]  ;;  %v10543_v3 = vld [vmem:[#allocation61_spill] sm:$0xff] }
 0x4b9   : > { %v2381_v44 = vpop.f32.mrf.mxu3  ;;  %v7799_v18 = vadd.f32 %v2484_v50, %v10533_v51  ;;  %v1997_v7 = vadd.f32 %v10535_v61, %v1874_v40  ;;  %v10539_v47 = vld [vmem:[#allocation3_spill] sm:$0xff] }
 0x4ba   : > { %2657 = vrot.lane.b32.xlu2 %v7780_v21, %s4691_s20  ;;  %2593 = vrot.lane.b32.xlu1 %v7780_v21, %s4690_s19  ;;  %v2463_v8 = vpop.f32.mrf.mxu2  ;;  %v1994_v39 = vadd.f32 %v10539_v47, %v1871_v9 }
 0x4bb   : > { %2641 = vrot.lane.b32.xlu0 %v7777_v49, %s4691_s20  ;;  %v2340_v28 = vpop.f32.mrf.mxu1 }
 0x4bc   : > { %v2422_v15 = vpop.f32.mrf.mxu0  ;;  %v2382_v23 = vadd.f32 %v2381_v44, %v2340_v28  ;;  %v2067_v44 = vadd.f32 %v7730_v36, %v1944_v58  ;;  %v10541_v58 = vld [vmem:[#allocation4_spill] sm:$0xff] }
 0x4bd   : > { %v2464_v28 = vadd.f32 %v2463_v8, %v2422_v15  ;;  %v1865_v8 = vadd.f32 %v7639_v53, %v7651_v11  ;;  %v1956_v15 = vadd.f32 %v7696_v27, %v7701_v2  ;;  %v1950_v53 = vadd.f32 %v7664_v17, %v7669_v46  ;;  %v10536_v46 = vld [vmem:[#allocation66_spill] sm:$0xff] }
 0x4be   : > { %v2485_v62 = vadd.f32 %v2382_v23, %v2026_v63  ;;  %v2108_v50 = vadd.f32 %v7726_v12, %v2067_v44  ;;  %v1947_v12 = vadd.f32 %v7648_v31, %v7653_v26  ;;  %v1953_v31 = vadd.f32 %v7680_v60, %v7685_v48  ;;  %v10542_v44 = vld [vmem:[#allocation67_spill] sm:$0xff] }
 0x4bf   : > { %v2079_v11 = vadd.f32 %v7762_v43, %v1956_v15  ;;  %v2082_v26 = vadd.f32 %v7770_v10, %v1959_v33  ;;  %v1988_v19 = vadd.f32 %v7736_v56, %v1865_v8  ;;  %v10537_v43 = vld [vmem:[#allocation6_spill] sm:$0xff]  ;;  %v10538_v10 = vld [vmem:[#allocation8_spill] sm:$0xff]  ;;  %v2041_v56 = vadd.f32 %v10540_v20, %v2000_v30 }
 0x4c0   : > { %v7847_v45 = vadd.f32 %v2485_v62, %v10534_v34  ;;  %v2486_v0 = vadd.f32 %v2464_v28, %v2108_v50  ;;  %v2070_v60 = vadd.f32 %v10536_v46, %v1947_v12  ;;  %v2073_v48 = vadd.f32 %v10537_v43, %v1950_v53  ;;  %v10545_v33 = vld [vmem:[#allocation60_spill] sm:$0xff]  ;;  %v10546_v53 = vld [vmem:[#allocation46_spill] sm:$0xff]  ;;  %v10555_v46 = vld [vmem:[#allocation65_spill] sm:$0xff] }
 0x4c1   : > { %v7801_v42 = vpop.f32.mrf.mxu3  ;;  %v2076_v37 = vadd.f32 %v10538_v10, %v1953_v31  ;;  %v2120_v62 = vadd.f32 %v10541_v58, %v2079_v11  ;;  %v2123_v28 = vadd.f32 %v10542_v44, %v2082_v26  ;;  %v1991_v8 = vadd.f32 %v10543_v3, %v1868_v4  ;;  %v10549_v4 = vld [vmem:[#allocation64_spill] sm:$0xff]  ;;  %v10557_v10 = vld [vmem:[#allocation17_spill] sm:$0xff] }
 0x4c2   : > { %2769 = vrot.lane.b32.xlu2 %v7777_v49, %s4693_s22  ;;  %2531 = vrot.lane.b32.xlu1 %v7799_v18, %s4689_s18  ;;  %v7808_v6 = vpop.f32.mrf.mxu2  ;;  %v7872_v5 = vadd.f32 %v2486_v0, %v10534_v34  ;;  %v2035_v31 = vadd.f32 %v10546_v53, %v1994_v39  ;;  %v10562_v39 = vld [vmem:[#allocation56_spill] sm:$0xff] }
 0x4c3   : > { %2785 = vrot.lane.b32.xlu0 %v7780_v21, %s4693_s22  ;;  %v7812_v16 = vpop.f32.mrf.mxu1  ;;  %v2117_v40 = vadd.f32 %v10545_v33, %v2076_v37 }
 0x4c4   : > { %v7814_v32 = vpop.f32.mrf.mxu0  ;;  %v2385_v61 = vadd.f32 %v7801_v42, %v7812_v16  ;;  %v2029_v42 = vadd.f32 %v10555_v46, %v1988_v19 }
 0x4c6   : > { %v2487_v37 = vadd.f32 %v2385_v61, %v2029_v42 }
 0x4c9   : > { %v7819_v35 = vpop.f32.mrf.mxu3 }
 0x4ca   : > { %2515 = vrot.lane.b32.xlu2 %v7817_v57, %s4689_s18  ;;  %2643 = vrot.lane.b32.xlu1 %v7817_v57, %s4691_s20  ;;  %v7825_v1 = vpop.f32.mrf.mxu2 }
 0x4cb   : > { %2579 = vrot.lane.b32.xlu0 %v7817_v57, %s4690_s19  ;;  %v7829_v14 = vpop.f32.mrf.mxu1 }
 0x4cc   : > { %v7833_v59 = vpop.f32.mrf.mxu0  ;;  %v2388_v11 = vadd.f32 %v7819_v35, %v7829_v14  ;;  %v10552_v35 = vld [vmem:[#allocation62_spill] sm:$0xff] }
 0x4cd   : > { %v2470_v30 = vadd.f32 %v7825_v1, %v7833_v59  ;;  %v10551_v1 = vld [vmem:[#allocation63_spill] sm:$0xff]  ;;  %v2111_v14 = vadd.f32 %v10552_v35, %v2070_v60 }
 0x4ce   : > { %v2032_v59 = vadd.f32 %v10551_v1, %v1991_v8  ;;  %v10580_v35 = vld [vmem:[#allocation31_spill] sm:$0xff] }
 0x4cf   : > { %vm10581_vm4 = vcmp.lt.s32.totalorder %v10580_v35, 15  ;;  %vm10586_vm15 = vcmp.lt.s32.totalorder %v10580_v35, 127  ;;  %vm10588_vm6 = vcmp.lt.s32.totalorder %v10580_v35, 1 }
 0x4d0   : > { %v2489_v16 = vadd.f32 %v2388_v11, %v2032_v59  ;;  %vm10583_vm2 = vmmov %vm10581_vm4 }
 0x4d1   : > { %v2390_v41 = vpop.f32.mrf.mxu3  ;;  %vm10587_vm7 = vmmov %vm10586_vm15 }
 0x4d2   : > { %2595 = vrot.lane.b32.xlu2 %v7799_v18, %s4690_s19  ;;  %2771 = vrot.lane.b32.xlu1 %v7817_v57, %s4693_s22  ;;  %v2472_v55 = vpop.f32.mrf.mxu2 }
 0x4d3   : > { %2659 = vrot.lane.b32.xlu0 %v7799_v18, %s4691_s20  ;;  %v2349_v38 = vpop.f32.mrf.mxu1 }
 0x4d4   : > { %v2431_v25 = vpop.f32.mrf.mxu0  ;;  %v2391_v12 = vadd.f32 %v2390_v41, %v2349_v38  ;;  %v2467_v41 = vadd.f32 %v7808_v6, %v7814_v32  ;;  %v10553_v6 = vld [vmem:[#allocation9_spill] sm:$0xff] }
 0x4d5   : > { %v2473_v50 = vadd.f32 %v2472_v55, %v2431_v25  ;;  %v10547_v25 = vld [vmem:[#allocation23_spill] sm:$0xff] }
 0x4d7   : > { %v2492_v38 = vadd.f32 %v2473_v50, %v2117_v40 }
 0x4d9   : > { %v2393_v13 = vpop.f32.mrf.mxu3  ;;  %v7934_v60 = vadd.f32 %v2492_v38, %v10557_v10 }
 0x4da   : > { %2787 = vrot.lane.b32.xlu2 %v7799_v18, %s4693_s22  ;;  %2581 = vrot.lane.b32.xlu1 %v7847_v45, %s4690_s19  ;;  %v2475_v29 = vpop.f32.mrf.mxu2 }
 0x4db   : > { %2517 = vrot.lane.b32.xlu0 %v7847_v45, %s4689_s18  ;;  %v2352_v54 = vpop.f32.mrf.mxu1  ;;  %10558 = vst [vmem:[#allocation3_spill] sm:$0xff] %v7934_v60 }
 0x4dc   : > { %v2434_v36 = vpop.f32.mrf.mxu0  ;;  %v2394_v24 = vadd.f32 %v2393_v13, %v2352_v54 }
 0x4dd   : > { %v2476_v2 = vadd.f32 %v2475_v29, %v2434_v36  ;;  %v10544_v29 = vld [vmem:[#allocation11_spill] sm:$0xff] }
 0x4de   : > { %v2038_v36 = vadd.f32 %v10544_v29, %v1997_v7  ;;  %v2491_v7 = vadd.f32 %v2391_v12, %v2035_v31 }
 0x4df   : > { %v2494_v13 = vadd.f32 %v2476_v2, %v2120_v62 }
 0x4e0   : > { %v2493_v55 = vadd.f32 %v2394_v24, %v2038_v36  ;;  %v7938_v2 = vadd.f32 %v2491_v7, %v10557_v10 }
 0x4e1   : > { %v2396_v27 = vpop.f32.mrf.mxu3  ;;  %v7923_v32 = vadd.f32 %v2494_v13, %v10553_v6 }
 0x4e2   : > { %2533 = vrot.lane.b32.xlu2 %v7872_v5, %s4689_s18  ;;  %2661 = vrot.lane.b32.xlu1 %v7872_v5, %s4691_s20  ;;  %v2478_v17 = vpop.f32.mrf.mxu2  ;;  %v7930_v43 = vadd.f32 %v2493_v55, %v10553_v6  ;;  %10559 = vst [vmem:[#allocation21_spill] sm:$0xff] %v7938_v2 }
 0x4e3   : > { %2597 = vrot.lane.b32.xlu0 %v7872_v5, %s4690_s19  ;;  %v2355_v22 = vpop.f32.mrf.mxu1  ;;  %10554 = vst [vmem:[#allocation6_spill] sm:$0xff] %v7923_v32 }
 0x4e4   : > { %v2397_v23 = vadd.f32 %v2396_v27, %v2355_v22  ;;  %v2437_v63 = vpop.f32.mrf.mxu0  ;;  %v2114_v27 = vadd.f32 %v10549_v4, %v2073_v48  ;;  %10556 = vst [vmem:[#allocation8_spill] sm:$0xff] %v7930_v43  ;;  %v2488_v48 = vadd.f32 %v2467_v41, %v2111_v14  ;;  %v10560_v22 = vld [vmem:[#allocation59_spill] sm:$0xff] }
 0x4e5   : > { %v2479_v0 = vadd.f32 %v2478_v17, %v2437_v63  ;;  %v7946_v47 = vadd.f32 %v2489_v16, %v10560_v22 }
 0x4e6   : > { %v2495_v15 = vadd.f32 %v2397_v23, %v2041_v56  ;;  %v2490_v17 = vadd.f32 %v2470_v30, %v2114_v27  ;;  %v7950_v20 = vadd.f32 %v2488_v48, %v10562_v39  ;;  %v7954_v56 = vadd.f32 %v2487_v37, %v10562_v39 }
 0x4e7   : > { %v2496_v54 = vadd.f32 %v2479_v0, %v2123_v28  ;;  %10561 = vst [vmem:[#allocation4_spill] sm:$0xff] %v7946_v47 }
 0x4e8   : > { %v7906_v26 = vadd.f32 %v2495_v15, %v10547_v25  ;;  %v7942_v19 = vadd.f32 %v2490_v17, %v10560_v22 }
 0x4e9   : > { %v7912_v9 = vadd.f32 %v2496_v54, %v10547_v25 }
 0x4ea   : > { %10548 = vst [vmem:[#allocation7_spill] sm:$0xff] %v7906_v26  ;;  %2645 = vrot.lane.b32.xlu2 %v7847_v45, %s4691_s20  ;;  %2789 = vrot.lane.b32.xlu1 %v7872_v5, %s4693_s22 }
 0x4eb   : > { %10550 = vst [vmem:[#allocation66_spill] sm:$0xff] %v7912_v9  ;;  %2915 = vmatpush.msra.mxu0 %v7912_v9  ;;  %2773 = vrot.lane.b32.xlu0 %v7847_v45, %s4693_s22 }
 0x4ec   : > { %2833 = vmatpush.msra.mxu1 %v7906_v26 }
 0x4ed   : > { %2916 = vmatpush.msra.mxu0 %v7923_v32 }
 0x4ee   : > { %2834 = vmatpush.msra.mxu1 %v7930_v43 }
 0x4ef   : > { %2917 = vmatpush.msra.mxu0 %v7934_v60 }
 0x4f0   : > { %2835 = vmatpush.msra.mxu1 %v7938_v2 }
 0x4f1   : > { %2918 = vmatpush.msra.mxu0 %v7942_v19 }
 0x4f2   : > { %2836 = vmatpush.msra.mxu1 %v7946_v47  ;;  %2725 = vrot.lane.b32.xlu2 %v7872_v5, %s4692_s21 }
 0x4f3   : > { %2919 = vmatpush.msra.mxu0 %v7950_v20  ;;  %2535 = vrot.lane.b32.xlu0 %v7950_v20, %s4689_s18 }
 0x4f4   : > { %2709 = vrot.lane.b32.xlu1 %v7847_v45, %s4692_s21  ;;  %2837 = vmatpush.msra.mxu1 %v7954_v56 }
 0x4f5   : > { %2920 = vmatpush.msra.mxu0 %v7872_v5 }
 0x4f6   : > { %2838 = vmatpush.msra.mxu1 %v7847_v45 }
 0x4f7   : > { %2921 = vmatpush.msra.mxu0 %v7799_v18 }
 0x4f8   : > { %2839 = vmatpush.msra.mxu1 %v7817_v57 }
 0x4f9   : > { %2922 = vmatpush.msra.mxu0 %v7780_v21 }
 0x4fa   : > { %2840 = vmatpush.msra.mxu1 %v7777_v49  ;;  %2583 = vrot.lane.b32.xlu2 %v7954_v56, %s4690_s19 }
 0x4fb   : > { %2647 = vrot.lane.b32.xlu0 %v7954_v56, %s4691_s20 }
 0x4fc   : > { %2519 = vrot.lane.b32.xlu1 %v7954_v56, %s4689_s18 }
 0x502   : > { %2663 = vrot.lane.b32.xlu2 %v7950_v20, %s4691_s20 }
 0x503   : > { %2791 = vrot.lane.b32.xlu0 %v7950_v20, %s4693_s22 }
 0x504   : > { %2599 = vrot.lane.b32.xlu1 %v7950_v20, %s4690_s19 }
 0x50a   : > { %2775 = vrot.lane.b32.xlu2 %v7954_v56, %s4693_s22 }
 0x50b   : > { %2711 = vrot.lane.b32.xlu0 %v7954_v56, %s4692_s21 }
 0x50c   : > { %2727 = vrot.lane.b32.xlu1 %v7950_v20, %s4692_s21  ;;  %v7989_v24 = vpop.permute.xlu2 %2577 }
 0x50d   : > { %10563 = vst [vmem:[#allocation67_spill] sm:$0xff] %v7989_v24 }
 0x512   : > { %2521 = vrot.lane.b32.xlu2 %v7946_v47, %s4689_s18 }
 0x513   : > { %2585 = vrot.lane.b32.xlu0 %v7946_v47, %s4690_s19 }
 0x514   : > { %2537 = vrot.lane.b32.xlu1 %v7942_v19, %s4689_s18  ;;  %v7997_v23 = vpop.permute.xlu2 %2657 }
 0x515   : > { %10564 = vst [vmem:[#allocation61_spill] sm:$0xff] %v7997_v23 }
 0x51a   : > { %2601 = vrot.lane.b32.xlu2 %v7942_v19, %s4690_s19 }
 0x51b   : > { %2665 = vrot.lane.b32.xlu0 %v7942_v19, %s4691_s20 }
 0x51c   : > { %2649 = vrot.lane.b32.xlu1 %v7946_v47, %s4691_s20  ;;  %v8005_v63 = vpop.permute.xlu2 %2769 }
 0x522   : > { %2793 = vrot.lane.b32.xlu2 %v7942_v19, %s4693_s22 }
 0x523   : > { %2729 = vrot.lane.b32.xlu0 %v7942_v19, %s4692_s21 }
 0x524   : > { %2777 = vrot.lane.b32.xlu1 %v7946_v47, %s4693_s22  ;;  %v8013_v58 = vpop.permute.xlu2 %2515  ;;  %v8015_v62 = vpop.permute.xlu1 %2513 }
 0x525   : > { %10565 = vst [vmem:[#allocation11_spill] sm:$0xff] %v8013_v58  ;;  %v8017_v44 = vpop.permute.xlu0 %2529 }
 0x526   : > { %10566 = vst [vmem:[#allocation60_spill] sm:$0xff] %v8015_v62 }
 0x527   : > { %10567 = vst [vmem:[#allocation46_spill] sm:$0xff] %v8017_v44 }
 0x52a   : > { %2713 = vrot.lane.b32.xlu2 %v7946_v47, %s4692_s21 }
 0x52b   : > { %2523 = vrot.lane.b32.xlu0 %v7938_v2, %s4689_s18 }
 0x52c   : > { %2587 = vrot.lane.b32.xlu1 %v7938_v2, %s4690_s19  ;;  %v8025_v28 = vpop.permute.xlu2 %2595  ;;  %v8027_v50 = vpop.permute.xlu1 %2593 }
 0x52d   : > { %10568 = vst [vmem:[#allocation64_spill] sm:$0xff] %v8025_v28  ;;  %v8029_v0 = vpop.permute.xlu0 %2641  ;;  %v4647_v28 = vld [vmem:[%s10060_s1 + $0x78] sm:$0xff] }
 0x52e   : > { %10569 = vst [vmem:[#allocation63_spill] sm:$0xff] %v8027_v50 }
 0x52f   : > { %10570 = vst [vmem:[#allocation62_spill] sm:$0xff] %v8029_v0 }
 0x532   : > { %2539 = vrot.lane.b32.xlu2 %v7934_v60, %s4689_s18 }
 0x533   : > { %2603 = vrot.lane.b32.xlu0 %v7934_v60, %s4690_s19 }
 0x534   : > { %2667 = vrot.lane.b32.xlu1 %v7934_v60, %s4691_s20  ;;  %v8037_v3 = vpop.permute.xlu2 %2787  ;;  %v8039_v8 = vpop.permute.xlu1 %2531 }
 0x535   : > { %10571 = vst [vmem:[#allocation65_spill] sm:$0xff] %v8039_v8  ;;  %v8041_v29 = vpop.permute.xlu0 %2785 }
 0x53a   : > { %2651 = vrot.lane.b32.xlu2 %v7938_v2, %s4691_s20 }
 0x53b   : > { %2779 = vrot.lane.b32.xlu0 %v7938_v2, %s4693_s22 }
 0x53c   : > { %2795 = vrot.lane.b32.xlu1 %v7934_v60, %s4693_s22  ;;  %v8049_v36 = vpop.permute.xlu2 %2533  ;;  %v8051_v12 = vpop.permute.xlu1 %2643 }
 0x53d   : > { %10572 = vst [vmem:[#allocation68_spill] sm:$0xff] %v8049_v36  ;;  %v8053_v15 = vpop.permute.xlu0 %2579 }
 0x53e   : > { %10573 = vst [vmem:[#allocation69_spill] sm:$0xff] %v8051_v12 }
 0x53f   : > { %10574 = vst [vmem:[#allocation70_spill] sm:$0xff] %v8053_v15 }
 0x542   : > { %2731 = vrot.lane.b32.xlu2 %v7934_v60, %s4692_s21 }
 0x543   : > { %2541 = vrot.lane.b32.xlu0 %v7923_v32, %s4689_s18 }
 0x544   : > { %2715 = vrot.lane.b32.xlu1 %v7938_v2, %s4692_s21  ;;  %v8061_v33 = vpop.permute.xlu2 %2645  ;;  %v8063_v40 = vpop.permute.xlu1 %2771 }
 0x545   : > { %10575 = vst [vmem:[#allocation71_spill] sm:$0xff] %v8061_v33  ;;  %v8065_v30 = vpop.permute.xlu0 %2659 }
 0x546   : > { %10576 = vst [vmem:[#allocation72_spill] sm:$0xff] %v8065_v30 }
 0x54a   : > { %2589 = vrot.lane.b32.xlu2 %v7930_v43, %s4690_s19 }
 0x54b   : > { %2653 = vrot.lane.b32.xlu0 %v7930_v43, %s4691_s20 }
 0x54c   : > { %2525 = vrot.lane.b32.xlu1 %v7930_v43, %s4689_s18  ;;  %v8073_v13 = vpop.permute.xlu2 %2725  ;;  %v8075_v54 = vpop.permute.xlu1 %2581 }
 0x54d   : > { %v8077_v53 = vpop.permute.xlu0 %2517 }
 0x54e   : > { %10577 = vst [vmem:[#allocation73_spill] sm:$0xff] %v8077_v53 }
 0x552   : > { %2797 = vrot.lane.b32.xlu2 %v7923_v32, %s4693_s22 }
 0x553   : > { %2717 = vrot.lane.b32.xlu0 %v7930_v43, %s4692_s21 }
 0x554   : > { %2605 = vrot.lane.b32.xlu1 %v7923_v32, %s4690_s19  ;;  %v8085_v31 = vpop.permute.xlu2 %2583  ;;  %v8087_v11 = vpop.permute.xlu1 %2661 }
 0x555   : > { %10578 = vst [vmem:[#allocation74_spill] sm:$0xff] %v8087_v11  ;;  %v8089_v55 = vpop.permute.xlu0 %2597 }
 0x55a   : > { %2527 = vrot.lane.b32.xlu2 %v7906_v26, %s4689_s18 }
 0x55b   : > { %2591 = vrot.lane.b32.xlu0 %v7906_v26, %s4690_s19 }
 0x55c   : > { %2781 = vrot.lane.b32.xlu1 %v7930_v43, %s4693_s22  ;;  %v2664_v4 = vpop.permute.xlu2 %2663  ;;  %v8097_v27 = vpop.permute.xlu1 %2789 }
 0x55d   : > { %v8099_v41 = vpop.permute.xlu0 %2773 }
 0x562   : > { %2607 = vrot.lane.b32.xlu2 %v7912_v9, %s4690_s19 }
 0x563   : > { %2799 = vrot.lane.b32.xlu0 %v7912_v9, %s4693_s22 }
 0x564   : > { %2733 = vrot.lane.b32.xlu1 %v7923_v32, %s4692_s21  ;;  %v2776_v38 = vpop.permute.xlu2 %2775 }
 0x565   : > { %v8107_v1 = vpop.permute.xlu0 %2535 }
 0x566   : > { %10579 = vst [vmem:[#allocation75_spill] sm:$0xff] %v8107_v1  ;;  %v8109_v59 = vpop.permute.xlu1 %2709 }
 0x56a   : > { %2783 = vrot.lane.b32.xlu2 %v7906_v26, %s4693_s22 }
 0x56b   : > { %2735 = vrot.lane.b32.xlu0 %v7912_v9, %s4692_s21 }
 0x56c   : > { %2543 = vrot.lane.b32.xlu1 %v7912_v9, %s4689_s18  ;;  %v2522_v61 = vpop.permute.xlu2 %2521 }
 0x56d   : > { %v2648_v7 = vpop.permute.xlu0 %2647 }
 0x56e   : > { %v8119_v14 = vsel %vm10581_vm4, %v2648_v7, %v2664_v4  ;;  %v8123_v17 = vsel %vm10583_vm2, %v2664_v4, %v2648_v7  ;;  %v8125_v46 = vpop.permute.xlu1 %2519  ;;  %vm10589_vm4 = vmmov %vm10588_vm6  ;;  %vm10590_vm2 = vcmp.lt.s32.totalorder %v10580_v35, 16 }
 0x56f   : > { %10582 = vst [vmem:[#allocation31_spill] sm:$0xff] %v8119_v14 }
 0x570   : > { %10584 = vst [vmem:[#allocation76_spill] sm:$0xff] %v8123_v17 }
 0x571   : > { %10585 = vst [vmem:[#allocation77_spill] sm:$0xff] %v8125_v46 }
 0x572   : > { %2719 = vrot.lane.b32.xlu2 %v7906_v26, %s4692_s21 }
 0x573   : > { %2707 = vrot.lane.b32.xlu0 %v7817_v57, %s4692_s21 }
 0x574   : > { %2655 = vrot.lane.b32.xlu1 %v7906_v26, %s4691_s20  ;;  %v2602_v42 = vpop.permute.xlu2 %2601 }
 0x575   : > { %v2792_v16 = vpop.permute.xlu0 %2791 }
 0x576   : > { %v8135_v48 = vsel %vm10586_vm15, %v2776_v38, %v2792_v16  ;;  %v8139_v37 = vsel %vm10587_vm7, %v2792_v16, %v2776_v38  ;;  %v8141_v4 = vpop.permute.xlu1 %2599  ;;  %vm10591_vm15 = vmmov %vm10590_vm2  ;;  %vm10592_vm7 = vcmp.lt.s32.totalorder %v10580_v35, 17 }
 0x57a   : > { %2705 = vrot.lane.b32.xlu2 %v7777_v49, %s4692_s21 }
 0x57b   : > { %2721 = vrot.lane.b32.xlu0 %v7780_v21, %s4692_s21 }
 0x57c   : > { %2723 = vrot.lane.b32.xlu1 %v7799_v18, %s4692_s21  ;;  %v2794_v7 = vpop.permute.xlu2 %2793 }
 0x57d   : > { %v2712_v25 = vpop.permute.xlu0 %2711 }
 0x57e   : > { %v2728_v6 = vpop.permute.xlu1 %2727 }
 0x57f   : > { %v8151_v10 = vsel %vm10588_vm6, %v2712_v25, %v2728_v6  ;;  %v8155_v38 = vsel %vm10589_vm4, %v2728_v6, %v2712_v25  ;;  %vm10594_vm6 = vmmov %vm10592_vm7  ;;  %vm10596_vm4 = vcmp.lt.s32.totalorder %v10580_v35, 15 }
 0x582   : > { %2669 = vrot.lane.b32.xlu2 %v7923_v32, %s4691_s20 }
 0x583   : > { %3161 = vrot.lane.b32.xlu0 %v7777_v49, %s4694_s23 }
 0x584   : > { %2671 = vrot.lane.b32.xlu1 %v7912_v9, %s4691_s20  ;;  %v2714_v16 = vpop.permute.xlu2 %2713 }
 0x585   : > { %v2586_v22 = vpop.permute.xlu0 %2585 }
 0x586   : > { %v8165_v39 = vsel %vm10590_vm2, %v2602_v42, %v2586_v22  ;;  %v2538_v34 = vpop.permute.xlu1 %2537  ;;  %v8169_v25 = vsel %vm10591_vm15, %v2586_v22, %v2602_v42  ;;  %vm10598_vm2 = vmmov %vm10596_vm4  ;;  %vm10599_vm15 = vcmp.lt.s32.totalorder %v10580_v35, 1 }
 0x587   : > { %v8173_v6 = vsel %vm10592_vm7, %v2522_v61, %v2538_v34  ;;  %v8177_v51 = vsel %vm10594_vm6, %v2538_v34, %v2522_v61  ;;  %vm10600_vm7 = vmmov %vm10599_vm15  ;;  %vm10601_vm6 = vcmp.lt.s32.totalorder %v10580_v35, 127 }
 0x588   : > { %10593 = vst [vmem:[#allocation78_spill] sm:$0xff] %v8173_v6 }
 0x589   : > { %10595 = vst [vmem:[#allocation79_spill] sm:$0xff] %v8177_v51 }
 0x58a   : > { %3165 = vrot.lane.b32.xlu2 %v7847_v45, %s4694_s23 }
 0x58b   : > { %3167 = vrot.lane.b32.xlu0 %v7954_v56, %s4694_s23 }
 0x58c   : > { %3163 = vrot.lane.b32.xlu1 %v7817_v57, %s4694_s23  ;;  %v2540_v52 = vpop.permute.xlu2 %2539 }
 0x58d   : > { %v2666_v22 = vpop.permute.xlu0 %2665 }
 0x58e   : > { %v2650_v42 = vpop.permute.xlu1 %2649 }
 0x58f   : > { %v8187_v44 = vsel %vm10596_vm4, %v2650_v42, %v2666_v22  ;;  %v8191_v34 = vsel %vm10598_vm2, %v2666_v22, %v2650_v42  ;;  %vm10602_vm4 = vmmov %vm10601_vm6  ;;  %vm10603_vm2 = vcmp.lt.s32.totalorder %v10580_v35, 17 }
 0x590   : > { %10597 = vst [vmem:[#allocation80_spill] sm:$0xff] %v8187_v44 }
 0x592   : > { %3239 = vrot.lane.b32.xlu2 %v7906_v26, %s4695_s24 }
 0x593   : > { %3255 = vrot.lane.b32.xlu0 %v7912_v9, %s4695_s24 }
 0x594   : > { %3169 = vrot.lane.b32.xlu1 %v7946_v47, %s4694_s23  ;;  %v2652_v61 = vpop.permute.xlu2 %2651 }
 0x595   : > { %v2730_v62 = vpop.permute.xlu0 %2729 }
 0x596   : > { %v8201_v8 = vsel %vm10599_vm15, %v2714_v16, %v2730_v62  ;;  %v8205_v58 = vsel %vm10600_vm7, %v2730_v62, %v2714_v16  ;;  %v2778_v22 = vpop.permute.xlu1 %2777  ;;  %vm10605_vm15 = vmmov %vm10603_vm2  ;;  %vm10607_vm7 = vcmp.lt.s32.totalorder %v10580_v35, 16 }
 0x597   : > { %v8209_v42 = vsel %vm10601_vm6, %v2778_v22, %v2794_v7  ;;  %v8213_v36 = vsel %vm10602_vm4, %v2794_v7, %v2778_v22  ;;  %vm10608_vm6 = vmmov %vm10607_vm7  ;;  %vm10609_vm4 = vcmp.lt.s32.totalorder %v10580_v35, 15 }
 0x59a   : > { %3253 = vrot.lane.b32.xlu2 %v7923_v32, %s4695_s24 }
 0x59b   : > { %3235 = vrot.lane.b32.xlu0 %v7938_v2, %s4695_s24 }
 0x59c   : > { %3237 = vrot.lane.b32.xlu1 %v7930_v43, %s4695_s24  ;;  %v8221_v62 = vpop.permute.xlu2 %2731 }
 0x59d   : > { %v2524_v16 = vpop.permute.xlu0 %2523 }
 0x59e   : > { %v8225_v53 = vsel %vm10603_vm2, %v2524_v16, %v2540_v52  ;;  %v8229_v7 = vsel %vm10605_vm15, %v2540_v52, %v2524_v16  ;;  %v2588_v22 = vpop.permute.xlu1 %2587  ;;  %vm10610_vm2 = vmmov %vm10609_vm4 }
 0x59f   : > { %10604 = vst [vmem:[#allocation81_spill] sm:$0xff] %v8225_v53 }
 0x5a0   : > { %10606 = vst [vmem:[#allocation82_spill] sm:$0xff] %v8229_v7 }
 0x5a2   : > { %3233 = vrot.lane.b32.xlu2 %v7946_v47, %s4695_s24 }
 0x5a3   : > { %3249 = vrot.lane.b32.xlu0 %v7942_v19, %s4695_s24 }
 0x5a4   : > { %3251 = vrot.lane.b32.xlu1 %v7934_v60, %s4695_s24  ;;  %v8237_v1 = vpop.permute.xlu2 %2589 }
 0x5a5   : > { %v2604_v46 = vpop.permute.xlu0 %2603 }
 0x5a6   : > { %v8241_v6 = vsel %vm10607_vm7, %v2604_v46, %v2588_v22  ;;  %v2668_v51 = vpop.permute.xlu1 %2667  ;;  %v8245_v52 = vsel %vm10608_vm6, %v2588_v22, %v2604_v46  ;;  %vm10613_vm7 = vmmov %vm10605_vm15  ;;  %vm10615_vm6 = vcmp.lt.s32.totalorder %v10580_v35, 127 }
 0x5a7   : > { %v8249_v16 = vsel %vm10609_vm4, %v2652_v61, %v2668_v51  ;;  %v8253_v53 = vsel %vm10610_vm2, %v2668_v51, %v2652_v61  ;;  %vm10616_vm4 = vmmov %vm10615_vm6 }
 0x5a8   : > { %vm10619_vm2 = vmmov %vm10616_vm4 }
 0x5aa   : > { %3247 = vrot.lane.b32.xlu2 %v7950_v20, %s4695_s24 }
 0x5ab   : > { %3229 = vrot.lane.b32.xlu0 %v7847_v45, %s4695_s24 }
 0x5ac   : > { %3231 = vrot.lane.b32.xlu1 %v7954_v56, %s4695_s24  ;;  %v2798_v7 = vpop.permute.xlu2 %2797 }
 0x5ad   : > { %v2780_v46 = vpop.permute.xlu0 %2779 }
 0x5ae   : > { %v2796_v22 = vpop.permute.xlu1 %2795 }
 0x5b2   : > { %3303 = vrot.lane.b32.xlu2 %v7906_v26, %s4696_s25 }
 0x5b3   : > { %3319 = vrot.lane.b32.xlu0 %v7912_v9, %s4696_s25 }
 0x5b4   : > { %3245 = vrot.lane.b32.xlu1 %v7872_v5, %s4695_s24  ;;  %v8267_v51 = vpop.permute.xlu2 %2527 }
 0x5b5   : > { %10611 = vst [vmem:[#allocation83_spill] sm:$0xff] %v8267_v51  ;;  %v2542_v61 = vpop.permute.xlu0 %2541 }
 0x5b6   : > { %v8269_v23 = vpop.permute.xlu1 %2715 }
 0x5ba   : > { %3243 = vrot.lane.b32.xlu2 %v7799_v18, %s4695_s24 }
 0x5bb   : > { %3301 = vrot.lane.b32.xlu0 %v7930_v43, %s4696_s25 }
 0x5bc   : > { %3227 = vrot.lane.b32.xlu1 %v7817_v57, %s4695_s24  ;;  %v8277_v0 = vpop.permute.xlu2 %2607 }
 0x5bd   : > { %v8279_v30 = vpop.permute.xlu0 %2653 }
 0x5be   : > { %v2526_v12 = vpop.permute.xlu1 %2525 }
 0x5bf   : > { %v8283_v51 = vsel %vm10605_vm15, %v2526_v12, %v2542_v61  ;;  %v8287_v11 = vsel %vm10613_vm7, %v2542_v61, %v2526_v12  ;;  %vm10620_vm15 = vmmov %vm10619_vm2 }
 0x5c0   : > { %10612 = vst [vmem:[#allocation84_spill] sm:$0xff] %v8283_v51  ;;  %vm10621_vm7 = vmmov %vm10619_vm2 }
 0x5c1   : > { %10614 = vst [vmem:[#allocation85_spill] sm:$0xff] %v8287_v11 }
 0x5c2   : > { %3225 = vrot.lane.b32.xlu2 %v7777_v49, %s4695_s24 }
 0x5c3   : > { %3241 = vrot.lane.b32.xlu0 %v7780_v21, %s4695_s24 }
 0x5c4   : > { %3317 = vrot.lane.b32.xlu1 %v7923_v32, %s4696_s25  ;;  %v2784_v33 = vpop.permute.xlu2 %2783 }
 0x5c5   : > { %v2718_v14 = vpop.permute.xlu0 %2717 }
 0x5c6   : > { %v8295_v50 = vpop.permute.xlu1 %2605 }
 0x5ca   : > { %3315 = vrot.lane.b32.xlu2 %v7934_v60, %s4696_s25 }
 0x5cb   : > { %3175 = vrot.lane.b32.xlu0 %v7906_v26, %s4694_s23 }
 0x5cc   : > { %3299 = vrot.lane.b32.xlu1 %v7938_v2, %s4696_s25  ;;  %v2720_v12 = vpop.permute.xlu2 %2719 }
 0x5cd   : > { %v8303_v61 = vpop.permute.xlu0 %2591 }
 0x5ce   : > { %v2782_v51 = vpop.permute.xlu1 %2781 }
 0x5cf   : > { %v2807_v15 = vsel %vm10619_vm2, %v2782_v51, %v2798_v7 }
 0x5d2   : > { %3297 = vrot.lane.b32.xlu2 %v7946_v47, %s4696_s25 }
 0x5d3   : > { %3313 = vrot.lane.b32.xlu0 %v7942_v19, %s4696_s25 }
 0x5d4   : > { %3191 = vrot.lane.b32.xlu1 %v7912_v9, %s4694_s23  ;;  %v8311_v11 = vpop.permute.xlu2 %2705  ;;  %v2815_v9 = vsel %vm10620_vm15, %v2798_v7, %v2782_v51 }
 0x5d5   : > { %v2800_v24 = vpop.permute.xlu0 %2799 }
 0x5d6   : > { %v2734_v26 = vpop.permute.xlu1 %2733  ;;  %v2808_v17 = vsel %vm10615_vm6, %v2784_v33, %v2800_v24  ;;  %v2816_v44 = vsel %vm10616_vm4, %v2800_v24, %v2784_v33  ;;  %v2806_v24 = vsel %vm10621_vm7, %v2780_v46, %v2796_v22  ;;  %vm10622_vm6 = vmmov %vm10619_vm2  ;;  %vm10623_vm4 = vcmp.lt.s32.totalorder %v10580_v35, 1 }
 0x5d7   : > { %4353 = vmatpush.msk.msra.mxu3 %vm5182_vm3, %v2808_v17  ;;  %4377 = vmatpush.msk.msra.mxu2 %vm5193_vm5, %v2816_v44  ;;  %v2814_v44 = vsel %vm10622_vm6, %v2796_v22, %v2780_v46  ;;  %vm10624_vm2 = vmmov %vm10623_vm4 }
 0x5d8   : > { %vm10626_vm15 = vmmov %vm10624_vm2 }
 0x5d9   : > { %4354 = vmatpush.msk.msra.mxu3 %vm5182_vm3, %v2807_v15  ;;  %4378 = vmatpush.msk.msra.mxu2 %vm5193_vm5, %v2815_v9  ;;  %vm10628_vm7 = vmmov %vm10622_vm6 }
 0x5da   : > { %3189 = vrot.lane.b32.xlu2 %v7923_v32, %s4694_s23  ;;  %vm10629_vm6 = vmmov %vm10624_vm2 }
 0x5db   : > { %3295 = vrot.lane.b32.xlu0 %v7954_v56, %s4696_s25  ;;  %4355 = vmatpush.msk.msra.mxu3 %vm5182_vm3, %v2806_v24  ;;  %v2743_v51 = vsel %vm10629_vm6, %v2718_v14, %v2734_v26 }
 0x5dc   : > { %3173 = vrot.lane.b32.xlu1 %v7930_v43, %s4694_s23  ;;  %4379 = vmatpush.msk.msra.mxu2 %vm5193_vm5, %v2814_v44  ;;  %v8343_v9 = vpop.permute.xlu2 %2669  ;;  %v4602_v44 = vld [vmem:[%s10060_s1 + $0x98] sm:$0xff] }
 0x5dd   : > { %v2736_v15 = vpop.permute.xlu0 %2735  ;;  %4356 = vmatpush.msk.msra.mxu3 %vm5182_vm3, %v8209_v42  ;;  %v2751_v42 = vsel %vm10626_vm15, %v2734_v26, %v2718_v14  ;;  %v2750_v26 = vsel %vm10624_vm2, %v8221_v62, %v8269_v23  ;;  %vm10631_vm15 = vmmov %vm10624_vm2 }
 0x5de   : > { %v8348_v33 = vpop.permute.xlu1 %2543  ;;  %v2744_v17 = vsel %vm10623_vm4, %v2720_v12, %v2736_v15  ;;  %v2752_v7 = vsel %vm10624_vm2, %v2736_v15, %v2720_v12  ;;  %4380 = vmatpush.msk.msra.mxu2 %vm5193_vm5, %v8213_v36  ;;  %v2803_v36 = vsel %vm10628_vm7, %v8099_v41, %v8097_v27  ;;  %vm10630_vm4 = vmmov %vm10628_vm7 }
 0x5df   : > { %4345 = vmatpush.msk.msra.mxu1 %vm5143_vm0, %v2752_v7  ;;  %4357 = vmatpush.msk.msra.mxu3 %vm5182_vm3, %v8135_v48  ;;  %v2811_v48 = vsel %vm10630_vm4, %v8097_v27, %v8099_v41  ;;  %v2742_v27 = vsel %vm10631_vm15, %v8269_v23, %v8221_v62  ;;  %vm10632_vm7 = vmmov %vm10630_vm4  ;;  %v2801_v12 = vsel %vm10630_vm4, %v8005_v63, %v8041_v29 }
 0x5e0   : > { %4369 = vmatpush.msk.msra.mxu0 %vm5147_vm1, %v2744_v17  ;;  %4381 = vmatpush.msk.msra.mxu2 %vm5193_vm5, %v8139_v37  ;;  %v2802_v41 = vsel %vm10632_vm7, %v8063_v40, %v8037_v3  ;;  %vm10633_vm6 = vmmov %vm10630_vm4 }
 0x5e1   : > { %4346 = vmatpush.msk.msra.mxu1 %vm5143_vm0, %v2751_v42  ;;  %4358 = vmatpush.msk.msra.mxu3 %vm5182_vm3, %v2803_v36  ;;  %v2810_v23 = vsel %vm10633_vm6, %v8037_v3, %v8063_v40  ;;  %vm10634_vm2 = vmmov %vm10630_vm4  ;;  %v4603_v36 = vld [vmem:[%s10060_s1 + $0x80] sm:$0xff] }
 0x5e2   : > { %4370 = vmatpush.msk.msra.mxu0 %vm5147_vm1, %v2743_v51  ;;  %4382 = vmatpush.msk.msra.mxu2 %vm5193_vm5, %v2811_v48  ;;  %v2809_v3 = vsel %vm10634_vm2, %v8041_v29, %v8005_v63  ;;  %v4601_v63 = vld [vmem:[%s10060_s1 + $0x88] sm:$0xff]  ;;  %vm10635_vm7 = vmmov %vm10631_vm15 }
 0x5e3   : > { %3187 = vrot.lane.b32.xlu0 %v7934_v60, %s4694_s23  ;;  %3171 = vrot.lane.b32.xlu2 %v7938_v2, %s4694_s23  ;;  %vm10636_vm6 = vmmov %vm10635_vm7 }
 0x5e4   : > { %3311 = vrot.lane.b32.xlu1 %v7950_v20, %s4696_s25  ;;  %4347 = vmatpush.msk.msra.mxu1 %vm5143_vm0, %v2750_v26  ;;  %v8407_v14 = vpop.permute.xlu2 %3165  ;;  %vm10637_vm4 = vmmov %vm10636_vm6 }
 0x5e5   : > { %4359 = vmatpush.msk.msra.mxu3 %vm5182_vm3, %v2802_v41  ;;  %4371 = vmatpush.msk.msra.mxu0 %vm5147_vm1, %v2742_v27  ;;  %v2708_v37 = vpop.permute.xlu0 %2707  ;;  %vm10638_vm2 = vmmov %vm10637_vm4  ;;  %v10660_v27 = vld [vmem:[#allocation80_spill] sm:$0xff]  ;;  %v10665_v41 = vld [vmem:[#allocation63_spill] sm:$0xff] }
 0x5e6   : > { %4383 = vmatpush.msk.msra.mxu2 %vm5193_vm5, %v2810_v23  ;;  %v2656_v62 = vpop.permute.xlu1 %2655  ;;  %4348 = vmatpush.msk.msra.mxu1 %vm5143_vm0, %v8205_v58  ;;  %v2747_v58 = vsel %vm10631_vm15, %v8073_v13, %v8109_v59  ;;  %vm10639_vm15 = vmmov %vm10638_vm2 }
 0x5e7   : > { %4360 = vmatpush.msk.msra.mxu3 %vm5182_vm3, %v2801_v12  ;;  %4372 = vmatpush.msk.msra.mxu0 %vm5147_vm1, %v8201_v8  ;;  %v2739_v8 = vsel %vm10635_vm7, %v8109_v59, %v8073_v13  ;;  %vm10640_vm7 = vcmp.lt.s32.totalorder %v10580_v35, 16  ;;  %v10669_v12 = vld [vmem:[#allocation71_spill] sm:$0xff] }
 0x5e8   : > { %4384 = vmatpush.msk.msra.mxu2 %vm5193_vm5, %v2809_v3  ;;  %4349 = vmatpush.msk.msra.mxu1 %vm5143_vm0, %v8155_v38  ;;  %v2616_v15 = vsel %vm10640_vm7, %v8303_v61, %v8277_v0  ;;  %v10670_v3 = vld [vmem:[#allocation74_spill] sm:$0xff] }
 0x5e9   : > { %4373 = vmatpush.msk.msra.mxu0 %vm5147_vm1, %v8151_v10  ;;  %4361 = vmatmul.msk.f32.vlgmr.msra.gmra.mxu3 %vm645_vm10, %v4601_v63 }
 0x5ea   : > { %4350 = vmatpush.msk.msra.mxu1 %vm5143_vm0, %v2747_v58  ;;  %4385 = vmatmul.msk.f32.vlgmr.msra.gmra.mxu2 %vm645_vm10, %v4601_v63 }
 0x5eb   : > { %4374 = vmatpush.msk.msra.mxu0 %vm5147_vm1, %v2739_v8  ;;  %3185 = vrot.lane.b32.xlu0 %v7942_v19, %s4694_s23 }
 0x5ec   : > { %3293 = vrot.lane.b32.xlu1 %v7847_v45, %s4696_s25  ;;  %3309 = vrot.lane.b32.xlu2 %v7872_v5, %s4696_s25  ;;  %v8466_v10 = vpop.permute.xlu2 %3239 }
 0x5ed   : > { %v2722_v29 = vpop.permute.xlu0 %2721 }
 0x5ee   : > { %v2724_v40 = vpop.permute.xlu1 %2723  ;;  %v2737_v38 = vsel %vm10638_vm2, %v8311_v11, %v2722_v29  ;;  %v2745_v24 = vsel %vm10639_vm15, %v2722_v29, %v8311_v11  ;;  %v10673_v29 = vld [vmem:[#allocation83_spill] sm:$0xff] }
 0x5ef   : > { %v2738_v13 = vsel %vm10636_vm6, %v2708_v37, %v2724_v40  ;;  %v2746_v59 = vsel %vm10637_vm4, %v2724_v40, %v2708_v37  ;;  %vm10641_vm6 = vmmov %vm10640_vm7  ;;  %vm10642_vm4 = vcmp.ge.s32.totalorder %v10580_v35, 16  ;;  %v10667_v37 = vld [vmem:[#allocation31_spill] sm:$0xff] }
 0x5f0   : > { %4351 = vmatpush.msk.msra.mxu1 %vm5143_vm0, %v2746_v59  ;;  %4375 = vmatpush.msk.msra.mxu0 %vm5147_vm1, %v2738_v13  ;;  %v2624_v17 = vsel %vm10641_vm6, %v8277_v0, %v8303_v61  ;;  %vm10643_vm2 = vmmov %vm10641_vm6  ;;  %vm10646_vm6 = vcmp.lt.s32.totalorder %v10580_v35, 15  ;;  %v4604_v13 = vld [vmem:[%s10060_s1 + $0x90] sm:$0xff] }
 0x5f1   : > { %4362 = vmatmul.msk.f32.gmra.mxu3 %vm645_vm10, %v4602_v44  ;;  %v2623_v11 = vsel %vm10643_vm2, %v8295_v50, %v8237_v1  ;;  %vm10644_vm15 = vmmov %vm10642_vm4 }
 0x5f2   : > { %4352 = vmatpush.msk.msra.mxu1 %vm5143_vm0, %v2745_v24  ;;  %4376 = vmatpush.msk.msra.mxu0 %vm5147_vm1, %v2737_v38  ;;  %vm10645_vm7 = vmmov %vm10643_vm2  ;;  %v4605_v38 = vld [vmem:[%s4734_s17] sm:$0xff]  ;;  %v10675_v24 = vld [vmem:[#allocation25_spill] sm:$0xff] }
 0x5f3   : > { %3183 = vrot.lane.b32.xlu0 %v7950_v20, %s4694_s23  ;;  %v2615_v61 = vsel %vm10645_vm7, %v8237_v1, %v8295_v50  ;;  %2849 = vmatmul.f32.vlgmr.msra.gmra.mxu1 %v4603_v36  ;;  %vm10648_vm2 = vmmov %vm10644_vm15  ;;  %v4608_v50 = vld [vmem:[%s4734_s17 + $0x10] sm:$0xff] }
 0x5f4   : > { %4393 = vmatpush.msk.msrb.mxu1 %vm10642_vm4, %v2624_v17  ;;  %3079 = vmatpush.msrb.mxu0 %v2616_v15  ;;  %v8508_v0 = vpop.permute.xlu2 %3253  ;;  %vm10647_vm4 = vmmov %vm10646_vm6 }
 0x5f5   : > { %3291 = vrot.lane.b32.xlu1 %v7817_v57, %s4696_s25  ;;  %3307 = vrot.lane.b32.xlu2 %v7799_v18, %s4696_s25  ;;  %v8518_v7 = vpop.permute.xlu0 %3161  ;;  %vm10651_vm7 = vmmov %vm10648_vm2 }
 0x5f6   : > { %4394 = vmatpush.msk.msrb.mxu1 %vm10644_vm15, %v2623_v11  ;;  %3080 = vmatpush.msrb.mxu0 %v2615_v61  ;;  %v2672_v42 = vpop.permute.xlu1 %2671  ;;  %vm10650_vm15 = vmmov %vm10647_vm4  ;;  %v10678_v61 = vld [vmem:[#allocation69_spill] sm:$0xff] }
 0x5f7   : > { %v2680_v51 = vsel %vm10646_vm6, %v2656_v62, %v2672_v42  ;;  %v2688_v48 = vsel %vm10647_vm4, %v2672_v42, %v2656_v62  ;;  %2931 = vmatmul.f32.vlgmr.msra.gmra.mxu0 %v4603_v36  ;;  %v2687_v1 = vsel %vm10650_vm15, %v8343_v9, %v8279_v30  ;;  %vm10652_vm6 = vcmp.lt.s32.totalorder %v10580_v35, 16  ;;  %4386 = vmatmul.msk.f32.gmra.mxu2 %vm645_vm10, %v4602_v44 }
 0x5f8   : > { %4395 = vmatpush.msk.msrb.mxu1 %vm10648_vm2, %v8241_v6  ;;  %3081 = vmatpush.msrb.mxu0 %v8245_v52  ;;  %v2620_v6 = vsel %vm10652_vm6, %v8141_v4, %v8085_v31  ;;  %v2679_v52 = vsel %vm10647_vm4, %v8279_v30, %v8343_v9  ;;  %vm10653_vm15 = vmmov %vm10652_vm6  ;;  %v10658_v9 = vld [vmem:[#allocation64_spill] sm:$0xff]  ;;  %v8647_v44 = vadd.f32 %v4605_v38, %v10675_v24  ;;  %v4611_v38 = vld [vmem:[%s10060_s1 + $0xb8] sm:$0xff] }
 0x5f9   : > { %4409 = vmatpush.msk.msrb.mxu3 %vm5538_vm11, %v2688_v48  ;;  %4433 = vmatpush.msk.msrb.mxu2 %vm5193_vm5, %v2680_v51  ;;  %v4606_v51 = vld [vmem:[%s10060_s1 + $0xa8] sm:$0xff]  ;;  %v10682_v48 = vld [vmem:[#allocation85_spill] sm:$0xff] }
 0x5fa   : > { %4396 = vmatpush.msk.msrb.mxu1 %vm10651_vm7, %v8165_v39  ;;  %3082 = vmatpush.msrb.mxu0 %v8169_v25  ;;  %v2612_v39 = vsel %vm10653_vm15, %v8085_v31, %v8141_v4  ;;  %vm10654_vm7 = vmmov %vm10652_vm6  ;;  %v10699_v24 = vld [vmem:[#allocation73_spill] sm:$0xff] }
 0x5fb   : > { %4410 = vmatpush.msk.msrb.mxu3 %vm5538_vm11, %v2687_v1  ;;  %4434 = vmatpush.msk.msrb.mxu2 %vm5193_vm5, %v2679_v52  ;;  %v2619_v31 = vsel %vm10654_vm7, %v8089_v55, %v8075_v54  ;;  %vm10655_vm6 = vmmov %vm10648_vm2  ;;  %v10683_v1 = vld [vmem:[#allocation84_spill] sm:$0xff]  ;;  %v10685_v52 = vld [vmem:[#allocation61_spill] sm:$0xff] }
 0x5fc   : > { %4397 = vmatpush.msk.msrb.mxu1 %vm10648_vm2, %v2620_v6  ;;  %3083 = vmatpush.msrb.mxu0 %v2612_v39  ;;  %v8563_v30 = vpop.permute.xlu2 %3233  ;;  %vm10656_vm4 = vmmov %vm10654_vm7  ;;  %v10684_v6 = vld [vmem:[#allocation62_spill] sm:$0xff] }
 0x5fd   : > { %3289 = vrot.lane.b32.xlu1 %v7777_v49, %s4696_s25  ;;  %3181 = vrot.lane.b32.xlu0 %v7872_v5, %s4694_s23  ;;  %v8569_v25 = vpop.permute.xlu0 %3167  ;;  %vm10659_vm2 = vmmov %vm10656_vm4 }
 0x5fe   : > { %3305 = vrot.lane.b32.xlu2 %v7780_v21, %s4696_s25  ;;  %4411 = vmatpush.msk.msrb.mxu3 %vm5538_vm11, %v8253_v53  ;;  %v8581_v4 = vpop.permute.xlu1 %3163  ;;  %v2611_v53 = vsel %vm10656_vm4, %v8075_v54, %v8089_v55  ;;  %vm10661_vm15 = vmmov %vm10655_vm6  ;;  %v10663_v55 = vld [vmem:[#allocation76_spill] sm:$0xff] }
 0x5ff   : > { %4435 = vmatpush.msk.msrb.mxu2 %vm5193_vm5, %v8249_v16  ;;  %4398 = vmatpush.msk.msrb.mxu1 %vm10655_vm6, %v2619_v31  ;;  %v10657_v16 = vld [vmem:[#allocation70_spill] sm:$0xff]  ;;  %vm10662_vm7 = vmmov %vm10659_vm2 }
 0x600   : > { %3084 = vmatpush.msrb.mxu0 %v2611_v53  ;;  %4412 = vmatpush.msk.msrb.mxu3 %vm5538_vm11, %v8191_v34  ;;  %v2618_v26 = vsel %vm10659_vm2, %v10658_v9, %v10657_v16  ;;  %v2610_v54 = vsel %vm10662_vm7, %v10657_v16, %v10658_v9  ;;  %v10664_v34 = vld [vmem:[#allocation67_spill] sm:$0xff]  ;;  %vm10666_vm6 = vmmov %vm10659_vm2  ;;  %v10688_v16 = vld [vmem:[#allocation82_spill] sm:$0xff] }
 0x601   : > { %4436 = vmatpush.msk.msrb.mxu2 %vm5193_vm5, %v10660_v27  ;;  %4399 = vmatpush.msk.msrb.mxu1 %vm10661_vm15, %v2618_v26  ;;  %v2617_v23 = vsel %vm10666_vm6, %v10665_v41, %v10664_v34  ;;  %vm10668_vm4 = vmmov %vm10661_vm15  ;;  %v2609_v62 = vsel %vm10659_vm2, %v10664_v34, %v10665_v41  ;;  %vm10671_vm15 = vcmp.lt.s32.totalorder %v10580_v35, 15  ;;  %vm10674_vm6 = vcmp.lt.s32.totalorder %v10580_v35, 17  ;;  %v10689_v9 = vld [vmem:[#allocation81_spill] sm:$0xff]  ;;  %v4607_v27 = vld [vmem:[%s4734_s17 + $0x30] sm:$0xff] }
 0x602   : > { %3085 = vmatpush.msrb.mxu0 %v2610_v54  ;;  %4413 = vmatpush.msk.msrb.mxu3 %vm5538_vm11, %v10663_v55  ;;  %v2683_v58 = vsel %vm10671_vm15, %v10670_v3, %v10669_v12  ;;  %vm10672_vm7 = vmmov %vm10671_vm15  ;;  %v2560_v40 = vsel %vm10674_vm6, %v8348_v33, %v10673_v29  ;;  %v10690_v54 = vld [vmem:[#allocation28_spill] sm:$0xff]  ;;  %v10691_v34 = vld [vmem:[#allocation29_spill] sm:$0xff] }
 0x603   : > { %4437 = vmatpush.msk.msrb.mxu2 %vm5193_vm5, %v10667_v37  ;;  %4400 = vmatpush.msk.msrb.mxu1 %vm10668_vm4, %v2617_v23  ;;  %v2675_v63 = vsel %vm10672_vm7, %v10669_v12, %v10670_v3  ;;  %vm10676_vm4 = vmmov %vm10674_vm6  ;;  %v8710_v55 = vadd.f32 %v4607_v27, %v10690_v54  ;;  %v8714_v47 = vadd.f32 %v4608_v50, %v10691_v34  ;;  %v4609_v41 = vld [vmem:[%s10060_s1 + $0xa0] sm:$0xff]  ;;  %v10692_v37 = vld [vmem:[#allocation79_spill] sm:$0xff] }
 0x604   : > { %3086 = vmatpush.msrb.mxu0 %v2609_v62  ;;  %4414 = vmatpush.msk.msrb.mxu3 %vm5538_vm11, %v2683_v58  ;;  %v8632_v8 = vpop.permute.xlu2 %3247  ;;  %v2552_v15 = vsel %vm10676_vm4, %v10673_v29, %v8348_v33  ;;  %v10679_v33 = vld [vmem:[#allocation72_spill] sm:$0xff]  ;;  %vm10680_vm2 = vmmov %vm10672_vm7  ;;  %v10693_v62 = vld [vmem:[#allocation78_spill] sm:$0xff] }
 0x605   : > { %4438 = vmatpush.msk.msrb.mxu2 %vm5193_vm5, %v2675_v63  ;;  %2852 = vmatmul.f32.gmra.mxu1 %v4604_v13  ;;  %v8643_v59 = vpop.permute.xlu0 %3255  ;;  %v2682_v42 = vsel %vm10680_vm2, %v10679_v33, %v10678_v61  ;;  %vm10681_vm15 = vmmov %vm10680_vm2  ;;  %v4610_v12 = vld [vmem:[%s4734_s17 + $0x20] sm:$0xff]  ;;  %v10694_v3 = vld [vmem:[#allocation27_spill] sm:$0xff] }
 0x606   : > { %2934 = vmatmul.f32.gmra.mxu0 %v4604_v13  ;;  %4401 = vmatpush.msk.msrb.mxu1 %vm5694_vm12, %v2560_v40  ;;  %v8655_v11 = vpop.permute.xlu1 %3169  ;;  %v2674_v36 = vsel %vm10681_vm15, %v10678_v61, %v10679_v33  ;;  %vm10686_vm7 = vmmov %vm10680_vm2  ;;  %v8727_v58 = vadd.f32 %v4610_v12, %v10694_v3  ;;  %v10695_v63 = vld [vmem:[#allocation77_spill] sm:$0xff]  ;;  %v10696_v29 = vld [vmem:[#allocation75_spill] sm:$0xff]  ;;  %v3264_v34 = vsel %vm1119_vm14, %v8466_v10, %v8643_v59 }
 0x607   : > { %4425 = vmatpush.msk.msrb.mxu0 %vm5147_vm1, %v2552_v15  ;;  %3179 = vrot.lane.b32.xlu1 %v7799_v18, %s4694_s23  ;;  %v2681_v39 = vsel %vm10686_vm7, %v10685_v52, %v10684_v6  ;;  %vm10687_vm6 = vmmov %vm10680_vm2  ;;  %v10700_v15 = vld [vmem:[#allocation68_spill] sm:$0xff]  ;;  %v4613_v27 = vld [vmem:[%s4734_s17 + $0x40] sm:$0xff]  ;;  %v8811_v17 = vsel %vm1119_vm14, %v8643_v59, %v8466_v10 }
 0x608   : > { %3649 = vrot.lane.b32.xlu0 %v8647_v44, %s4692_s21  ;;  %3177 = vrot.lane.b32.xlu2 %v7780_v21, %s4694_s23  ;;  %v2673_v31 = vsel %vm10687_vm6, %v10684_v6, %v10685_v52  ;;  %v2555_v61 = vsel %vm10676_vm4, %v10700_v15, %v10699_v24  ;;  %vm10701_vm2 = vmmov %vm10676_vm4  ;;  %v10706_v52 = vld [vmem:[#allocation60_spill] sm:$0xff] }
 0x609   : > { %4415 = vmatpush.msk.msrb.mxu3 %vm5538_vm11, %v2682_v42  ;;  %4439 = vmatpush.msk.msrb.mxu2 %vm5193_vm5, %v2674_v36  ;;  %v2547_v33 = vsel %vm10701_vm2, %v10699_v24, %v10700_v15  ;;  %v10702_v42 = vld [vmem:[#allocation11_spill] sm:$0xff]  ;;  %v10703_v36 = vld [vmem:[#allocation65_spill] sm:$0xff]  ;;  %vm10704_vm15 = vmmov %vm10701_vm2 }
 0x60a   : > { %4363 = vmatmul.msk.f32.gmra.mxu3 %vm645_vm10, %v4606_v51  ;;  %4387 = vmatmul.msk.f32.gmra.mxu2 %vm645_vm10, %v4606_v51  ;;  %v2554_v51 = vsel %vm10704_vm15, %v10703_v36, %v10702_v42  ;;  %vm10705_vm7 = vmmov %vm10701_vm2  ;;  %v10709_v54 = vld [vmem:[#allocation44_spill] sm:$0xff]  ;;  %v4617_v15 = vld [vmem:[%s10060_s1 + $0xc0] sm:$0xff] }
 0x60b   : > { %4402 = vmatpush.msk.msrb.mxu1 %vm5694_vm12, %v10682_v48  ;;  %4426 = vmatpush.msk.msrb.mxu0 %vm5147_vm1, %v10683_v1  ;;  %v2546_v1 = vsel %vm10705_vm7, %v10702_v42, %v10703_v36  ;;  %vm10708_vm6 = vmmov %vm10701_vm2  ;;  %v8787_v50 = vadd.f32 %v4613_v27, %v10709_v54  ;;  %v4615_v3 = vld [vmem:[%s4734_s17 + $0x50] sm:$0xff]  ;;  %v10714_v42 = vld [vmem:[#allocation38_spill] sm:$0xff] }
 0x60c   : > { %4416 = vmatpush.msk.msrb.mxu3 %vm5538_vm11, %v2681_v39  ;;  %4440 = vmatpush.msk.msrb.mxu2 %vm5193_vm5, %v2673_v31  ;;  %v8700_v53 = vpop.permute.xlu2 %3303  ;;  %vm10697_vm5 = vmmov %vm10676_vm4  ;;  %v10707_v39 = vld [vmem:[#allocation46_spill] sm:$0xff]  ;;  %v4622_v54 = vld [vmem:[%s10060_s1 + $0xd0] sm:$0xff] }
 0x60d   : > { %4403 = vmatpush.msk.msrb.mxu1 %vm5694_vm12, %v10688_v16  ;;  %4427 = vmatpush.msk.msrb.mxu0 %vm5147_vm1, %v10689_v9  ;;  %v3236_v26 = vpop.permute.xlu0 %3235  ;;  %v2556_v40 = vsel %vm10697_vm5, %v10696_v29, %v10695_v63  ;;  %vm10698_vm11 = vmmov %vm10676_vm4  ;;  %v2553_v31 = vsel %vm10708_vm6, %v10707_v39, %v10706_v52  ;;  %v4612_v16 = vld [vmem:[%s10060_s1 + $0xb0] sm:$0xff] }
 0x60e   : > { %2855 = vmatmul.f32.gmra.mxu1 %v4609_v41  ;;  %2937 = vmatmul.f32.gmra.mxu0 %v4609_v41  ;;  %v3238_v23 = vpop.permute.xlu1 %3237  ;;  %v2548_v13 = vsel %vm10698_vm11, %v10695_v63, %v10696_v29  ;;  %vm10710_vm5 = vmmov %vm10701_vm2  ;;  %v10712_v63 = vld [vmem:[#allocation42_spill] sm:$0xff] }
 0x60f   : > { %4404 = vmatpush.msk.msrb.mxu1 %vm5694_vm12, %v10692_v37  ;;  %4428 = vmatpush.msk.msrb.mxu0 %vm5147_vm1, %v10693_v62  ;;  %v2545_v41 = vsel %vm10710_vm5, %v10706_v52, %v10707_v39  ;;  %v4614_v37 = vld [vmem:[%s4734_s17 + $0x60] sm:$0xff]  ;;  %v10711_v62 = vld [vmem:[#allocation40_spill] sm:$0xff]  ;;  %v8805_v29 = vadd.f32 %v4615_v3, %v10712_v63  ;;  %v3263_v22 = vsel %vm1119_vm14, %v3238_v23, %v8508_v0  ;;  %v4620_v52 = vld [vmem:[%s4734_s17 + $0x8] sm:$0xff]  ;;  %vm10732_vm5 = vcmp.lt.s32.totalorder %v10580_v35, 113 }
 0x610   : > { %3651 = vrot.lane.b32.xlu1 %v8714_v47, %s4692_s21  ;;  %3655 = vrot.lane.b32.xlu0 %v8710_v55, %s4692_s21  ;;  %v8801_v12 = vadd.f32 %v4614_v37, %v10711_v62  ;;  %v10716_v39 = vld [vmem:[#allocation18_spill] sm:$0xff]  ;;  %v4623_v62 = vld [vmem:[%s4734_s17 + $0x28] sm:$0xff]  ;;  %v10719_v3 = vld [vmem:[#allocation24_spill] sm:$0xff] }
 0x611   : > { %4405 = vmatpush.msk.msrb.mxu1 %vm5694_vm12, %v2556_v40  ;;  %4429 = vmatpush.msk.msrb.mxu0 %vm5147_vm1, %v2548_v13  ;;  %v8818_v40 = vsel %vm1119_vm14, %v8508_v0, %v3238_v23  ;;  %v10713_v13 = vld [vmem:[#allocation32_spill] sm:$0xff]  ;;  %v8914_v63 = vadd.f32 %v4623_v62, %v10719_v3  ;;  %v10724_v62 = vld [vmem:[#allocation39_spill] sm:$0xff] }
 0x612   : > { %3653 = vrot.lane.b32.xlu2 %v8727_v58, %s4692_s21  ;;  %4364 = vmatmul.msk.f32.gmra.mxu3 %vm645_vm10, %v4611_v38 }
 0x613   : > { %4388 = vmatmul.msk.f32.gmra.mxu2 %vm645_vm10, %v4611_v38  ;;  %4406 = vmatpush.msk.msrb.mxu1 %vm5694_vm12, %v2555_v61  ;;  %v4616_v38 = vld [vmem:[%s10060_s1 + $0xc8] sm:$0xff] }
 0x614   : > { %4430 = vmatpush.msk.msrb.mxu0 %vm5147_vm1, %v2547_v33  ;;  %v8768_v48 = vpop.permute.xlu2 %3243  ;;  %v4618_v33 = vld [vmem:[%s4734_s17 + $0x70] sm:$0xff] }
 0x615   : > { %4407 = vmatpush.msk.msrb.mxu1 %vm5694_vm12, %v2554_v51  ;;  %v3250_v6 = vpop.permute.xlu0 %3249  ;;  %v8864_v36 = vadd.f32 %v4618_v33, %v10714_v42  ;;  %v10722_v33 = vld [vmem:[#allocation2_spill] sm:$0xff] }
 0x616   : > { %4431 = vmatpush.msk.msrb.mxu0 %vm5147_vm1, %v2546_v1  ;;  %2858 = vmatmul.f32.gmra.mxu1 %v4612_v16  ;;  %v3252_v9 = vpop.permute.xlu1 %3251  ;;  %v8854_v23 = vsel %vm1119_vm14, %v3250_v6, %v8563_v30  ;;  %v3261_v24 = vsel %vm1119_vm14, %v8563_v30, %v3250_v6  ;;  %v4619_v30 = vld [vmem:[%s4734_s17 + $0x18] sm:$0xff]  ;;  %v10715_v1 = vld [vmem:[#allocation26_spill] sm:$0xff] }
 0x617   : > { %4408 = vmatpush.msk.msrb.mxu1 %vm5694_vm12, %v2553_v31  ;;  %2940 = vmatmul.f32.gmra.mxu0 %v4612_v16  ;;  %v8834_v10 = vsel %vm1119_vm14, %v3252_v9, %v3236_v26  ;;  %v3262_v59 = vsel %vm1119_vm14, %v3236_v26, %v3252_v9  ;;  %v8874_v6 = vadd.f32 %v4619_v30, %v10715_v1  ;;  %v4627_v1 = vld [vmem:[%s10060_s1 + $0xe0] sm:$0xff] }
 0x618   : > { %4432 = vmatpush.msk.msrb.mxu0 %vm5147_vm1, %v2545_v41  ;;  %3657 = vrot.lane.b32.xlu1 %v8787_v50, %s4692_s21  ;;  %v8878_v31 = vadd.f32 %v4620_v52, %v10716_v39  ;;  %vm10717_vm1 = vcmp.lt.s32.totalorder %v10580_v35, 111  ;;  %v4628_v39 = vld [vmem:[%s4734_s17 + $0x58] sm:$0xff] }
 0x619   : > { %3353 = vmatpush.msra.mxu1 %v3264_v34  ;;  %3661 = vrot.lane.b32.xlu0 %v8801_v12, %s4692_s21  ;;  %vm10718_vm12 = vmmov %vm10717_vm1 }
 0x61a   : > { %4473 = vmatpush.msk.msra.mxu0 %vm303_vm13, %v8811_v17  ;;  %3659 = vrot.lane.b32.xlu2 %v8805_v29, %s4692_s21  ;;  %vm10726_vm11 = vmmov %vm10717_vm1 }
 0x61b   : > { %3354 = vmatpush.msra.mxu1 %v3263_v22  ;;  %4365 = vmatmul.msk.f32.gmra.mxu3 %vm645_vm10, %v4616_v38  ;;  %vm10727_vm4 = vmmov %vm10717_vm1 }
 0x61c   : > { %4474 = vmatpush.msk.msra.mxu0 %vm303_vm13, %v8818_v40  ;;  %4389 = vmatmul.msk.f32.gmra.mxu2 %vm645_vm10, %v4616_v38  ;;  %v8846_v0 = vpop.permute.xlu2 %3225  ;;  %vm10728_vm2 = vmmov %vm10717_vm1  ;;  %v4653_v38 = vld [vmem:[%s10060_s1 + $0x128] sm:$0xff] }
 0x61d   : > { %3355 = vmatpush.msra.mxu1 %v3262_v59  ;;  %v3230_v26 = vpop.permute.xlu0 %3229  ;;  %vm10729_vm15 = vmmov %vm10717_vm1 }
 0x61e   : > { %4475 = vmatpush.msk.msra.mxu0 %vm303_vm13, %v8834_v10  ;;  %2861 = vmatmul.f32.gmra.mxu1 %v4617_v15  ;;  %v3232_v61 = vpop.permute.xlu1 %3231  ;;  %vm10730_vm7 = vmmov %vm10717_vm1 }
 0x61f   : > { %3356 = vmatpush.msra.mxu1 %v3261_v24  ;;  %v3260_v51 = vsel %vm1119_vm14, %v3232_v61, %v8632_v8  ;;  %2943 = vmatmul.f32.gmra.mxu0 %v4617_v15  ;;  %v8883_v16 = vsel %vm1119_vm14, %v8632_v8, %v3232_v61  ;;  %v4621_v8 = vld [vmem:[%s10060_s1 + $0xd8] sm:$0xff]  ;;  %vm10731_vm6 = vmmov %vm10717_vm1 }
 0x620   : > { %4476 = vmatpush.msk.msra.mxu0 %vm303_vm13, %v8854_v23  ;;  %3663 = vrot.lane.b32.xlu1 %v8864_v36, %s4692_s21  ;;  %v10721_v24 = vld [vmem:[#allocation45_spill] sm:$0xff] }
 0x621   : > { %3357 = vmatpush.msra.mxu1 %v3260_v51  ;;  %3667 = vrot.lane.b32.xlu0 %v8874_v6, %s4692_s21  ;;  %v4625_v61 = vld [vmem:[%s4734_s17 + $0x38] sm:$0xff] }
 0x622   : > { %3665 = vrot.lane.b32.xlu2 %v8878_v31, %s4692_s21  ;;  %4477 = vmatpush.msk.msra.mxu0 %vm303_vm13, %v8883_v16  ;;  %v8933_v42 = vadd.f32 %v4625_v61, %v10722_v33 }
 0x623   : > { %4366 = vmatmul.msk.f32.gmra.mxu3 %vm645_vm10, %v4621_v8 }
 0x624   : > { %4390 = vmatmul.msk.f32.gmra.mxu2 %vm645_vm10, %v4621_v8  ;;  %v8899_v9 = vpop.permute.xlu2 %3315  ;;  %v10723_v8 = vld [vmem:[#allocation43_spill] sm:$0xff] }
 0x625   : > { %v3320_v27 = vpop.permute.xlu0 %3319 }
 0x626   : > { %2864 = vmatmul.f32.gmra.mxu1 %v4622_v54  ;;  %v3246_v34 = vpop.permute.xlu1 %3245  ;;  %v3328_v41 = vsel %vm10717_vm1, %v8700_v53, %v3320_v27  ;;  %v8910_v37 = vsel %vm10718_vm12, %v3320_v27, %v8700_v53  ;;  %v4624_v53 = vld [vmem:[%s4734_s17 + $0x48] sm:$0xff]  ;;  %v8954_v27 = vadd.f32 %v4628_v39, %v10723_v8  ;;  %vm10733_vm1 = vmmov %vm10732_vm5 }
 0x627   : > { %v8918_v22 = vsel %vm1119_vm14, %v3246_v34, %v3230_v26  ;;  %v3259_v59 = vsel %vm1119_vm14, %v3230_v26, %v3246_v34  ;;  %4457 = vmatpush.msk.msra.mxu3 %vm5182_vm3, %v3328_v41  ;;  %4489 = vmatpush.msk.msra.mxu2 %vm5904_vm8, %v8910_v37  ;;  %v8929_v15 = vadd.f32 %v4624_v53, %v10721_v24  ;;  %v4626_v26 = vld [vmem:[%s10060_s1 + $0xe8] sm:$0xff]  ;;  %v4629_v41 = vld [vmem:[%s4734_s17 + $0x78] sm:$0xff]  ;;  %vm10735_vm12 = vmmov %vm10733_vm1 }
 0x628   : > { %2946 = vmatmul.f32.gmra.mxu0 %v4622_v54  ;;  %3358 = vmatpush.msra.mxu1 %v3259_v59  ;;  %v8966_v3 = vadd.f32 %v4629_v41, %v10724_v62  ;;  %v4630_v59 = vld [vmem:[%s4734_s17 + $0x68] sm:$0xff]  ;;  %v10725_v53 = vld [vmem:[#allocation41_spill] sm:$0xff]  ;;  %v4634_v62 = vld [vmem:[%s10060_s1] sm:$0xff] }
 0x629   : > { %3669 = vrot.lane.b32.xlu1 %v8914_v63, %s4692_s21  ;;  %4478 = vmatpush.msk.msra.mxu0 %vm303_vm13, %v8918_v22  ;;  %v8970_v24 = vadd.f32 %v4630_v59, %v10725_v53 }
 0x62a   : > { %3673 = vrot.lane.b32.xlu0 %v8929_v15, %s4692_s21  ;;  %3671 = vrot.lane.b32.xlu2 %v8933_v42, %s4692_s21 }
 0x62b   : > { %4367 = vmatmul.msk.f32.gmra.mxu3 %vm645_vm10, %v4626_v26 }
 0x62c   : > { %4391 = vmatmul.msk.f32.gmra.mxu2 %vm645_vm10, %v4626_v26  ;;  %v3298_v51 = vpop.permute.xlu2 %3297  ;;  %v4632_v26 = vld [vmem:[%s10060_s1 + $0xf0] sm:$0xff] }
 0x62d   : > { %v3302_v30 = vpop.permute.xlu0 %3301 }
 0x62e   : > { %2867 = vmatmul.f32.gmra.mxu1 %v4627_v1  ;;  %v3228_v52 = vpop.permute.xlu1 %3227 }
 0x62f   : > { %v8959_v54 = vsel %vm1119_vm14, %v8768_v48, %v3228_v52  ;;  %v3258_v34 = vsel %vm1119_vm14, %v3228_v52, %v8768_v48  ;;  %v4631_v48 = vld [vmem:[%s10060_s1 + $0xf8] sm:$0xff] }
 0x630   : > { %2949 = vmatmul.f32.gmra.mxu0 %v4627_v1  ;;  %3359 = vmatpush.msra.mxu1 %v3258_v34 }
 0x631   : > { %3675 = vrot.lane.b32.xlu1 %v8954_v27, %s4692_s21  ;;  %4479 = vmatpush.msk.msra.mxu0 %vm303_vm13, %v8959_v54 }
 0x632   : > { %3679 = vrot.lane.b32.xlu0 %v8966_v3, %s4692_s21  ;;  %3677 = vrot.lane.b32.xlu2 %v8970_v24, %s4692_s21 }
 0x633   : > { %4368 = vmatmul.msk.f32.gmra.mxu3 %vm645_vm10, %v4631_v48 }
 0x634   : > { %4392 = vmatmul.msk.f32.gmra.mxu2 %vm645_vm10, %v4631_v48  ;;  %v3190_v61 = vpop.permute.xlu2 %3189 }
 0x635   : > { %v3242_v33 = vpop.permute.xlu0 %3241 }
 0x636   : > { %2870 = vmatmul.f32.gmra.mxu1 %v4632_v26  ;;  %v3318_v1 = vpop.permute.xlu1 %3317  ;;  %v8992_v52 = vsel %vm1119_vm14, %v3242_v33, %v8846_v0  ;;  %v3257_v39 = vsel %vm1119_vm14, %v8846_v0, %v3242_v33  ;;  %v4633_v0 = vld [vmem:[%s10060_s1 + $0x8] sm:$0xff]  ;;  %v4635_v33 = vld [vmem:[%s10060_s1 + $0x18] sm:$0xff] }
 0x637   : > { %v3327_v8 = vsel %vm10726_vm11, %v3302_v30, %v3318_v1  ;;  %v9001_v34 = vsel %vm10727_vm4, %v3318_v1, %v3302_v30  ;;  %3360 = vmatpush.msra.mxu1 %v3257_v39  ;;  %4480 = vmatpush.msk.msra.mxu0 %vm303_vm13, %v8992_v52  ;;  %vm10736_vm11 = vmmov %vm10733_vm1 }
 0x638   : > { %2952 = vmatmul.f32.gmra.mxu0 %v4632_v26  ;;  %4458 = vmatpush.msk.msra.mxu3 %vm5182_vm3, %v3327_v8  ;;  %vm10737_vm4 = vmmov %vm10733_vm1 }
 0x639   : > { %4490 = vmatpush.msk.msra.mxu2 %vm5904_vm8, %v9001_v34 }
 0x63b   : > { %4417 = vmatmul.msk.f32.vlgmr.msrb.gmra.mxu3 %vm645_vm10, %v4633_v0 }
 0x63c   : > { %4441 = vmatmul.msk.f32.vlgmr.msrb.gmra.mxu2 %vm645_vm10, %v4633_v0 }
 0x63d   : > { %v3176_v30 = vpop.permute.xlu0 %3175  ;;  %v3172_v41 = vpop.permute.xlu2 %3171 }
 0x63e   : > { %3013 = vmatmul.f32.vlgmr.msrb.gmra.mxu1 %v4634_v62  ;;  %v3300_v59 = vpop.permute.xlu1 %3299 }
 0x63f   : > { %v3326_v53 = vsel %vm10728_vm2, %v3300_v59, %v8899_v9  ;;  %v9025_v48 = vsel %vm10729_vm15, %v8899_v9, %v3300_v59  ;;  %v4636_v9 = vld [vmem:[%s10060_s1 + $0x10] sm:$0xff]  ;;  %vm10738_vm2 = vmmov %vm10733_vm1 }
 0x640   : > { %3095 = vmatmul.f32.vlgmr.msrb.gmra.mxu0 %v4634_v62  ;;  %4459 = vmatpush.msk.msra.mxu3 %vm5182_vm3, %v3326_v53  ;;  %vm10739_vm15 = vmmov %vm10731_vm6 }
 0x641   : > { %4491 = vmatpush.msk.msra.mxu2 %vm5904_vm8, %v9025_v48 }
 0x643   : > { %4418 = vmatmul.msk.f32.gmra.mxu3 %vm645_vm10, %v4635_v33 }
 0x644   : > { %4442 = vmatmul.msk.f32.gmra.mxu2 %vm645_vm10, %v4635_v33  ;;  %v4638_v33 = vld [vmem:[%s10060_s1 + $0x20] sm:$0xff] }
 0x645   : > { %v3314_v26 = vpop.permute.xlu0 %3313 }
 0x646   : > { %3016 = vmatmul.f32.gmra.mxu1 %v4636_v9  ;;  %v3192_v1 = vpop.permute.xlu1 %3191  ;;  %v3325_v39 = vsel %vm10730_vm7, %v3298_v51, %v3314_v26  ;;  %v9044_v8 = vsel %vm10731_vm6, %v3314_v26, %v3298_v51  ;;  %v3310_v0 = vpop.permute.xlu2 %3309  ;;  %vm10740_vm7 = vmmov %vm10731_vm6 }
 0x647   : > { %v3200_v62 = vsel %vm10732_vm5, %v3176_v30, %v3192_v1  ;;  %v9050_v59 = vsel %vm10733_vm1, %v3192_v1, %v3176_v30  ;;  %4460 = vmatpush.msk.msra.mxu3 %vm5182_vm3, %v3325_v39  ;;  %4492 = vmatpush.msk.msra.mxu2 %vm5904_vm8, %v9044_v8  ;;  %v4637_v30 = vld [vmem:[%s10060_s1 + $0x28] sm:$0xff]  ;;  %vm10741_vm6 = vmmov %vm10733_vm1 }
 0x648   : > { %3098 = vmatmul.f32.gmra.mxu0 %v4636_v9  ;;  %4449 = vmatpush.msk.msra.mxu1 %vm5143_vm0, %v3200_v62  ;;  %v4639_v62 = vld [vmem:[%s10060_s1 + $0x38] sm:$0xff]  ;;  %vm10742_vm5 = vmmov %vm10733_vm1 }
 0x649   : > { %4481 = vmatpush.msk.msra.mxu0 %vm5958_vm9, %v9050_v59  ;;  %vm10743_vm1 = vmmov %vm10740_vm7 }
 0x64b   : > { %4419 = vmatmul.msk.f32.gmra.mxu3 %vm645_vm10, %v4637_v30 }
 0x64c   : > { %4443 = vmatmul.msk.f32.gmra.mxu2 %vm645_vm10, %v4637_v30 }
 0x64d   : > { %v3296_v53 = vpop.permute.xlu0 %3295 }
 0x64e   : > { %3019 = vmatmul.f32.gmra.mxu1 %v4638_v33  ;;  %v3174_v26 = vpop.permute.xlu1 %3173 }
 0x64f   : > { %v3199_v9 = vsel %vm10735_vm12, %v3174_v26, %v3190_v61  ;;  %v9074_v1 = vsel %vm10736_vm11, %v3190_v61, %v3174_v26  ;;  %v3308_v39 = vpop.permute.xlu2 %3307  ;;  %v4640_v61 = vld [vmem:[%s10060_s1 + $0x30] sm:$0xff]  ;;  %vm10744_vm12 = vmmov %vm10743_vm1 }
 0x650   : > { %3101 = vmatmul.f32.gmra.mxu0 %v4638_v33  ;;  %4450 = vmatpush.msk.msra.mxu1 %vm5143_vm0, %v3199_v9  ;;  %vm10745_vm11 = vmmov %vm10743_vm1 }
 0x651   : > { %4482 = vmatpush.msk.msra.mxu0 %vm5958_vm9, %v9074_v1 }
 0x653   : > { %4420 = vmatmul.msk.f32.gmra.mxu3 %vm645_vm10, %v4639_v62 }
 0x654   : > { %4444 = vmatmul.msk.f32.gmra.mxu2 %vm645_vm10, %v4639_v62 }
 0x655   : > { %v3188_v30 = vpop.permute.xlu0 %3187 }
 0x656   : > { %3022 = vmatmul.f32.gmra.mxu1 %v4640_v61  ;;  %v3312_v33 = vpop.permute.xlu1 %3311  ;;  %v3198_v26 = vsel %vm10737_vm4, %v3172_v41, %v3188_v30  ;;  %v9093_v9 = vsel %vm10738_vm2, %v3188_v30, %v3172_v41  ;;  %v4641_v41 = vld [vmem:[%s10060_s1 + $0x48] sm:$0xff]  ;;  %v4642_v30 = vld [vmem:[%s10060_s1 + $0x40] sm:$0xff]  ;;  %vm10746_vm4 = vmmov %vm10743_vm1 }
 0x657   : > { %v3324_v32 = vsel %vm10739_vm15, %v3296_v53, %v3312_v33  ;;  %v9099_v62 = vsel %vm10740_vm7, %v3312_v33, %v3296_v53  ;;  %4451 = vmatpush.msk.msra.mxu1 %vm5143_vm0, %v3198_v26  ;;  %4483 = vmatpush.msk.msra.mxu0 %vm5958_vm9, %v9093_v9  ;;  %vm10747_vm15 = vmmov %vm10738_vm2 }
 0x658   : > { %3104 = vmatmul.f32.gmra.mxu0 %v4640_v61  ;;  %v3306_v43 = vpop.permute.xlu2 %3305  ;;  %4461 = vmatpush.msk.msra.mxu3 %vm5182_vm3, %v3324_v32  ;;  %vm10748_vm7 = vmmov %vm10743_vm1 }
 0x659   : > { %4493 = vmatpush.msk.msra.mxu2 %vm5904_vm8, %v9099_v62 }
 0x65b   : > { %4421 = vmatmul.msk.f32.gmra.mxu3 %vm645_vm10, %v4641_v41 }
 0x65c   : > { %4445 = vmatmul.msk.f32.gmra.mxu2 %vm645_vm10, %v4641_v41 }
 0x65d   : > { %v3186_v53 = vpop.permute.xlu0 %3185 }
 0x65e   : > { %3025 = vmatmul.f32.gmra.mxu1 %v4642_v30  ;;  %v3294_v61 = vpop.permute.xlu1 %3293  ;;  %v3197_v32 = vsel %vm10741_vm6, %v8655_v11, %v3186_v53  ;;  %v9125_v33 = vsel %vm10742_vm5, %v3186_v53, %v8655_v11  ;;  %v4644_v53 = vld [vmem:[%s10060_s1 + $0x50] sm:$0xff]  ;;  %vm10749_vm6 = vmmov %vm10743_vm1 }
 0x65f   : > { %v3323_v26 = vsel %vm10743_vm1, %v3294_v61, %v3310_v0  ;;  %v9131_v41 = vsel %vm10744_vm12, %v3310_v0, %v3294_v61  ;;  %4452 = vmatpush.msk.msra.mxu1 %vm5143_vm0, %v3197_v32  ;;  %4484 = vmatpush.msk.msra.mxu0 %vm5958_vm9, %v9125_v33  ;;  %v4643_v0 = vld [vmem:[%s10060_s1 + $0x58] sm:$0xff]  ;;  %vm10750_vm5 = vmmov %vm10738_vm2 }
 0x660   : > { %3107 = vmatmul.f32.gmra.mxu0 %v4642_v30  ;;  %4462 = vmatpush.msk.msra.mxu3 %vm5182_vm3, %v3323_v26  ;;  %vm10751_vm1 = vmmov %vm10738_vm2 }
 0x661   : > { %4494 = vmatpush.msk.msra.mxu2 %vm5904_vm8, %v9131_v41  ;;  %vm10753_vm12 = vmmov %vm10751_vm1 }
 0x662   : > { %v9143_v11 = vpop.permute.xlu2 %3177 }
 0x663   : > { %4422 = vmatmul.msk.f32.gmra.mxu3 %vm645_vm10, %v4643_v0 }
 0x664   : > { %4446 = vmatmul.msk.f32.gmra.mxu2 %vm645_vm10, %v4643_v0 }
 0x665   : > { %v3184_v61 = vpop.permute.xlu0 %3183 }
 0x666   : > { %3028 = vmatmul.f32.gmra.mxu1 %v4644_v53  ;;  %v3196_v60 = vsel %vm10738_vm2, %v8569_v25, %v3184_v61  ;;  %v9165_v0 = vsel %vm10747_vm15, %v3184_v61, %v8569_v25  ;;  %v4645_v25 = vld [vmem:[%s10060_s1 + $0x68] sm:$0xff]  ;;  %vm10757_vm2 = vmmov %vm10751_vm1  ;;  %vm10758_vm15 = vcmp.lt.s32.totalorder %v10580_v35, 1 }
 0x667   : > { %v3292_v30 = vpop.permute.xlu1 %3291  ;;  %4453 = vmatpush.msk.msra.mxu1 %vm5143_vm0, %v3196_v60  ;;  %4485 = vmatpush.msk.msra.mxu0 %vm5958_vm9, %v9165_v0 }
 0x668   : > { %v3322_v32 = vsel %vm10745_vm11, %v3292_v30, %v3308_v39  ;;  %v9157_v26 = vsel %vm10746_vm4, %v3308_v39, %v3292_v30  ;;  %3110 = vmatmul.f32.gmra.mxu0 %v4644_v53  ;;  %v4646_v39 = vld [vmem:[%s10060_s1 + $0x60] sm:$0xff]  ;;  %vm10756_vm4 = vmmov %vm10751_vm1 }
 0x669   : > { %4463 = vmatpush.msk.msra.mxu3 %vm5182_vm3, %v3322_v32  ;;  %4495 = vmatpush.msk.msra.mxu2 %vm5904_vm8, %v9157_v26 }
 0x66b   : > { %4423 = vmatmul.msk.f32.gmra.mxu3 %vm645_vm10, %v4645_v25 }
 0x66c   : > { %4447 = vmatmul.msk.f32.gmra.mxu2 %vm645_vm10, %v4645_v25  ;;  %v9182_v60 = vpop.permute.xlu2 %3653 }
 0x66e   : > { %3031 = vmatmul.f32.gmra.mxu1 %v4646_v39 }
 0x66f   : > { %v3290_v53 = vpop.permute.xlu1 %3289  ;;  %v3182_v32 = vpop.permute.xlu0 %3181 }
 0x670   : > { %v3321_v30 = vsel %vm10748_vm7, %v3290_v53, %v3306_v43  ;;  %v9191_v61 = vsel %vm10749_vm6, %v3306_v43, %v3290_v53  ;;  %3113 = vmatmul.f32.gmra.mxu0 %v4646_v39  ;;  %v3195_v25 = vsel %vm10750_vm5, %v8407_v14, %v3182_v32  ;;  %v9199_v2 = vsel %vm10751_vm1, %v3182_v32, %v8407_v14  ;;  %v2973_v43 = vpop.f32.mrf.mxu2 }
 0x671   : > { %4464 = vmatpush.msk.msra.mxu3 %vm5182_vm3, %v3321_v30  ;;  %4454 = vmatpush.msk.msra.mxu1 %vm5143_vm0, %v3195_v25  ;;  %v9232_v30 = vpop.f32.mrf.mxu3  ;;  %v3585_v32 = vand.u32 1, %v10580_v35  ;;  %vm10752_vm3 = vmmov %vm10751_vm1 }
 0x672   : > { %4486 = vmatpush.msk.msra.mxu0 %vm5958_vm9, %v9199_v2  ;;  %4496 = vmatpush.msk.msra.mxu2 %vm5904_vm8, %v9191_v61 }
 0x673   : > { %4525 = vmatpush.msk.msrb.mxu3 %vm5904_vm8, %v8910_v37  ;;  %v4648_v37 = vld [vmem:[%s10060_s1 + $0x70] sm:$0xff]  ;;  %vm9255_vm11 = vcmp.eq.s32.totalorder %v3585_v32, 0  ;;  %v9274_v32 = vsel %vm10757_vm2, %v9143_v11, %v8518_v7 }
 0x674   : > { %4424 = vmatmul.msk.f32.gmra.mxu3 %vm645_vm10, %v4647_v28  ;;  %4448 = vmatmul.msk.f32.gmra.mxu2 %vm645_vm10, %v4647_v28  ;;  %v9219_v14 = vpop.permute.xlu2 %3659  ;;  %v2932_v39 = vpop.f32.mrf.mxu0 }
 0x675   : > { %4526 = vmatpush.msk.msrb.mxu3 %vm5904_vm8, %v9001_v34  ;;  %v9224_v53 = vadd.f32 %v2973_v43, %v2932_v39  ;;  %v9238_v34 = vpop.f32.mrf.mxu1  ;;  %v3193_v39 = vsel %vm10756_vm4, %v8518_v7, %v9143_v11  ;;  %v4650_v7 = vld [vmem:[%s10060_s1 + $0x100] sm:$0xff] }
 0x676   : > { %3034 = vmatmul.f32.gmra.mxu1 %v4648_v37 }
 0x677   : > { %4527 = vmatpush.msk.msrb.mxu3 %vm5904_vm8, %v9025_v48 }
 0x678   : > { %3116 = vmatmul.f32.gmra.mxu0 %v4648_v37 }
 0x679   : > { %v3180_v25 = vpop.permute.xlu1 %3179  ;;  %4528 = vmatpush.msk.msrb.mxu3 %vm5904_vm8, %v9044_v8  ;;  %v2894_v46 = vpop.f32.mrf.mxu3 }
 0x67a   : > { %v3194_v43 = vsel %vm10752_vm3, %v8581_v4, %v3180_v25  ;;  %v9246_v48 = vsel %vm10753_vm12, %v3180_v25, %v8581_v4  ;;  %v9248_v28 = vpop.permute.xlu0 %3649  ;;  %v4649_v4 = vld [vmem:[%s10060_s1 + $0x108] sm:$0xff] }
 0x67b   : > { %4455 = vmatpush.msk.msra.mxu1 %vm5143_vm0, %v3194_v43  ;;  %4487 = vmatpush.msk.msra.mxu0 %vm5958_vm9, %v9246_v48 }
 0x67c   : > { %4465 = vmatmul.msk.f32.vlgmr.msra.gmra.mxu3 %vm645_vm10, %v4649_v4  ;;  %4497 = vmatmul.msk.f32.vlgmr.msra.gmra.mxu2 %vm645_vm10, %v4649_v4  ;;  %v9268_v37 = vpop.permute.xlu2 %3665 }
 0x67d   : > { %v3689_v25 = vsel %vm10758_vm15, %v9268_v37, %v9248_v28  ;;  %4529 = vmatpush.msk.msrb.mxu3 %vm5904_vm8, %v9099_v62  ;;  %4456 = vmatpush.msk.msra.mxu1 %vm5143_vm0, %v3193_v39  ;;  %v2976_v39 = vpop.f32.mrf.mxu2  ;;  %vm10759_vm0 = vmmov %vm10758_vm15 }
 0x67e   : > { %v9288_v43 = vsel %vm9255_vm11, %v8647_v44, %v3689_v25  ;;  %4488 = vmatpush.msk.msra.mxu0 %vm5958_vm9, %v9274_v32  ;;  %3369 = vmatmul.f32.vlgmr.msra.gmra.mxu1 %v4650_v7  ;;  %vm10762_vm7 = vmmov %vm10759_vm0 }
 0x67f   : > { %3717 = vrot.lane.b32.xlu1 %v9288_v43, %s4695_s24  ;;  %4509 = vmatpush.msk.msrb.mxu1 %vm303_vm13, %v8811_v17  ;;  %vm10765_vm5 = vmmov %vm10759_vm0 }
 0x680   : > { %3451 = vmatmul.f32.vlgmr.msra.gmra.mxu0 %v4650_v7  ;;  %4530 = vmatpush.msk.msrb.mxu3 %vm5904_vm8, %v9131_v41  ;;  %v4651_v41 = vld [vmem:[%s10060_s1 + $0x118] sm:$0xff]  ;;  %v4652_v7 = vld [vmem:[%s10060_s1 + $0x110] sm:$0xff]  ;;  %vm10766_vm1 = vmmov %vm10759_vm0 }
 0x681   : > { %4510 = vmatpush.msk.msrb.mxu1 %vm303_vm13, %v8818_v40  ;;  %vm10767_vm3 = vmmov %vm10759_vm0 }
 0x682   : > { %4531 = vmatpush.msk.msrb.mxu3 %vm5904_vm8, %v9157_v26  ;;  %v3652_v44 = vpop.permute.xlu1 %3651  ;;  %v9310_v62 = vpop.permute.xlu0 %3655  ;;  %vm10768_vm12 = vmmov %vm10759_vm0 }
 0x683   : > { %4511 = vmatpush.msk.msrb.mxu1 %vm303_vm13, %v8834_v10  ;;  %v2853_v17 = vpop.f32.mrf.mxu1  ;;  %v2935_v11 = vpop.f32.mrf.mxu0  ;;  %vm10769_vm4 = vmmov %vm10759_vm0 }
 0x684   : > { %4466 = vmatmul.msk.f32.gmra.mxu3 %vm645_vm10, %v4651_v41  ;;  %4498 = vmatmul.msk.f32.gmra.mxu2 %vm645_vm10, %v4651_v41  ;;  %v9320_v40 = vpop.permute.xlu2 %3671  ;;  %v9322_v26 = vadd.f32 %v2894_v46, %v2853_v17  ;;  %v9331_v4 = vadd.f32 %v2976_v39, %v2935_v11  ;;  %v4654_v39 = vld [vmem:[%s10060_s1 + $0x120] sm:$0xff]  ;;  %vm10772_vm2 = vmmov %vm10759_vm0 }
 0x685   : > { %v3692_v10 = vsel %vm10759_vm0, %v9320_v40, %v9310_v62  ;;  %4532 = vmatpush.msk.msrb.mxu3 %vm5904_vm8, %v9191_v61  ;;  %4512 = vmatpush.msk.msrb.mxu1 %vm303_vm13, %v8854_v23  ;;  %vm10760_vm8 = vmmov %vm10759_vm0 }
 0x686   : > { %v9339_v25 = vsel %vm9255_vm11, %v8710_v55, %v3692_v10  ;;  %3372 = vmatmul.f32.gmra.mxu1 %v4652_v7  ;;  %vm10773_vm15 = vmmov %vm10759_vm0 }
 0x687   : > { %3723 = vrot.lane.b32.xlu1 %v9339_v25, %s4695_s24  ;;  %4513 = vmatpush.msk.msrb.mxu1 %vm303_vm13, %v8883_v16 }
 0x688   : > { %3454 = vmatmul.f32.gmra.mxu0 %v4652_v7 }
 0x689   : > { %4514 = vmatpush.msk.msrb.mxu1 %vm303_vm13, %v8918_v22 }
 0x68a   : > { %v3658_v23 = vpop.permute.xlu1 %3657 }
 0x68b   : > { %4515 = vmatpush.msk.msrb.mxu1 %vm303_vm13, %v8959_v54  ;;  %v2856_v55 = vpop.f32.mrf.mxu1  ;;  %v9360_v16 = vpop.permute.xlu0 %3661 }
 0x68c   : > { %4467 = vmatmul.msk.f32.gmra.mxu3 %vm645_vm10, %v4653_v38  ;;  %4499 = vmatmul.msk.f32.gmra.mxu2 %vm645_vm10, %v4653_v38  ;;  %v9362_v61 = vpop.permute.xlu2 %3677  ;;  %v2938_v54 = vpop.f32.mrf.mxu0 }
 0x68d   : > { %v3695_v22 = vsel %vm10760_vm8, %v9362_v61, %v9360_v16  ;;  %v2897_v46 = vpop.f32.mrf.mxu3  ;;  %4516 = vmatpush.msk.msrb.mxu1 %vm303_vm13, %v8992_v52  ;;  %v2979_v11 = vpop.f32.mrf.mxu2  ;;  %vm10761_vm13 = vmmov %vm10759_vm0 }
 0x68e   : > { %v9371_v17 = vadd.f32 %v2897_v46, %v2856_v55  ;;  %v9376_v41 = vsel %vm9255_vm11, %v8801_v12, %v3695_v22  ;;  %3375 = vmatmul.f32.gmra.mxu1 %v4654_v39  ;;  %v9381_v10 = vadd.f32 %v2979_v11, %v2938_v54  ;;  %v3592_v12 = vand.u32 1, %v10713_v13  ;;  %v4655_v55 = vld [vmem:[%s10060_s1 + $0x138] sm:$0xff]  ;;  %vm10774_vm8 = vmmov %vm10759_vm0 }
 0x68f   : > { %3729 = vrot.lane.b32.xlu1 %v9376_v41, %s4695_s24  ;;  %4517 = vmatpush.msk.msrb.mxu1 %vm5958_vm9, %v9050_v59 }
 0x690   : > { %3457 = vmatmul.f32.gmra.mxu0 %v4654_v39  ;;  %vm9404_vm6 = vcmp.eq.s32.totalorder %v3592_v12, 0  ;;  %v4656_v12 = vld [vmem:[%s10060_s1 + $0x130] sm:$0xff] }
 0x691   : > { %4518 = vmatpush.msk.msrb.mxu1 %vm5958_vm9, %v9074_v1 }
 0x692   : > { %v3664_v52 = vpop.permute.xlu1 %3663 }
 0x693   : > { %4519 = vmatpush.msk.msrb.mxu1 %vm5958_vm9, %v9093_v9  ;;  %v2859_v7 = vpop.f32.mrf.mxu1  ;;  %v3668_v59 = vpop.permute.xlu0 %3667 }
 0x694   : > { %4468 = vmatmul.msk.f32.gmra.mxu3 %vm645_vm10, %v4655_v55  ;;  %4500 = vmatmul.msk.f32.gmra.mxu2 %vm645_vm10, %v4655_v55  ;;  %v3682_v1 = vsel %vm10761_vm13, %v3652_v44, %v3668_v59  ;;  %v3690_v38 = vsel %vm10762_vm7, %v3668_v59, %v3652_v44  ;;  %v2941_v46 = vpop.f32.mrf.mxu0  ;;  %vm10846_vm13 = vcmp.lt.s32.totalorder %v10580_v35, 16 }
 0x695   : > { %v2900_v22 = vpop.f32.mrf.mxu3  ;;  %4520 = vmatpush.msk.msrb.mxu1 %vm5958_vm9, %v9125_v33  ;;  %v9416_v39 = vsel %vm9255_vm11, %v8714_v47, %v3690_v38  ;;  %v9421_v44 = vsel %vm9404_vm6, %v8874_v6, %v3682_v1  ;;  %v4657_v33 = vld [vmem:[%s10060_s1 + $0x148] sm:$0xff]  ;;  %vm10847_vm7 = vmmov %vm10846_vm13 }
 0x696   : > { %v9411_v54 = vadd.f32 %v2900_v22, %v2859_v7  ;;  %v2982_v11 = vpop.f32.mrf.mxu2  ;;  %3378 = vmatmul.f32.gmra.mxu1 %v4656_v12  ;;  %3719 = vrot.lane.b32.xlu2 %v9416_v39, %s4695_s24 }
 0x697   : > { %v9426_v55 = vadd.f32 %v2982_v11, %v2941_v46  ;;  %3735 = vrot.lane.b32.xlu1 %v9421_v44, %s4695_s24  ;;  %4521 = vmatpush.msk.msrb.mxu1 %vm5958_vm9, %v9165_v0 }
 0x698   : > { %3460 = vmatmul.f32.gmra.mxu0 %v4656_v12 }
 0x699   : > { %4522 = vmatpush.msk.msrb.mxu1 %vm5958_vm9, %v9199_v2 }
 0x69b   : > { %v3670_v47 = vpop.permute.xlu1 %3669  ;;  %v2862_v6 = vpop.f32.mrf.mxu1  ;;  %4523 = vmatpush.msk.msrb.mxu1 %vm5958_vm9, %v9246_v48  ;;  %v4658_v48 = vld [vmem:[%s10060_s1 + $0x140] sm:$0xff] }
 0x69c   : > { %4469 = vmatmul.msk.f32.gmra.mxu3 %vm645_vm10, %v4657_v33  ;;  %4501 = vmatmul.msk.f32.gmra.mxu2 %vm645_vm10, %v4657_v33  ;;  %v3691_v7 = vsel %vm10765_vm5, %v3670_v47, %v9182_v60  ;;  %v3674_v0 = vpop.permute.xlu0 %3673  ;;  %v2944_v1 = vpop.f32.mrf.mxu0  ;;  %v4659_v33 = vld [vmem:[%s10060_s1 + $0x158] sm:$0xff] }
 0x69d   : > { %v3685_v59 = vsel %vm10766_vm1, %v3658_v23, %v3674_v0  ;;  %v3693_v2 = vsel %vm10767_vm3, %v3674_v0, %v3658_v23  ;;  %v9456_v38 = vsel %vm9255_vm11, %v8727_v58, %v3691_v7  ;;  %4524 = vmatpush.msk.msrb.mxu1 %vm5958_vm9, %v9274_v32  ;;  %vm10770_vm9 = vmmov %vm10759_vm0 }
 0x69e   : > { %v9461_v22 = vsel %vm9255_vm11, %v8787_v50, %v3693_v2  ;;  %3721 = vrot.lane.b32.xlu0 %v9456_v38, %s4695_s24  ;;  %v9468_v23 = vsel %vm9404_vm6, %v8929_v15, %v3685_v59  ;;  %3381 = vmatmul.f32.gmra.mxu1 %v4658_v48  ;;  %v2903_v58 = vpop.f32.mrf.mxu3 }
 0x69f   : > { %v2985_v46 = vpop.f32.mrf.mxu2  ;;  %3725 = vrot.lane.b32.xlu2 %v9461_v22, %s4695_s24  ;;  %3741 = vrot.lane.b32.xlu1 %v9468_v23, %s4695_s24  ;;  %v9477_v50 = vadd.f32 %v2903_v58, %v2862_v6  ;;  %v3683_v58 = vsel %vm10772_vm2, %v9182_v60, %v3670_v47  ;;  %v4662_v60 = vld [vmem:[%s10060_s1 + $0x160] sm:$0xff] }
 0x6a0   : > { %v9479_v11 = vadd.f32 %v2985_v46, %v2944_v1  ;;  %3463 = vmatmul.f32.gmra.mxu0 %v4658_v48 }
 0x6a3   : > { %v3676_v15 = vpop.permute.xlu1 %3675  ;;  %v2865_v12 = vpop.f32.mrf.mxu1 }
 0x6a4   : > { %4470 = vmatmul.msk.f32.gmra.mxu3 %vm645_vm10, %v4659_v33  ;;  %4502 = vmatmul.msk.f32.gmra.mxu2 %vm645_vm10, %v4659_v33  ;;  %v3694_v6 = vsel %vm10768_vm12, %v3676_v15, %v9219_v14  ;;  %v3680_v7 = vpop.permute.xlu0 %3679  ;;  %v4661_v33 = vld [vmem:[%s10060_s1 + $0x168] sm:$0xff] }
 0x6a5   : > { %v3688_v51 = vsel %vm10769_vm4, %v3664_v52, %v3680_v7  ;;  %v3696_v32 = vsel %vm10770_vm9, %v3680_v7, %v3664_v52  ;;  %v2947_v0 = vpop.f32.mrf.mxu0  ;;  %v9499_v59 = vsel %vm9255_vm11, %v8805_v29, %v3694_v6  ;;  %v4660_v52 = vld [vmem:[%s10060_s1 + $0x150] sm:$0xff] }
 0x6a6   : > { %v9504_v2 = vsel %vm9255_vm11, %v8864_v36, %v3696_v32  ;;  %3727 = vrot.lane.b32.xlu0 %v9499_v59, %s4695_s24  ;;  %v9511_v1 = vsel %vm9404_vm6, %v8966_v3, %v3688_v51  ;;  %3384 = vmatmul.f32.gmra.mxu1 %v4660_v52  ;;  %v2906_v29 = vpop.f32.mrf.mxu3  ;;  %vm10771_vm11 = vmmov %vm10759_vm0  ;;  %v3686_v51 = vsel %vm10759_vm0, %v9219_v14, %v3676_v15  ;;  %v4664_v14 = vld [vmem:[%s10060_s1 + $0x170] sm:$0xff] }
 0x6a7   : > { %v2988_v48 = vpop.f32.mrf.mxu2  ;;  %3731 = vrot.lane.b32.xlu2 %v9504_v2, %s4695_s24  ;;  %3747 = vrot.lane.b32.xlu1 %v9511_v1, %s4695_s24  ;;  %v9520_v36 = vadd.f32 %v2906_v29, %v2865_v12  ;;  %v3681_v3 = vsel %vm10771_vm11, %v9248_v28, %v9268_v37  ;;  %v9544_v28 = vsel %vm9404_vm6, %v8914_v63, %v3683_v58 }
 0x6a8   : > { %v9522_v8 = vadd.f32 %v2988_v48, %v2947_v0  ;;  %3466 = vmatmul.f32.gmra.mxu0 %v4660_v52  ;;  %v9539_v6 = vsel %vm9404_vm6, %v8878_v31, %v3681_v3  ;;  %v3684_v63 = vsel %vm10773_vm15, %v9310_v62, %v9320_v40  ;;  %v4663_v0 = vld [vmem:[%s10060_s1 + $0x178] sm:$0xff]  ;;  %v9576_v62 = vsel %vm9404_vm6, %v8954_v27, %v3686_v51 }
 0x6a9   : > { %v9571_v29 = vsel %vm9404_vm6, %v8933_v42, %v3684_v63  ;;  %v2892_v42 = vadd.f32 %v9232_v30, %v9238_v34  ;;  %v3687_v3 = vsel %vm10774_vm8, %v9360_v16, %v9362_v61 }
 0x6ab   : > { %v2868_v46 = vpop.f32.mrf.mxu1 }
 0x6ac   : > { %4471 = vmatmul.msk.f32.gmra.mxu3 %vm645_vm10, %v4661_v33  ;;  %4503 = vmatmul.msk.f32.gmra.mxu2 %vm645_vm10, %v4661_v33 }
 0x6ad   : > { %v2950_v12 = vpop.f32.mrf.mxu0 }
 0x6ae   : > { %3733 = vrot.lane.b32.xlu0 %v9539_v6, %s4695_s24  ;;  %3387 = vmatmul.f32.gmra.mxu1 %v4662_v60  ;;  %v2909_v37 = vpop.f32.mrf.mxu3 }
 0x6af   : > { %v2991_v47 = vpop.f32.mrf.mxu2  ;;  %3737 = vrot.lane.b32.xlu2 %v9544_v28, %s4695_s24  ;;  %v9553_v31 = vadd.f32 %v2909_v37, %v2868_v46 }
 0x6b0   : > { %v9555_v7 = vadd.f32 %v2991_v47, %v2950_v12  ;;  %3469 = vmatmul.f32.gmra.mxu0 %v4662_v60  ;;  %v9599_v12 = vsel %vm9404_vm6, %v8970_v24, %v3687_v3  ;;  %vm10849_vm6 = vmmov %vm10847_vm7 }
 0x6b1   : > { %vm10850_vm5 = vmmov %vm10849_vm6 }
 0x6b2   : > { %vm10856_vm1 = vmmov %vm10850_vm5 }
 0x6b3   : > { %v2871_v32 = vpop.f32.mrf.mxu1  ;;  %vm10857_vm3 = vmmov %vm10856_vm1 }
 0x6b4   : > { %4472 = vmatmul.msk.f32.gmra.mxu3 %vm645_vm10, %v4663_v0  ;;  %vm10863_vm12 = vmmov %vm10856_vm1 }
 0x6b5   : > { %v2953_v52 = vpop.f32.mrf.mxu0  ;;  %vm10864_vm4 = vmmov %vm10856_vm1 }
 0x6b6   : > { %3739 = vrot.lane.b32.xlu0 %v9571_v29, %s4695_s24  ;;  %3390 = vmatmul.f32.gmra.mxu1 %v4664_v14  ;;  %v2912_v40 = vpop.f32.mrf.mxu3  ;;  %vm10865_vm9 = vmmov %vm10856_vm1 }
 0x6b7   : > { %v2994_v15 = vpop.f32.mrf.mxu2  ;;  %3743 = vrot.lane.b32.xlu2 %v9576_v62, %s4695_s24  ;;  %v9587_v48 = vadd.f32 %v2912_v40, %v2871_v32  ;;  %vm10866_vm11 = vmmov %vm10856_vm1 }
 0x6b8   : > { %v9589_v27 = vadd.f32 %v2994_v15, %v2953_v52  ;;  %vm10871_vm2 = vmmov %vm10856_vm1 }
 0x6b9   : > { %vm10872_vm15 = vmmov %vm10856_vm1 }
 0x6ba   : > { %vm10876_vm0 = vmmov %vm10856_vm1 }
 0x6bb   : > { %v3014_v58 = vpop.f32.mrf.mxu1  ;;  %vm10877_vm8 = vmmov %vm10876_vm0 }
 0x6bc   : > { %4504 = vmatmul.msk.f32.vlgmr.msrb.gmra.mxu3 %vm645_vm10, %v4663_v0  ;;  %v3015_v46 = vadd.f32 %v3014_v58, %v2892_v42 }
 0x6bd   : > { %v3096_v33 = vpop.f32.mrf.mxu0 }
 0x6be   : > { %v3097_v30 = vadd.f32 %v3096_v33, %v9224_v53  ;;  %3745 = vrot.lane.b32.xlu0 %v9599_v12, %s4695_s24  ;;  %3472 = vmatmul.f32.vlgmr.msrb.gmra.mxu1 %v4664_v14  ;;  %v3055_v34 = vpop.f32.mrf.mxu3 }
 0x6bf   : > { %v3137_v60 = vpop.f32.mrf.mxu2  ;;  %v9604_v37 = vadd.f32 %v3055_v34, %v3015_v46 }
 0x6c0   : > { %v9606_v16 = vadd.f32 %v3137_v60, %v3097_v30 }
 0x6c3   : > { %v3017_v61 = vpop.f32.mrf.mxu1 }
 0x6c4   : > { %v3018_v47 = vadd.f32 %v3017_v61, %v9322_v26 }
 0x6c5   : > { %v3099_v63 = vpop.f32.mrf.mxu0 }
 0x6c6   : > { %v3100_v9 = vadd.f32 %v3099_v63, %v9331_v4  ;;  %v3058_v24 = vpop.f32.mrf.mxu3 }
 0x6c7   : > { %v3140_v51 = vpop.f32.mrf.mxu2  ;;  %v9610_v32 = vadd.f32 %v3058_v24, %v3018_v47 }
 0x6c8   : > { %v9612_v53 = vadd.f32 %v3140_v51, %v3100_v9 }
 0x6cb   : > { %v3020_v0 = vpop.f32.mrf.mxu1 }
 0x6cc   : > { %v3021_v52 = vadd.f32 %v3020_v0, %v9371_v17 }
 0x6cd   : > { %v3102_v14 = vpop.f32.mrf.mxu0 }
 0x6ce   : > { %v3103_v40 = vadd.f32 %v3102_v14, %v9381_v10  ;;  %v3061_v15 = vpop.f32.mrf.mxu3 }
 0x6cf   : > { %v3143_v42 = vpop.f32.mrf.mxu2  ;;  %v9616_v3 = vadd.f32 %v3061_v15, %v3021_v52 }
 0x6d0   : > { %v9618_v26 = vadd.f32 %v3143_v42, %v3103_v40 }
 0x6d3   : > { %v3023_v58 = vpop.f32.mrf.mxu1 }
 0x6d4   : > { %v3024_v4 = vadd.f32 %v3023_v58, %v9411_v54 }
 0x6d5   : > { %v3105_v46 = vpop.f32.mrf.mxu0 }
 0x6d6   : > { %v3106_v33 = vadd.f32 %v3105_v46, %v9426_v55  ;;  %v3064_v30 = vpop.f32.mrf.mxu3 }
 0x6d7   : > { %v3146_v34 = vpop.f32.mrf.mxu2  ;;  %v9622_v60 = vadd.f32 %v3064_v30, %v3024_v4 }
 0x6d8   : > { %v9624_v17 = vadd.f32 %v3146_v34, %v3106_v33 }
 0x6db   : > { %v3026_v61 = vpop.f32.mrf.mxu1 }
 0x6dc   : > { %v3027_v10 = vadd.f32 %v3026_v61, %v9477_v50 }
 0x6dd   : > { %v3108_v47 = vpop.f32.mrf.mxu0 }
 0x6de   : > { %v3109_v63 = vadd.f32 %v3108_v47, %v9479_v11  ;;  %v3067_v9 = vpop.f32.mrf.mxu3 }
 0x6df   : > { %v3149_v24 = vpop.f32.mrf.mxu2  ;;  %v9628_v51 = vadd.f32 %v3067_v9, %v3027_v10 }
 0x6e0   : > { %v9630_v54 = vadd.f32 %v3149_v24, %v3109_v63 }
 0x6e3   : > { %v3029_v0 = vpop.f32.mrf.mxu1 }
 0x6e4   : > { %v3030_v55 = vadd.f32 %v3029_v0, %v9520_v36 }
 0x6e5   : > { %v3111_v52 = vpop.f32.mrf.mxu0 }
 0x6e6   : > { %v3112_v14 = vadd.f32 %v3111_v52, %v9522_v8  ;;  %v3070_v40 = vpop.f32.mrf.mxu3 }
 0x6e7   : > { %v3152_v15 = vpop.f32.mrf.mxu2  ;;  %v9634_v42 = vadd.f32 %v3070_v40, %v3030_v55 }
 0x6e8   : > { %v9636_v50 = vadd.f32 %v3152_v15, %v3112_v14 }
 0x6eb   : > { %v3032_v58 = vpop.f32.mrf.mxu1 }
 0x6ec   : > { %v3033_v11 = vadd.f32 %v3032_v58, %v9553_v31 }
 0x6ed   : > { %v3114_v4 = vpop.f32.mrf.mxu0 }
 0x6ee   : > { %v3115_v46 = vadd.f32 %v3114_v4, %v9555_v7  ;;  %v3073_v33 = vpop.f32.mrf.mxu3 }
 0x6ef   : > { %v3155_v30 = vpop.f32.mrf.mxu2  ;;  %v9640_v34 = vadd.f32 %v3073_v33, %v3033_v11 }
 0x6f0   : > { %v9642_v36 = vadd.f32 %v3155_v30, %v3115_v46  ;;  %v3720_v8 = vpop.permute.xlu2 %3719 }
 0x6f1   : > { %10775 = vst [vmem:[#allocation36_spill] sm:$0xff] %v9640_v34  ;;  %v3718_v61 = vpop.permute.xlu1 %3717  ;;  %v10809_v34 = vld [vmem:[#allocation4_spill] sm:$0xff] }
 0x6f2   : > { %10776 = vst [vmem:[#allocation37_spill] sm:$0xff] %v9642_v36  ;;  %v10808_v36 = vld [vmem:[#allocation15_spill] sm:$0xff] }
 0x6f3   : > { %v3035_v10 = vpop.f32.mrf.mxu1 }
 0x6f4   : > { %v3036_v47 = vadd.f32 %v3035_v10, %v9587_v48 }
 0x6f7   : > { %v3076_v63 = vpop.f32.mrf.mxu3 }
 0x6f8   : > { %v9645_v9 = vadd.f32 %v3076_v63, %v3036_v47 }
 0x6f9   : > { %v3724_v24 = vpop.permute.xlu1 %3723  ;;  %v3726_v0 = vpop.permute.xlu2 %3725 }
 0x6fa   : > { %10777 = vst [vmem:[#allocation34_spill] sm:$0xff] %v9645_v9 }
 0x701   : > { %v3730_v31 = vpop.permute.xlu1 %3729  ;;  %v3732_v55 = vpop.permute.xlu2 %3731 }
 0x709   : > { %v3736_v52 = vpop.permute.xlu1 %3735  ;;  %v3738_v40 = vpop.permute.xlu2 %3737 }
 0x70a   : > { %v3750_v7 = vsel %vm1119_vm14, %v3720_v8, %v3736_v52 }
 0x70b   : > { %v9650_v14 = vadd.f32 %v3750_v7, %v9416_v39 }
 0x70d   : > { %10778 = vst [vmem:[#allocation35_spill] sm:$0xff] %v9650_v14  ;;  %3783 = vrot.lane.b32.xlu0 %v9650_v14, %s4690_s19 }
 0x710   : > { %v3722_v15 = vpop.permute.xlu0 %3721 }
 0x711   : > { %v3751_v48 = vsel %vm1119_vm14, %v3722_v15, %v3738_v40  ;;  %v3742_v58 = vpop.permute.xlu1 %3741  ;;  %v3744_v39 = vpop.permute.xlu2 %3743  ;;  %v3759_v7 = vsel %vm1119_vm14, %v3738_v40, %v3722_v15 }
 0x712   : > { %v9657_v11 = vadd.f32 %v3751_v48, %v9456_v38  ;;  %v3753_v4 = vsel %vm1119_vm14, %v3726_v0, %v3742_v58 }
 0x713   : > { %v9662_v46 = vadd.f32 %v3753_v4, %v9461_v22 }
 0x714   : > { %10779 = vst [vmem:[#allocation16_spill] sm:$0xff] %v9657_v11  ;;  %3785 = vrot.lane.b32.xlu1 %v9657_v11, %s4690_s19 }
 0x715   : > { %10780 = vst [vmem:[#allocation70_spill] sm:$0xff] %v9662_v46  ;;  %3789 = vrot.lane.b32.xlu0 %v9662_v46, %s4690_s19 }
 0x718   : > { %v3728_v33 = vpop.permute.xlu0 %3727 }
 0x719   : > { %v3754_v30 = vsel %vm1119_vm14, %v3728_v33, %v3744_v39  ;;  %v3748_v10 = vpop.permute.xlu1 %3747 }
 0x71a   : > { %v9671_v38 = vadd.f32 %v3754_v30, %v9499_v59  ;;  %v3756_v47 = vsel %vm1119_vm14, %v3732_v55, %v3748_v10  ;;  %v9695_v30 = vadd.f32 %v3759_v7, %v9544_v28  ;;  %v3411_v7 = vpop.f32.mrf.mxu3 }
 0x71b   : > { %v9676_v22 = vadd.f32 %v3756_v47, %v9504_v2 }
 0x71c   : > { %10781 = vst [vmem:[#allocation64_spill] sm:$0xff] %v9671_v38  ;;  %3791 = vrot.lane.b32.xlu1 %v9671_v38, %s4690_s19  ;;  %v10797_v38 = vld [vmem:[#allocation48_spill] sm:$0xff] }
 0x71d   : > { %10782 = vst [vmem:[#allocation80_spill] sm:$0xff] %v9676_v22  ;;  %3795 = vrot.lane.b32.xlu0 %v9676_v22, %s4690_s19  ;;  %v9775_v9 = vadd.f32 %v7780_v21, %v10797_v38  ;;  %v10806_v38 = vld [vmem:[#allocation57_spill] sm:$0xff] }
 0x71e   : > { %10785 = vst [vmem:[#allocation63_spill] sm:$0xff] %v9695_v30 }
 0x720   : > { %v3734_v63 = vpop.permute.xlu0 %3733 }
 0x721   : > { %v3749_v59 = vsel %vm1119_vm14, %v3718_v61, %v3734_v63  ;;  %v3757_v48 = vsel %vm1119_vm14, %v3734_v63, %v3718_v61 }
 0x722   : > { %v9689_v4 = vadd.f32 %v3749_v59, %v9288_v43  ;;  %v9692_v2 = vadd.f32 %v3757_v48, %v9539_v6  ;;  %v3762_v43 = vsel %vm1119_vm14, %v3744_v39, %v3728_v33  ;;  %v3758_v33 = vsel %vm1119_vm14, %v3736_v52, %v3720_v8  ;;  %v3117_v52 = vpop.f32.mrf.mxu0 }
 0x723   : > { %v9716_v47 = vadd.f32 %v3762_v43, %v9576_v62  ;;  %v9741_v63 = vadd.f32 %v3758_v33, %v9421_v44  ;;  %v3764_v8 = vsel %vm1119_vm14, %v3748_v10, %v3732_v55  ;;  %v9754_v44 = vpop.f32.mrf.mxu2 }
 0x724   : > { %10783 = vst [vmem:[#allocation76_spill] sm:$0xff] %v9689_v4  ;;  %3781 = vrot.lane.b32.xlu2 %v9689_v4, %s4690_s19  ;;  %3797 = vrot.lane.b32.xlu1 %v9692_v2, %s4690_s19  ;;  %v9757_v59 = vadd.f32 %v3764_v8, %v9511_v1 }
 0x725   : > { %10784 = vst [vmem:[#allocation67_spill] sm:$0xff] %v9692_v2  ;;  %3801 = vrot.lane.b32.xlu0 %v9695_v30, %s4690_s19  ;;  %v10798_v30 = vld [vmem:[#allocation51_spill] sm:$0xff]  ;;  %v10800_v2 = vld [vmem:[#allocation54_spill] sm:$0xff] }
 0x726   : > { %10788 = vst [vmem:[#allocation74_spill] sm:$0xff] %v9716_v47  ;;  %v9779_v11 = vadd.f32 %v7817_v57, %v10798_v30  ;;  %v9787_v4 = vadd.f32 %v7847_v45, %v10800_v2  ;;  %v9799_v57 = vadd.f32 %v7950_v20, %v10806_v38  ;;  %v9803_v45 = vadd.f32 %v10809_v34, %v10808_v36  ;;  %v10811_v2 = vld [vmem:[#allocation13_spill] sm:$0xff]  ;;  %v10815_v36 = vld [vmem:[#allocation14_spill] sm:$0xff] }
 0x727   : > { %10791 = vst [vmem:[#allocation19_spill] sm:$0xff] %v9741_v63 }
 0x728   : > { %v3740_v40 = vpop.permute.xlu0 %3739  ;;  %10793 = vst [vmem:[#allocation72_spill] sm:$0xff] %v9757_v59 }
 0x729   : > { %v3752_v6 = vsel %vm1119_vm14, %v3724_v24, %v3740_v40  ;;  %v3760_v28 = vsel %vm1119_vm14, %v3740_v40, %v3724_v24  ;;  %10801 = vst [vmem:[#allocation62_spill] sm:$0xff] %v9787_v4 }
 0x72a   : > { %v9710_v61 = vadd.f32 %v3752_v6, %v9339_v25  ;;  %v9713_v15 = vadd.f32 %v3760_v28, %v9571_v29  ;;  %10807 = vst [vmem:[#allocation81_spill] sm:$0xff] %v9799_v57 }
 0x72b   : > { %10810 = vst [vmem:[#allocation28_spill] sm:$0xff] %v9803_v45 }
 0x72c   : > { %10786 = vst [vmem:[#allocation31_spill] sm:$0xff] %v9710_v61  ;;  %3787 = vrot.lane.b32.xlu2 %v9710_v61, %s4690_s19  ;;  %3803 = vrot.lane.b32.xlu1 %v9713_v15, %s4690_s19  ;;  %v10796_v61 = vld [vmem:[#allocation49_spill] sm:$0xff] }
 0x72d   : > { %10787 = vst [vmem:[#allocation71_spill] sm:$0xff] %v9713_v15  ;;  %3807 = vrot.lane.b32.xlu0 %v9716_v47, %s4690_s19  ;;  %v9771_v47 = vadd.f32 %v7777_v49, %v10796_v61  ;;  %v10804_v61 = vld [vmem:[#allocation58_spill] sm:$0xff] }
 0x72e   : > { %v9795_v21 = vadd.f32 %v7954_v56, %v10804_v61 }
 0x730   : > { %v3746_v39 = vpop.permute.xlu0 %3745  ;;  %10805 = vst [vmem:[#allocation82_spill] sm:$0xff] %v9795_v21 }
 0x731   : > { %v3755_v25 = vsel %vm1119_vm14, %v3730_v31, %v3746_v39  ;;  %v3763_v29 = vsel %vm1119_vm14, %v3746_v39, %v3730_v31 }
 0x732   : > { %v9729_v24 = vadd.f32 %v3755_v25, %v9376_v41  ;;  %v9732_v62 = vadd.f32 %v3763_v29, %v9599_v12  ;;  %v3761_v41 = vsel %vm1119_vm14, %v3742_v58, %v3726_v0  ;;  %v3370_v12 = vpop.f32.mrf.mxu1  ;;  %v3414_v0 = vpop.f32.mrf.mxu3 }
 0x733   : > { %v9748_v31 = vadd.f32 %v3761_v41, %v9468_v23  ;;  %v3452_v23 = vpop.f32.mrf.mxu0  ;;  %v3493_v58 = vpop.f32.mrf.mxu2 }
 0x734   : > { %10789 = vst [vmem:[#allocation83_spill] sm:$0xff] %v9729_v24  ;;  %3793 = vrot.lane.b32.xlu2 %v9729_v24, %s4690_s19  ;;  %3809 = vrot.lane.b32.xlu1 %v9732_v62, %s4690_s19 }
 0x735   : > { %10790 = vst [vmem:[#allocation25_spill] sm:$0xff] %v9732_v62 }
 0x736   : > { %10792 = vst [vmem:[#allocation69_spill] sm:$0xff] %v9748_v31 }
 0x73a   : > { %v3373_v48 = vpop.f32.mrf.mxu1  ;;  %v3417_v43 = vpop.f32.mrf.mxu3 }
 0x73b   : > { %v3455_v6 = vpop.f32.mrf.mxu0  ;;  %v3496_v28 = vpop.f32.mrf.mxu2  ;;  %v3415_v61 = vadd.f32 %v3414_v0, %v3373_v48  ;;  %v3118_v48 = vadd.f32 %v3117_v52, %v9589_v27 }
 0x73c   : > { %3799 = vrot.lane.b32.xlu2 %v9741_v63, %s4690_s19  ;;  %v10799_v63 = vld [vmem:[#allocation52_spill] sm:$0xff]  ;;  %v3497_v21 = vadd.f32 %v3496_v28, %v3455_v6 }
 0x73d   : > { %v9783_v14 = vadd.f32 %v7799_v18, %v10799_v63  ;;  %v3412_v18 = vadd.f32 %v3411_v7, %v3370_v12  ;;  %v3494_v63 = vadd.f32 %v3493_v58, %v3452_v23  ;;  %v10816_v58 = vld [vmem:[#allocation21_spill] sm:$0xff] }
 0x73e   : > { %v3559_v45 = vadd.f32 %v10816_v58, %v10815_v36  ;;  %v3520_v6 = vadd.f32 %v3497_v21, %v9612_v53  ;;  %v10823_v53 = vld [vmem:[#allocation33_spill] sm:$0xff] }
 0x73f   : > { %v3517_v0 = vadd.f32 %v3412_v18, %v9604_v37  ;;  %v10829_v21 = vld [vmem:[#allocation53_spill] sm:$0xff] }
 0x742   : > { %v3376_v40 = vpop.f32.mrf.mxu1  ;;  %v3420_v25 = vpop.f32.mrf.mxu3 }
 0x743   : > { %v3458_v55 = vpop.f32.mrf.mxu0  ;;  %v3499_v10 = vpop.f32.mrf.mxu2  ;;  %v3418_v20 = vadd.f32 %v3417_v43, %v3376_v40  ;;  %v3518_v40 = vadd.f32 %v3494_v63, %v9606_v16  ;;  %v10819_v43 = vld [vmem:[#allocation20_spill] sm:$0xff] }
 0x744   : > { %3805 = vrot.lane.b32.xlu2 %v9748_v31, %s4690_s19  ;;  %v3500_v38 = vadd.f32 %v3499_v10, %v3458_v55  ;;  %v10821_v55 = vld [vmem:[#allocation30_spill] sm:$0xff]  ;;  %v10830_v63 = vld [vmem:[#allocation56_spill] sm:$0xff] }
 0x746   : > { %v3522_v28 = vadd.f32 %v3500_v38, %v9618_v26  ;;  %v9845_v26 = vadd.f32 %v9754_v44, %v3118_v48 }
 0x748   : > { %v3538_v44 = vadd.f32 %v3522_v28, %v10829_v21 }
 0x74a   : > { %v3379_v39 = vpop.f32.mrf.mxu1  ;;  %v3423_v33 = vpop.f32.mrf.mxu3 }
 0x74b   : > { %v3461_v41 = vpop.f32.mrf.mxu0  ;;  %v3502_v1 = vpop.f32.mrf.mxu2  ;;  %v3421_v57 = vadd.f32 %v3420_v25, %v3379_v39 }
 0x74c   : > { %3811 = vrot.lane.b32.xlu2 %v9757_v59, %s4690_s19 }
 0x74d   : > { %v3523_v39 = vadd.f32 %v3421_v57, %v9622_v60  ;;  %v10825_v60 = vld [vmem:[#allocation47_spill] sm:$0xff] }
 0x752   : > { %v3382_v29 = vpop.f32.mrf.mxu1  ;;  %v3426_v22 = vpop.f32.mrf.mxu3 }
 0x753   : > { %v3464_v62 = vpop.f32.mrf.mxu0  ;;  %v3505_v24 = vpop.f32.mrf.mxu2  ;;  %v3424_v12 = vadd.f32 %v3423_v33, %v3382_v29  ;;  %v10827_v33 = vld [vmem:[#allocation66_spill] sm:$0xff] }
 0x754   : > { %v3506_v7 = vadd.f32 %v3505_v24, %v3464_v62  ;;  %v10820_v24 = vld [vmem:[#allocation8_spill] sm:$0xff] }
 0x755   : > { %v9824_v62 = vadd.f32 %v10820_v24, %v10819_v43  ;;  %v3525_v37 = vadd.f32 %v3424_v12, %v9628_v51  ;;  %v3534_v51 = vadd.f32 %v3518_v40, %v10825_v60 }
 0x756   : > { %v3526_v16 = vadd.f32 %v3506_v7, %v9630_v54  ;;  %v10826_v54 = vld [vmem:[#allocation5_spill] sm:$0xff] }
 0x75a   : > { %v3385_v8 = vpop.f32.mrf.mxu1  ;;  %v9765_v46 = vpop.f32.mrf.mxu3 }
 0x75b   : > { %v3467_v30 = vpop.f32.mrf.mxu0  ;;  %v3427_v34 = vadd.f32 %v3426_v22, %v3385_v8  ;;  %v3519_v22 = vadd.f32 %v3415_v61, %v9610_v32  ;;  %v10822_v32 = vld [vmem:[#allocation6_spill] sm:$0xff] }
 0x75c   : > { %v9838_v10 = vadd.f32 %v10822_v32, %v10821_v55  ;;  %v4675_v55 = vld [vmem:[%s4734_s17 + $0x40] sm:$0xff]  ;;  %v4676_v32 = vld [vmem:[%s4734_s17 + $0x48] sm:$0xff] }
 0x75d   : > { %v3527_v52 = vadd.f32 %v3427_v34, %v9634_v42  ;;  %v9851_v42 = vadd.f32 %v10827_v33, %v10826_v54  ;;  %v10832_v34 = vld [vmem:[#allocation17_spill] sm:$0xff] }
 0x75f   : > { %v3543_v36 = vadd.f32 %v3527_v52, %v10832_v34 }
 0x762   : > { %v9761_v59 = vpop.f32.mrf.mxu1 }
 0x763   : > { %v3430_v40 = vadd.f32 %v9765_v46, %v9761_v59 }
 0x76a   : > { %v3391_v4 = vpop.f32.mrf.mxu1 }
 0x77e   : > { %v9763_v31 = vpop.permute.xlu2 %3781 }
 0x77f   : > { %10794 = vst [vmem:[#allocation85_spill] sm:$0xff] %v9763_v31  ;;  %v9767_v15 = vpop.permute.xlu0 %3783  ;;  %v3508_v31 = vpop.f32.mrf.mxu2 }
 0x780   : > { %10795 = vst [vmem:[#allocation84_spill] sm:$0xff] %v9767_v15  ;;  %v10802_v15 = vld [vmem:[#allocation55_spill] sm:$0xff] }
 0x781   : > { %v9791_v49 = vadd.f32 %v7872_v5, %v10802_v15  ;;  %v9807_v5 = vadd.f32 %v7942_v19, %v10811_v2  ;;  %v3509_v19 = vadd.f32 %v3508_v31, %v3467_v30  ;;  %v10817_v2 = vld [vmem:[#allocation12_spill] sm:$0xff]  ;;  %v3521_v31 = vadd.f32 %v3418_v20, %v9616_v3  ;;  %v10824_v3 = vld [vmem:[#allocation7_spill] sm:$0xff]  ;;  %v3470_v30 = vpop.f32.mrf.mxu0 }
 0x782   : > { %v9842_v29 = vadd.f32 %v10824_v3, %v10823_v53  ;;  %v10831_v20 = vld [vmem:[#allocation59_spill] sm:$0xff]  ;;  %v10843_v53 = vld [vmem:[#allocation36_spill] sm:$0xff] }
 0x783   : > { %10803 = vst [vmem:[#allocation61_spill] sm:$0xff] %v9791_v49  ;;  %v3503_v49 = vadd.f32 %v3502_v1, %v3461_v41  ;;  %v3528_v25 = vadd.f32 %v3509_v19, %v9636_v50  ;;  %v10828_v1 = vld [vmem:[#allocation50_spill] sm:$0xff]  ;;  %v3537_v57 = vadd.f32 %v3521_v31, %v10829_v21  ;;  %v3541_v38 = vadd.f32 %v3525_v37, %v10831_v20 }
 0x784   : > { %10812 = vst [vmem:[#allocation29_spill] sm:$0xff] %v9807_v5  ;;  %v10818_v5 = vld [vmem:[#allocation3_spill] sm:$0xff]  ;;  %v3535_v8 = vadd.f32 %v3519_v22, %v10828_v1  ;;  %v3542_v12 = vadd.f32 %v3526_v16, %v10831_v20  ;;  %v3611_v19 = vand.u32 31, %v10580_v35  ;;  %v10835_v16 = vld [vmem:[#allocation82_spill] sm:$0xff]  ;;  %v3529_v3 = vadd.f32 %v3430_v40, %v10843_v53 }
 0x785   : > { %v3524_v27 = vadd.f32 %v3503_v49, %v9624_v17  ;;  %v3533_v17 = vadd.f32 %v3517_v0, %v10825_v60  ;;  %v3536_v49 = vadd.f32 %v3520_v6, %v10828_v1  ;;  %v3544_v58 = vadd.f32 %v3528_v25, %v10832_v34  ;;  %v10833_v6 = vld [vmem:[#allocation62_spill] sm:$0xff]  ;;  %v10844_v60 = vld [vmem:[#allocation37_spill] sm:$0xff]  ;;  %v10859_v40 = vld [vmem:[#allocation63_spill] sm:$0xff] }
 0x786   : > { %v9809_v15 = vpop.permute.xlu1 %3785  ;;  %v9811_v56 = vpop.permute.xlu2 %3787  ;;  %v3566_v0 = vadd.f32 %v9775_v9, %v3534_v51  ;;  %v3567_v24 = vadd.f32 %v9779_v11, %v3535_v8  ;;  %v3569_v31 = vadd.f32 %v10833_v6, %v3537_v57  ;;  %v10837_v9 = vld [vmem:[#allocation28_spill] sm:$0xff]  ;;  %v9891_v11 = vadd.f32 %v3559_v45, %v3543_v36  ;;  %v10845_v45 = vld [vmem:[#allocation85_spill] sm:$0xff] }
 0x787   : > { %10813 = vst [vmem:[#allocation79_spill] sm:$0xff] %v9809_v15  ;;  %v9813_v23 = vpop.permute.xlu0 %3789  ;;  %v3560_v15 = vadd.f32 %v10818_v5, %v10817_v2  ;;  %v3511_v18 = vpop.f32.mrf.mxu2  ;;  %v3539_v5 = vadd.f32 %v3523_v39, %v10830_v63  ;;  %v3540_v61 = vadd.f32 %v3524_v27, %v10830_v63  ;;  %v3618_v2 = vand.u32 31, %v10713_v13  ;;  %v10853_v63 = vld [vmem:[#allocation35_spill] sm:$0xff] }
 0x788   : > { %10814 = vst [vmem:[#allocation78_spill] sm:$0xff] %v9811_v56  ;;  %v3432_v56 = vpop.f32.mrf.mxu3  ;;  %v3565_v48 = vadd.f32 %v9771_v47, %v3533_v17  ;;  %v3512_v43 = vadd.f32 %v3511_v18, %v3470_v30  ;;  %v3568_v22 = vadd.f32 %v9783_v14, %v3536_v49  ;;  %v3473_v27 = vpop.f32.mrf.mxu1  ;;  %v10836_v47 = vld [vmem:[#allocation81_spill] sm:$0xff]  ;;  %v9886_v25 = vadd.f32 %v10837_v9, %v3541_v38  ;;  %v10848_v49 = vld [vmem:[#allocation84_spill] sm:$0xff]  ;;  %v10852_v30 = vld [vmem:[#allocation67_spill] sm:$0xff] }
 0x789   : > { %v9880_v13 = vadd.f32 %v10835_v16, %v3539_v5  ;;  %v9883_v52 = vadd.f32 %v10836_v47, %v3540_v61  ;;  %v9893_v14 = vadd.f32 %v3560_v15, %v3544_v58  ;;  %vm9895_vm10 = vcmp.lt.s32.totalorder %v3611_v19, 16  ;;  %v10854_v61 = vld [vmem:[#allocation19_spill] sm:$0xff]  ;;  %v10858_v19 = vld [vmem:[#allocation16_spill] sm:$0xff]  ;;  %v10860_v9 = vld [vmem:[#allocation9_spill] sm:$0xff] }
 0x78a   : > { %v10834_v28 = vld [vmem:[#allocation61_spill] sm:$0xff]  ;;  %vm9899_vm14 = vcmp.lt.s32.totalorder %v3618_v2, 16  ;;  %v3530_v17 = vadd.f32 %v3512_v43, %v10844_v60  ;;  %v3433_v51 = vadd.f32 %v3432_v56, %v3391_v4  ;;  %v10851_v56 = vld [vmem:[#allocation76_spill] sm:$0xff] }
 0x78b   : > { %v3570_v39 = vadd.f32 %v10834_v28, %v3538_v44  ;;  %v10838_v46 = vld [vmem:[#allocation29_spill] sm:$0xff] }
 0x78c   : > { %v9889_v59 = vadd.f32 %v10838_v46, %v3542_v12  ;;  %v3545_v46 = vadd.f32 %v3529_v3, %v10860_v9  ;;  %v3546_v53 = vadd.f32 %v3530_v17, %v10860_v9 }
 0x78e   : > { %v9853_v50 = vpop.permute.xlu1 %3791  ;;  %v9855_v41 = vpop.permute.xlu2 %3793  ;;  %v10855_v38 = vld [vmem:[#allocation79_spill] sm:$0xff]  ;;  %v3577_v9 = vadd.f32 %v9824_v62, %v3545_v46 }
 0x78f   : > { %v9865_v7 = vpop.permute.xlu0 %3795 }
 0x790   : > { %v3514_v37 = vpop.f32.mrf.mxu3 }
 0x791   : > { %v3515_v54 = vadd.f32 %v3514_v37, %v3473_v27 }
 0x796   : > { %v3798_v33 = vpop.permute.xlu1 %3797  ;;  %v3800_v1 = vpop.permute.xlu2 %3799 }
 0x797   : > { %v3813_v15 = vsel %vm10846_vm13, %v10845_v45, %v3798_v33  ;;  %v3821_v8 = vsel %vm10847_vm7, %v3798_v33, %v10845_v45  ;;  %v3814_v21 = vsel %vm10849_vm6, %v10848_v49, %v3800_v1  ;;  %v3822_v57 = vsel %vm10850_vm5, %v3800_v1, %v10848_v49  ;;  %v3802_v4 = vpop.permute.xlu0 %3801  ;;  %v10861_v49 = vld [vmem:[#allocation34_spill] sm:$0xff]  ;;  %vm10880_vm13 = vmmov %vm10876_vm0 }
 0x798   : > { %v3833_v44 = vsel %vm9895_vm10, %v10851_v56, %v3821_v8  ;;  %v3834_v18 = vsel %vm9899_vm14, %v10852_v30, %v3813_v15  ;;  %v3835_v5 = vsel %vm9895_vm10, %v10853_v63, %v3822_v57  ;;  %v3836_v20 = vsel %vm9899_vm14, %v10854_v61, %v3814_v21  ;;  %v4668_v63 = vld [vmem:[%s4734_s17 + $0x18] sm:$0xff]  ;;  %vm10881_vm7 = vmmov %vm10876_vm0 }
 0x799   : > { %v3815_v12 = vsel %vm10856_vm1, %v10855_v38, %v3802_v4  ;;  %v3823_v34 = vsel %vm10857_vm3, %v3802_v4, %v10855_v38  ;;  %v3849_v36 = vmul.f32 0.25, %v3833_v44  ;;  %v3850_v58 = vmul.f32 0.25, %v3834_v18  ;;  %v4670_v38 = vld [vmem:[%s4734_s17 + $0x28] sm:$0xff] }
 0x79a   : > { %v3837_v2 = vsel %vm9895_vm10, %v10858_v19, %v3823_v34  ;;  %v3838_v43 = vsel %vm9899_vm14, %v10859_v40, %v3815_v12  ;;  %v3851_v6 = vmul.f32 0.25, %v3835_v5  ;;  %v3852_v28 = vmul.f32 0.25, %v3836_v20 }
 0x79b   : > { %v3853_v27 = vmul.f32 0.25, %v3837_v2  ;;  %v3854_v37 = vmul.f32 0.25, %v3838_v43  ;;  %v3865_v16 = vmax.f32 %v3849_v36, 0.0  ;;  %v3866_v47 = vmax.f32 %v3850_v58, 0.0  ;;  %v10867_v58 = vld [vmem:[#allocation64_spill] sm:$0xff]  ;;  %v10868_v2 = vld [vmem:[#allocation74_spill] sm:$0xff] }
 0x79c   : > { %v3867_v60 = vmax.f32 %v3851_v6, 0.0  ;;  %v3868_v33 = vmax.f32 %v3852_v28, 0.0  ;;  %v3531_v21 = vadd.f32 %v3433_v51, %v10861_v49  ;;  %v3532_v57 = vadd.f32 %v3515_v54, %v9845_v26  ;;  %v4666_v51 = vld [vmem:[%s4734_s17 + $0x8] sm:$0xff]  ;;  %v4667_v54 = vld [vmem:[%s4734_s17 + $0x10] sm:$0xff] }
 0x79d   : > { %v3869_v1 = vmax.f32 %v3853_v27, 0.0  ;;  %v3870_v45 = vmax.f32 %v3854_v37, 0.0  ;;  %v3881_v15 = vmul.f32 %v3865_v16, %v3565_v48  ;;  %v3882_v8 = vmul.f32 %v3866_v47, %v3566_v0  ;;  %v4665_v0 = vld [vmem:[%s4734_s17] sm:$0xff]  ;;  %v10869_v43 = vld [vmem:[#allocation31_spill] sm:$0xff] }
 0x79e   : > { %v3883_v3 = vmul.f32 %v3867_v60, %v3567_v24  ;;  %v3884_v17 = vmul.f32 %v3868_v33, %v3568_v22  ;;  %v3804_v4 = vpop.permute.xlu1 %3803  ;;  %v3806_v56 = vpop.permute.xlu2 %3805  ;;  %v10862_v24 = vld [vmem:[#allocation78_spill] sm:$0xff]  ;;  %v10870_v28 = vld [vmem:[#allocation71_spill] sm:$0xff]  ;;  %v3578_v60 = vadd.f32 %v9838_v10, %v3546_v53  ;;  %v10875_v53 = vld [vmem:[#allocation69_spill] sm:$0xff] }
 0x79f   : > { %v3885_v44 = vmul.f32 %v3869_v1, %v3569_v31  ;;  %v3886_v48 = vmul.f32 %v3870_v45, %v3570_v39  ;;  %v3897_v30 = vadd.f32 %v4665_v0, %v3881_v15  ;;  %v3898_v26 = vadd.f32 %v4666_v51, %v3882_v8  ;;  %v3808_v61 = vpop.permute.xlu0 %3807  ;;  %v4669_v39 = vld [vmem:[%s4734_s17 + $0x20] sm:$0xff] }
 0x7a0   : > { %v3899_v18 = vadd.f32 %v4667_v54, %v3883_v3  ;;  %v3900_v5 = vadd.f32 %v4668_v63, %v3884_v17  ;;  %v3816_v22 = vsel %vm10863_vm12, %v10862_v24, %v3804_v4  ;;  %v3824_v31 = vsel %vm10864_vm4, %v3804_v4, %v10862_v24  ;;  %v10873_v3 = vld [vmem:[#allocation23_spill] sm:$0xff]  ;;  %v10874_v10 = vld [vmem:[#allocation70_spill] sm:$0xff]  ;;  %v4671_v54 = vld [vmem:[%s4734_s17 + $0x50] sm:$0xff] }
 0x7a1   : > { %v3901_v20 = vadd.f32 %v4669_v39, %v3885_v44  ;;  %v3902_v12 = vadd.f32 %v4670_v38, %v3886_v48  ;;  %3913 = vst [vmem:[%s9950_s4] sm:$0xff] %v3897_v30  ;;  %v3818_v34 = vsel %vm10865_vm9, %v9853_v50, %v3808_v61  ;;  %v3826_v36 = vsel %vm10866_vm11, %v3808_v61, %v9853_v50  ;;  %v10879_v39 = vld [vmem:[#allocation25_spill] sm:$0xff] }
 0x7a2   : > { %3914 = vst [vmem:[%s9950_s4 + $0x8] sm:$0xff] %v3898_v26  ;;  %v3843_v19 = vsel %vm9895_vm10, %v10867_v58, %v3826_v36  ;;  %v3844_v40 = vsel %vm9899_vm14, %v10868_v2, %v3818_v34  ;;  %v3839_v6 = vsel %vm9895_vm10, %v10869_v43, %v3824_v31  ;;  %v3840_v27 = vsel %vm9899_vm14, %v10870_v28, %v3816_v22  ;;  %v10878_v22 = vld [vmem:[#allocation83_spill] sm:$0xff] }
 0x7a3   : > { %3917 = vst [vmem:[%s9950_s4 + $0x20] sm:$0xff] %v3901_v20  ;;  %v3859_v50 = vmul.f32 0.25, %v3843_v19  ;;  %v3860_v37 = vmul.f32 0.25, %v3844_v40  ;;  %v3855_v16 = vmul.f32 0.25, %v3839_v6  ;;  %v3856_v47 = vmul.f32 0.25, %v3840_v27  ;;  %v10882_v19 = vld [vmem:[#allocation80_spill] sm:$0xff] }
 0x7a4   : > { %3918 = vst [vmem:[%s9950_s4 + $0x28] sm:$0xff] %v3902_v12  ;;  %v3817_v33 = vsel %vm10871_vm2, %v9813_v23, %v3806_v56  ;;  %v3825_v1 = vsel %vm10872_vm15, %v3806_v56, %v9813_v23  ;;  %v3547_v17 = vadd.f32 %v3531_v21, %v10873_v3  ;;  %v3548_v62 = vadd.f32 %v3532_v57, %v10873_v3  ;;  %v10883_v40 = vld [vmem:[#allocation72_spill] sm:$0xff] }
 0x7a5   : > { %3915 = vst [vmem:[%s9950_s4 + $0x10] sm:$0xff] %v3899_v18  ;;  %v3875_v45 = vmax.f32 %v3859_v50, 0.0  ;;  %v3876_v15 = vmax.f32 %v3860_v37, 0.0  ;;  %v3871_v8 = vmax.f32 %v3855_v16, 0.0  ;;  %v3872_v49 = vmax.f32 %v3856_v47, 0.0 }
 0x7a6   : > { %3916 = vst [vmem:[%s9950_s4 + $0x18] sm:$0xff] %v3900_v5  ;;  %v3841_v46 = vsel %vm9895_vm10, %v10874_v10, %v3825_v1  ;;  %v3842_v23 = vsel %vm9899_vm14, %v10875_v53, %v3817_v33  ;;  %v3810_v4 = vpop.permute.xlu1 %3809  ;;  %v3812_v26 = vpop.permute.xlu2 %3811 }
 0x7a7   : > { %v3891_v56 = vmul.f32 %v3875_v45, %v9891_v11  ;;  %v3892_v44 = vmul.f32 %v3876_v15, %v9893_v14  ;;  %v3887_v21 = vmul.f32 %v3871_v8, %v9880_v13  ;;  %v3888_v57 = vmul.f32 %v3872_v49, %v9883_v52  ;;  %v4672_v14 = vld [vmem:[%s4734_s17 + $0x58] sm:$0xff]  ;;  %v4673_v13 = vld [vmem:[%s4734_s17 + $0x30] sm:$0xff] }
 0x7a8   : > { %v3857_v48 = vmul.f32 0.25, %v3841_v46  ;;  %v3858_v0 = vmul.f32 0.25, %v3842_v23  ;;  %v3819_v30 = vsel %vm10876_vm0, %v9855_v41, %v3810_v4  ;;  %v3827_v51 = vsel %vm10877_vm8, %v3810_v4, %v9855_v41  ;;  %v4674_v52 = vld [vmem:[%s4734_s17 + $0x38] sm:$0xff]  ;;  %v4679_v49 = vld [vmem:[%s4734_s17 + $0x70] sm:$0xff] }
 0x7a9   : > { %v3907_v11 = vadd.f32 %v4671_v54, %v3891_v56  ;;  %v3908_v18 = vadd.f32 %v4672_v14, %v3892_v44  ;;  %v3903_v63 = vadd.f32 %v4673_v13, %v3887_v21  ;;  %v3904_v5 = vadd.f32 %v4674_v52, %v3888_v57 }
 0x7aa   : > { %v3873_v61 = vmax.f32 %v3857_v48, 0.0  ;;  %v3874_v24 = vmax.f32 %v3858_v0, 0.0  ;;  %v3845_v31 = vsel %vm9895_vm10, %v10878_v22, %v3827_v51  ;;  %v3846_v41 = vsel %vm9899_vm14, %v10879_v39, %v3819_v30 }
 0x7ab   : > { %3923 = vst [vmem:[%s9950_s4 + $0x50] sm:$0xff] %v3907_v11  ;;  %v3861_v20 = vmul.f32 0.25, %v3845_v31  ;;  %v3862_v38 = vmul.f32 0.25, %v3846_v41  ;;  %v3820_v12 = vsel %vm10880_vm13, %v9865_v7, %v3812_v26  ;;  %v3828_v34 = vsel %vm10881_vm7, %v3812_v26, %v9865_v7 }
 0x7ac   : > { %3924 = vst [vmem:[%s9950_s4 + $0x58] sm:$0xff] %v3908_v18  ;;  %v3889_v36 = vmul.f32 %v3873_v61, %v9886_v25  ;;  %v3890_v58 = vmul.f32 %v3874_v24, %v9889_v59  ;;  %v3847_v2 = vsel %vm9895_vm10, %v10882_v19, %v3828_v34  ;;  %v3848_v43 = vsel %vm9899_vm14, %v10883_v40, %v3820_v12 }
 0x7ad   : > { %3919 = vst [vmem:[%s9950_s4 + $0x30] sm:$0xff] %v3903_v63  ;;  %v3877_v6 = vmax.f32 %v3861_v20, 0.0  ;;  %v3878_v35 = vmax.f32 %v3862_v38, 0.0  ;;  %v3863_v7 = vmul.f32 0.25, %v3847_v2  ;;  %v3864_v28 = vmul.f32 0.25, %v3848_v43 }
 0x7ae   : > { %v3579_v25 = vadd.f32 %v9842_v29, %v3547_v17  ;;  %v3580_v59 = vadd.f32 %v9851_v42, %v3548_v62  ;;  %3920 = vst [vmem:[%s9950_s4 + $0x38] sm:$0xff] %v3904_v5  ;;  %v3905_v27 = vadd.f32 %v4675_v55, %v3889_v36  ;;  %v3906_v50 = vadd.f32 %v4676_v32, %v3890_v58  ;;  %v4677_v29 = vld [vmem:[%s4734_s17 + $0x60] sm:$0xff]  ;;  %v4678_v42 = vld [vmem:[%s4734_s17 + $0x68] sm:$0xff]  ;;  %v4680_v17 = vld [vmem:[%s4734_s17 + $0x78] sm:$0xff] }
 0x7af   : > { %v3893_v37 = vmul.f32 %v3877_v6, %v3577_v9  ;;  %v3894_v16 = vmul.f32 %v3878_v35, %v3578_v60  ;;  %v3879_v47 = vmax.f32 %v3863_v7, 0.0  ;;  %v3880_v33 = vmax.f32 %v3864_v28, 0.0 }
 0x7b0   : > { %3921 = vst [vmem:[%s9950_s4 + $0x40] sm:$0xff] %v3905_v27 }
 0x7b1   : > { %3922 = vst [vmem:[%s9950_s4 + $0x48] sm:$0xff] %v3906_v50  ;;  %v3909_v1 = vadd.f32 %v4677_v29, %v3893_v37  ;;  %v3910_v45 = vadd.f32 %v4678_v42, %v3894_v16  ;;  %v3895_v15 = vmul.f32 %v3879_v47, %v3579_v25  ;;  %v3896_v8 = vmul.f32 %v3880_v33, %v3580_v59 }
 0x7b3   : > { %3925 = vst [vmem:[%s9950_s4 + $0x60] sm:$0xff] %v3909_v1  ;;  %v3911_v3 = vadd.f32 %v4679_v49, %v3895_v15  ;;  %v3912_v62 = vadd.f32 %v4680_v17, %v3896_v8 }
 0x7b4   : > { %3926 = vst [vmem:[%s9950_s4 + $0x68] sm:$0xff] %v3910_v45 }
 0x7b5   : > { %3927 = vst [vmem:[%s9950_s4 + $0x70] sm:$0xff] %v3911_v3 }
 0x7b6   : > { %3928 = vst [vmem:[%s9950_s4 + $0x78] sm:$0xff] %v3912_v62 }
 0x7b7 PF: > { %s13_s12 = sadd.s32 1, %s4687_s12  }
 0x7b8   : > { %p10_p4 = scmp.ge.s32.totalorder %s13_s12, 4  }
 0x7ba   :  { %12 = sbr.rel (!%p10_p4) target bundleno = 1 (0x1), region = 64 }

</bundles_post_ra>
